<compile_context>
chip_gen: v7x
topology: tpu7x:2x2x1
jax: 0.10.0
libtpu: 0.0.40
codegen_flags: <defaults>
</compile_context>

<pallas_src>
import functools
import math

import jax
import jax.numpy as jnp
from jax import lax
from jax.experimental import pallas as pl
from jax.experimental.pallas import tpu as pltpu


def _nonlocal_kernel(feat_ref, attn_ref, h_ref,
                     wqkv_ref, bqkv_ref,
                     w1_ref, b1_ref, w2_ref, b2_ref, w3_ref, b3_ref,
                     out_ref, *, bs, inv_sqrt_d):
    bf = jnp.bfloat16
    f32 = jnp.float32
    C = w3_ref.shape[0]
    N = attn_ref.shape[-1]

    # Fused Q/K/V projection: one (3C, C) x (C, bs*N) bf16 matmul, f32 accumulate,
    # then a single f32->bf16 cast; q/k/v are sliced from the bf16 tensor.
    qkv = (lax.dot_general(
        wqkv_ref[...], feat_ref[...].astype(bf),
        (((1,), (0,)), ((), ())),
        preferred_element_type=f32) + bqkv_ref[...]).astype(bf)      # (3C, bs*N)

    # Per-batch attention (bs is a small static python int -> unrolled).
    # Messages are kept as values (no VMEM scratch round trip) and concatenated
    # along the lane axis for a single lane-dense fc_message pass.
    msgs = []
    for b in range(bs):
        lo, hi = b * N, (b + 1) * N
        q = qkv[0 * C:1 * C, lo:hi]                                  # (C, N) bf16
        k = qkv[1 * C:2 * C, lo:hi]
        v = qkv[2 * C:3 * C, lo:hi]

        # feat_attention[o, i] = sum_c Q[c, o] * K[c, i] / sqrt(C / head)
        fa = lax.dot_general(q, k, (((0,), (0,)), ((), ())),
                             preferred_element_type=f32) * inv_sqrt_d  # (N, N) f32

        # attention_mask = (1 - H).masked_fill((1 - H).bool(), -1e9)
        #   == 0 where H == 1, -1e9 elsewhere.
        scores = attn_ref[b] * fa + jnp.where(h_ref[b] == 1.0, 0.0, -1.0e9)

        # softmax over the last axis (f32; max-subtract + EUP reciprocal).
        scores = scores - jnp.max(scores, axis=-1, keepdims=True)
        e = jnp.exp(scores)
        weight = e * pl.reciprocal(jnp.sum(e, axis=-1, keepdims=True), approx=True)

        # message[c, o] = sum_i weight[o, i] * V[c, i]   (only consumer is a bf16
        # matmul, so cast once here).
        msgs.append(lax.dot_general(
            v, weight.astype(bf), (((1,), (1,)), ((), ())),
            preferred_element_type=f32).astype(bf))                  # (C, N) bf16

    message = msgs[0] if bs == 1 else jnp.concatenate(msgs, axis=-1)  # (C, bs*N)

    # fc_message: conv1x1 -> (folded BN) -> ReLU -> conv1x1 -> (folded BN) -> ReLU -> conv1x1
    m1 = jnp.maximum(
        lax.dot_general(w1_ref[...], message, (((1,), (0,)), ((), ())),
                        preferred_element_type=f32) + b1_ref[...], 0.0)
    m2 = jnp.maximum(
        lax.dot_general(w2_ref[...], m1.astype(bf), (((1,), (0,)), ((), ())),
                        preferred_element_type=f32) + b2_ref[...], 0.0)
    m3 = lax.dot_general(w3_ref[...], m2.astype(bf), (((1,), (0,)), ((), ())),
                         preferred_element_type=f32) + b3_ref[...]

    # Residual: re-read feat here (it is resident in the input VMEM buffer) instead
    # of holding the (C, bs*N) f32 value live across the whole kernel.
    out_ref[...] = feat_ref[...] + m3


def pack_nonlocal_params(params):
    """One-time (model init) packing: fused bf16 QKV weight, column biases, bf16
    fc weights.  Keeping this out of the per-call path removes per-forward XLA
    launches / HBM round-trips comparable to the kernel's own runtime."""
    (wq, bq, wk, bk, wv, bv, w1, b1, w2, b2, w3, b3) = params
    bf = jnp.bfloat16
    f32 = jnp.float32
    wqkv = jnp.concatenate([wq, wk, wv], axis=0).astype(bf)           # (3C, C)
    bqkv = jnp.concatenate([bq, bk, bv], axis=0)[:, None].astype(f32)  # (3C, 1)
    return (wqkv, bqkv,
            w1.astype(bf), b1[:, None].astype(f32),
            w2.astype(bf), b2[:, None].astype(f32),
            w3.astype(bf), b3[:, None].astype(f32))


def _rep_spec(a):
    """Full-array block, same block for every grid step (weights / wide inputs)."""
    nd = a.ndim
    return pl.BlockSpec(a.shape, lambda i, _nd=nd: (0,) * _nd)


@functools.partial(jax.jit, static_argnames=("bs", "batch_grid"))
def nonlocal_block_wide(feat_wide, attention, H, packed, *, bs, batch_grid=False):
    """feat_wide: [C, bs*N]; attention/H: [bs, N, N]; returns [C, bs*N]."""
    C = feat_wide.shape[0]
    N = attention.shape[-1]
    inv_sqrt_d = 1.0 / math.sqrt(C)   # num_heads = 1

    if batch_grid:
        # One batch item per grid step; "parallel" lets v7x's two TensorCores
        # each take a batch item.  Weights use a constant index_map (no re-DMA).
        kernel = functools.partial(_nonlocal_kernel, bs=1, inv_sqrt_d=inv_sqrt_d)
        grid = (bs,)
        in_specs = [
            pl.BlockSpec((C, N), lambda b: (0, b)),          # feat_wide slice
            pl.BlockSpec((1, N, N), lambda b: (b, 0, 0)),    # attention[b]
            pl.BlockSpec((1, N, N), lambda b: (b, 0, 0)),    # H[b]
        ] + [_rep_spec(w) for w in packed]
        out_specs = pl.BlockSpec((C, N), lambda b: (0, b))
        semantics = ("parallel",)
    else:
        # Single grid step, batch collapsed into the lane axis (best on 1-TC
        # v5e/v6e: a bs-grid is just a serial loop with per-step overhead).
        kernel = functools.partial(_nonlocal_kernel, bs=bs, inv_sqrt_d=inv_sqrt_d)
        grid = (1,)
        in_specs = [_rep_spec(a) for a in (feat_wide, attention, H, *packed)]
        out_specs = pl.BlockSpec((C, bs * N), lambda i: (0, 0))
        semantics = ("arbitrary",)

    return pl.pallas_call(
        kernel,
        out_shape=jax.ShapeDtypeStruct((C, bs * N), jnp.float32),
        grid_spec=pltpu.PrefetchScalarGridSpec(
            num_scalar_prefetch=0,
            grid=grid,
            in_specs=in_specs,
            out_specs=out_specs,
        ),
        compiler_params=pltpu.CompilerParams(dimension_semantics=semantics),
    )(feat_wide, attention, H, *packed)


def _prefer_batch_grid():
    """Use the per-batch grid only on multi-TensorCore chips (v7x)."""
    try:
        kind = jax.devices()[0].device_kind.lower()
        return ("v7" in kind) or ("7x" in kind)
    except Exception:
        return False


def nonlocal_block_pallas(feat, attention, H, packed, *, batch_grid=None):
    """Convenience wrapper with the PyTorch [bs, C, N] interface.  Prefer carrying
    activations in [C, bs*N] across the HGNN and calling nonlocal_block_wide so
    these transposes happen once per network, not per block."""
    bs, C, N = feat.shape
    if batch_grid is None:
        batch_grid = _prefer_batch_grid()
    feat_wide = jnp.transpose(feat, (1, 0, 2)).reshape(C, bs * N)
    out_wide = nonlocal_block_wide(feat_wide, attention, H, packed,
                                   bs=bs, batch_grid=batch_grid)
    return jnp.transpose(out_wide.reshape(C, bs, N), (1, 0, 2))


def _fold_bn(w, b, gamma, beta, mean, var, eps=1e-5):
    """Fold eval-mode BatchNorm1d into the preceding 1x1 conv (w: [Co,Ci], b: [Co])."""
    s = gamma / jnp.sqrt(var + eps)
    return w * s[:, None], s * (b - mean) + beta


def _reference(feat, attention, H, params):
    """Pure-JAX reference with the SAME bf16 operand quantization / f32 accumulation
    as the kernel (isolates accumulation-order + approx-reciprocal differences)."""
    (wq, bq, wk, bk, wv, bv, w1, b1, w2, b2, w3, b3) = params
    bs, C, N = feat.shape
    bf = jnp.bfloat16
    inv_sqrt_d = 1.0 / math.sqrt(C)

    def conv1x1(w, x, b):
        y = jnp.einsum('oc,bcn->bon', w.astype(bf), x.astype(bf),
                       preferred_element_type=jnp.float32)
        return y + b[None, :, None]

    q = conv1x1(wq, feat, bq)
    k = conv1x1(wk, feat, bk)
    v = conv1x1(wv, feat, bv)
    fa = jnp.einsum('bco,bci->boi', q.astype(bf), k.astype(bf),
                    preferred_element_type=jnp.float32) * inv_sqrt_d
    am = jnp.where(H == 1.0, 0.0, -1.0e9)
    weight = jax.nn.softmax(attention * fa + am, axis=-1)
    message = jnp.einsum('boi,bci->bco', weight.astype(bf), v.astype(bf),
                         preferred_element_type=jnp.float32)
    m1 = jax.nn.relu(conv1x1(w1, message, b1))
    m2 = jax.nn.relu(conv1x1(w2, m1, b2))
    m3 = conv1x1(w3, m2, b3)
    return feat + m3


def make_params(key, num_channels=128):
    C, Ch = num_channels, num_channels // 2
    ks = jax.random.split(key, 20)
    std = 1.0 / math.sqrt(C)

    def u(k, shape, scale):
        return jax.random.uniform(k, shape, jnp.float32, -scale, scale)

    wq, bq = u(ks[0], (C, C), std), u(ks[1], (C,), std)
    wk, bk = u(ks[2], (C, C), std), u(ks[3], (C,), std)
    wv, bv = u(ks[4], (C, C), std), u(ks[5], (C,), std)

    # fc_message convs + BatchNorm params (gamma/beta/running_mean/running_var).
    w1, b1 = u(ks[6], (Ch, C), std), u(ks[7], (Ch,), std)
    g1 = jax.random.uniform(ks[8], (Ch,), jnp.float32, 0.5, 1.5)
    be1 = u(ks[9], (Ch,), 0.1)
    mu1 = u(ks[10], (Ch,), 0.1)
    va1 = jax.random.uniform(ks[11], (Ch,), jnp.float32, 0.5, 1.5)

    w2, b2 = u(ks[12], (Ch, Ch), 1.0 / math.sqrt(Ch)), u(ks[13], (Ch,), 1.0 / math.sqrt(Ch))
    g2 = jax.random.uniform(ks[14], (Ch,), jnp.float32, 0.5, 1.5)
    be2 = u(ks[15], (Ch,), 0.1)
    mu2 = u(ks[16], (Ch,), 0.1)
    va2 = jax.random.uniform(ks[17], (Ch,), jnp.float32, 0.5, 1.5)

    w3, b3 = u(ks[18], (C, Ch), 1.0 / math.sqrt(Ch)), u(ks[19], (C,), 1.0 / math.sqrt(Ch))

    # Fold eval-mode BN into the conv that precedes it.
    w1f, b1f = _fold_bn(w1, b1, g1, be1, mu1, va1)
    w2f, b2f = _fold_bn(w2, b2, g2, be2, mu2, va2)

    return (wq, bq, wk, bk, wv, bv, w1f, b1f, w2f, b2f, w3, b3)


if __name__ == "__main__":
    bs, C, N = 2, 128, 128   # num_channels=128 (module default), num_corr=128

    key = jax.random.PRNGKey(0)
    k_feat, k_attn, k_h, k_par = jax.random.split(key, 4)

    feat = jax.random.normal(k_feat, (bs, C, N), jnp.float32)
    attention = jax.random.uniform(k_attn, (bs, N, N), jnp.float32)
    H = (jax.random.uniform(k_h, (bs, N, N), jnp.float32) > 0.5).astype(jnp.float32)

    params = make_params(k_par, num_channels=C)
    packed = pack_nonlocal_params(params)          # one-time init-style packing

    # Layout conversion happens once at the network boundary; activations would be
    # carried wide ([C, bs*N]) across HGNN blocks.
    feat_wide = jnp.transpose(feat, (1, 0, 2)).reshape(C, bs * N)

    ref = _reference(feat, attention, H, params)

    # Validate both layouts: single-step (default on 1-TC v5e/v6e) and per-batch
    # grid (used on 2-TC v7x via _prefer_batch_grid()).
    for batch_grid in (False, True):
        out_wide = nonlocal_block_wide(feat_wide, attention, H, packed,
                                       bs=bs, batch_grid=batch_grid)
        out = jnp.transpose(out_wide.reshape(C, bs, N), (1, 0, 2))
        out = jax.block_until_ready(out)
        assert out.shape == (bs, C, N)
        err = jnp.max(jnp.abs(out - ref))
        assert jnp.allclose(out, ref, rtol=2e-3, atol=2e-3), \
            f"mismatch (batch_grid={batch_grid}): max abs err {err}"

    print("KERNEL_OK")
</pallas_src>

<mosaic_0001>
module attributes {stable_mosaic.version = 11 : i64} {
  func.func @_nonlocal_kernel(%arg0: i32, %arg1: memref<128x256xf32, #tpu.memory_space<vmem>>, %arg2: memref<2x128x128xf32, #tpu.memory_space<vmem>>, %arg3: memref<2x128x128xf32, #tpu.memory_space<vmem>>, %arg4: memref<384x128xbf16, #tpu.memory_space<vmem>>, %arg5: memref<384x1xf32, #tpu.memory_space<vmem>>, %arg6: memref<64x128xbf16, #tpu.memory_space<vmem>>, %arg7: memref<64x1xf32, #tpu.memory_space<vmem>>, %arg8: memref<64x64xbf16, #tpu.memory_space<vmem>>, %arg9: memref<64x1xf32, #tpu.memory_space<vmem>>, %arg10: memref<128x64xbf16, #tpu.memory_space<vmem>>, %arg11: memref<128x1xf32, #tpu.memory_space<vmem>>, %arg12: memref<128x256xf32, #tpu.memory_space<vmem>>) attributes {dimension_semantics = [#tpu.dimension_semantics<arbitrary>], iteration_bounds = array<i64: 1>, scalar_prefetch = 0 : i64, scratch_operands = 0 : i64, tpu.core_type = #tpu.core_type<tc>, window_params = [{pipeline_mode = #tpu.pipeline_mode<synchronous>, transform_indices = @transform_0, window_bounds = array<i64: 128, 256>}, {pipeline_mode = #tpu.pipeline_mode<synchronous>, transform_indices = @transform_1, window_bounds = array<i64: 2, 128, 128>}, {pipeline_mode = #tpu.pipeline_mode<synchronous>, transform_indices = @transform_2, window_bounds = array<i64: 2, 128, 128>}, {pipeline_mode = #tpu.pipeline_mode<synchronous>, transform_indices = @transform_3, window_bounds = array<i64: 384, 128>}, {pipeline_mode = #tpu.pipeline_mode<synchronous>, transform_indices = @transform_4, window_bounds = array<i64: 384, 1>}, {pipeline_mode = #tpu.pipeline_mode<synchronous>, transform_indices = @transform_5, window_bounds = array<i64: 64, 128>}, {pipeline_mode = #tpu.pipeline_mode<synchronous>, transform_indices = @transform_6, window_bounds = array<i64: 64, 1>}, {pipeline_mode = #tpu.pipeline_mode<synchronous>, transform_indices = @transform_7, window_bounds = array<i64: 64, 64>}, {pipeline_mode = #tpu.pipeline_mode<synchronous>, transform_indices = @transform_8, window_bounds = array<i64: 64, 1>}, {pipeline_mode = #tpu.pipeline_mode<synchronous>, transform_indices = @transform_9, window_bounds = array<i64: 128, 64>}, {pipeline_mode = #tpu.pipeline_mode<synchronous>, transform_indices = @transform_10, window_bounds = array<i64: 128, 1>}, {pipeline_mode = #tpu.pipeline_mode<synchronous>, transform_indices = @transform_11, window_bounds = array<i64: 128, 256>}]} {
    %c0 = arith.constant 0 : index
    %c0_0 = arith.constant 0 : index
    %0 = vector.load %arg4[%c0, %c0_0] : memref<384x128xbf16, #tpu.memory_space<vmem>>, vector<384x128xbf16>
    %c0_1 = arith.constant 0 : index
    %c0_2 = arith.constant 0 : index
    %1 = vector.load %arg1[%c0_1, %c0_2] : memref<128x256xf32, #tpu.memory_space<vmem>>, vector<128x256xf32>
    %2 = arith.truncf %1 : vector<128x256xf32> to vector<128x256xbf16>
    %cst = arith.constant dense<0.000000e+00> : vector<384x256xf32>
    %3 = tpu.matmul %0, %2, %cst {dimension_numbers = #tpu.dot_dimension_numbers<[1], [0], [0], [1], [0, 0, 1, 1], [], []>} : vector<384x128xbf16>, vector<128x256xbf16>, vector<384x256xf32> -> vector<384x256xf32>
    %c0_3 = arith.constant 0 : index
    %c0_4 = arith.constant 0 : index
    %4 = vector.load %arg5[%c0_3, %c0_4] : memref<384x1xf32, #tpu.memory_space<vmem>>, vector<384x1xf32>
    %5 = vector.broadcast %4 : vector<384x1xf32> to vector<384x256xf32>
    %6 = arith.addf %3, %5 : vector<384x256xf32>
    %7 = arith.truncf %6 : vector<384x256xf32> to vector<384x256xbf16>
    %8 = vector.extract_strided_slice %7 {offsets = [0, 0], sizes = [128, 128], strides = [1, 1]} : vector<384x256xbf16> to vector<128x128xbf16>
    %9 = vector.extract_strided_slice %7 {offsets = [128, 0], sizes = [128, 128], strides = [1, 1]} : vector<384x256xbf16> to vector<128x128xbf16>
    %10 = vector.extract_strided_slice %7 {offsets = [256, 0], sizes = [128, 128], strides = [1, 1]} : vector<384x256xbf16> to vector<128x128xbf16>
    %cst_5 = arith.constant dense<0.000000e+00> : vector<128x128xf32>
    %11 = tpu.matmul %8, %9, %cst_5 {dimension_numbers = #tpu.dot_dimension_numbers<[0], [0], [1], [1], [0, 1, 1, 1], [], []>} : vector<128x128xbf16>, vector<128x128xbf16>, vector<128x128xf32> -> vector<128x128xf32>
    %cst_6 = arith.constant 0.0883883461 : f32
    %12 = vector.broadcast %cst_6 : f32 to vector<128x128xf32>
    %13 = arith.mulf %11, %12 : vector<128x128xf32>
    %c0_7 = arith.constant 0 : index
    %c0_8 = arith.constant 0 : index
    %c0_9 = arith.constant 0 : index
    %14 = vector.load %arg2[%c0_7, %c0_8, %c0_9] : memref<2x128x128xf32, #tpu.memory_space<vmem>>, vector<1x128x128xf32>
    %15 = vector.shape_cast %14 : vector<1x128x128xf32> to vector<128x128xf32>
    %16 = arith.mulf %15, %13 : vector<128x128xf32>
    %c0_10 = arith.constant 0 : index
    %c0_11 = arith.constant 0 : index
    %c0_12 = arith.constant 0 : index
    %17 = vector.load %arg3[%c0_10, %c0_11, %c0_12] : memref<2x128x128xf32, #tpu.memory_space<vmem>>, vector<1x128x128xf32>
    %18 = vector.shape_cast %17 : vector<1x128x128xf32> to vector<128x128xf32>
    %cst_13 = arith.constant 1.000000e+00 : f32
    %19 = vector.broadcast %cst_13 : f32 to vector<128x128xf32>
    %20 = arith.cmpf oeq, %18, %19 : vector<128x128xf32>
    %cst_14 = arith.constant 0.000000e+00 : f32
    %cst_15 = arith.constant -1.000000e+09 : f32
    %21 = vector.broadcast %cst_14 : f32 to vector<128x128xf32>
    %22 = vector.broadcast %cst_15 : f32 to vector<128x128xf32>
    %23 = arith.select %20, %21, %22 : vector<128x128xi1>, vector<128x128xf32>
    %24 = arith.addf %16, %23 : vector<128x128xf32>
    %cst_16 = arith.constant dense<0xFF800000> : vector<128xf32>
    %25 = vector.multi_reduction <maximumf>, %24, %cst_16 [1] : vector<128x128xf32> to vector<128xf32>
    %26 = vector.shape_cast %25 : vector<128xf32> to vector<128x1xf32>
    %27 = vector.broadcast %26 : vector<128x1xf32> to vector<128x128xf32>
    %28 = arith.subf %24, %27 : vector<128x128xf32>
    %29 = math.exp %28 : vector<128x128xf32>
    %cst_17 = arith.constant dense<0.000000e+00> : vector<128xf32>
    %30 = vector.multi_reduction <add>, %29, %cst_17 [1] : vector<128x128xf32> to vector<128xf32>
    %31 = vector.shape_cast %30 : vector<128xf32> to vector<128x1xf32>
    %32 = tpu.reciprocal %31 {approx = true} : vector<128x1xf32> -> vector<128x1xf32>
    %33 = vector.broadcast %32 : vector<128x1xf32> to vector<128x128xf32>
    %34 = arith.mulf %29, %33 : vector<128x128xf32>
    %35 = arith.truncf %34 : vector<128x128xf32> to vector<128x128xbf16>
    %cst_18 = arith.constant dense<0.000000e+00> : vector<128x128xf32>
    %36 = tpu.matmul %10, %35, %cst_18 {dimension_numbers = #tpu.dot_dimension_numbers<[1], [1], [0], [0], [0, 0, 1, 0], [], []>} : vector<128x128xbf16>, vector<128x128xbf16>, vector<128x128xf32> -> vector<128x128xf32>
    %37 = arith.truncf %36 : vector<128x128xf32> to vector<128x128xbf16>
    %38 = vector.extract_strided_slice %7 {offsets = [0, 128], sizes = [128, 128], strides = [1, 1]} : vector<384x256xbf16> to vector<128x128xbf16>
    %39 = vector.extract_strided_slice %7 {offsets = [128, 128], sizes = [128, 128], strides = [1, 1]} : vector<384x256xbf16> to vector<128x128xbf16>
    %40 = vector.extract_strided_slice %7 {offsets = [256, 128], sizes = [128, 128], strides = [1, 1]} : vector<384x256xbf16> to vector<128x128xbf16>
    %cst_19 = arith.constant dense<0.000000e+00> : vector<128x128xf32>
    %41 = tpu.matmul %38, %39, %cst_19 {dimension_numbers = #tpu.dot_dimension_numbers<[0], [0], [1], [1], [0, 1, 1, 1], [], []>} : vector<128x128xbf16>, vector<128x128xbf16>, vector<128x128xf32> -> vector<128x128xf32>
    %cst_20 = arith.constant 0.0883883461 : f32
    %42 = vector.broadcast %cst_20 : f32 to vector<128x128xf32>
    %43 = arith.mulf %41, %42 : vector<128x128xf32>
    %c1 = arith.constant 1 : index
    %c0_21 = arith.constant 0 : index
    %c0_22 = arith.constant 0 : index
    %44 = vector.load %arg2[%c1, %c0_21, %c0_22] : memref<2x128x128xf32, #tpu.memory_space<vmem>>, vector<1x128x128xf32>
    %45 = vector.shape_cast %44 : vector<1x128x128xf32> to vector<128x128xf32>
    %46 = arith.mulf %45, %43 : vector<128x128xf32>
    %c1_23 = arith.constant 1 : index
    %c0_24 = arith.constant 0 : index
    %c0_25 = arith.constant 0 : index
    %47 = vector.load %arg3[%c1_23, %c0_24, %c0_25] : memref<2x128x128xf32, #tpu.memory_space<vmem>>, vector<1x128x128xf32>
    %48 = vector.shape_cast %47 : vector<1x128x128xf32> to vector<128x128xf32>
    %cst_26 = arith.constant 1.000000e+00 : f32
    %49 = vector.broadcast %cst_26 : f32 to vector<128x128xf32>
    %50 = arith.cmpf oeq, %48, %49 : vector<128x128xf32>
    %cst_27 = arith.constant 0.000000e+00 : f32
    %cst_28 = arith.constant -1.000000e+09 : f32
    %51 = vector.broadcast %cst_27 : f32 to vector<128x128xf32>
    %52 = vector.broadcast %cst_28 : f32 to vector<128x128xf32>
    %53 = arith.select %50, %51, %52 : vector<128x128xi1>, vector<128x128xf32>
    %54 = arith.addf %46, %53 : vector<128x128xf32>
    %cst_29 = arith.constant dense<0xFF800000> : vector<128xf32>
    %55 = vector.multi_reduction <maximumf>, %54, %cst_29 [1] : vector<128x128xf32> to vector<128xf32>
    %56 = vector.shape_cast %55 : vector<128xf32> to vector<128x1xf32>
    %57 = vector.broadcast %56 : vector<128x1xf32> to vector<128x128xf32>
    %58 = arith.subf %54, %57 : vector<128x128xf32>
    %59 = math.exp %58 : vector<128x128xf32>
    %cst_30 = arith.constant dense<0.000000e+00> : vector<128xf32>
    %60 = vector.multi_reduction <add>, %59, %cst_30 [1] : vector<128x128xf32> to vector<128xf32>
    %61 = vector.shape_cast %60 : vector<128xf32> to vector<128x1xf32>
    %62 = tpu.reciprocal %61 {approx = true} : vector<128x1xf32> -> vector<128x1xf32>
    %63 = vector.broadcast %62 : vector<128x1xf32> to vector<128x128xf32>
    %64 = arith.mulf %59, %63 : vector<128x128xf32>
    %65 = arith.truncf %64 : vector<128x128xf32> to vector<128x128xbf16>
    %cst_31 = arith.constant dense<0.000000e+00> : vector<128x128xf32>
    %66 = tpu.matmul %40, %65, %cst_31 {dimension_numbers = #tpu.dot_dimension_numbers<[1], [1], [0], [0], [0, 0, 1, 0], [], []>} : vector<128x128xbf16>, vector<128x128xbf16>, vector<128x128xf32> -> vector<128x128xf32>
    %67 = arith.truncf %66 : vector<128x128xf32> to vector<128x128xbf16>
    %68 = tpu.concatenate %37, %67 in 1 : vector<128x128xbf16>, vector<128x128xbf16> -> vector<128x256xbf16>
    %c0_32 = arith.constant 0 : index
    %c0_33 = arith.constant 0 : index
    %69 = vector.load %arg6[%c0_32, %c0_33] : memref<64x128xbf16, #tpu.memory_space<vmem>>, vector<64x128xbf16>
    %cst_34 = arith.constant dense<0.000000e+00> : vector<64x256xf32>
    %70 = tpu.matmul %69, %68, %cst_34 {dimension_numbers = #tpu.dot_dimension_numbers<[1], [0], [0], [1], [0, 0, 1, 1], [], []>} : vector<64x128xbf16>, vector<128x256xbf16>, vector<64x256xf32> -> vector<64x256xf32>
    %c0_35 = arith.constant 0 : index
    %c0_36 = arith.constant 0 : index
    %71 = vector.load %arg7[%c0_35, %c0_36] : memref<64x1xf32, #tpu.memory_space<vmem>>, vector<64x1xf32>
    %72 = vector.broadcast %71 : vector<64x1xf32> to vector<64x256xf32>
    %73 = arith.addf %70, %72 : vector<64x256xf32>
    %cst_37 = arith.constant 0.000000e+00 : f32
    %74 = vector.broadcast %cst_37 : f32 to vector<64x256xf32>
    %75 = arith.maximumf %73, %74 : vector<64x256xf32>
    %c0_38 = arith.constant 0 : index
    %c0_39 = arith.constant 0 : index
    %76 = vector.load %arg8[%c0_38, %c0_39] : memref<64x64xbf16, #tpu.memory_space<vmem>>, vector<64x64xbf16>
    %77 = arith.truncf %75 : vector<64x256xf32> to vector<64x256xbf16>
    %cst_40 = arith.constant dense<0.000000e+00> : vector<64x256xf32>
    %78 = tpu.matmul %76, %77, %cst_40 {dimension_numbers = #tpu.dot_dimension_numbers<[1], [0], [0], [1], [0, 0, 1, 1], [], []>} : vector<64x64xbf16>, vector<64x256xbf16>, vector<64x256xf32> -> vector<64x256xf32>
    %c0_41 = arith.constant 0 : index
    %c0_42 = arith.constant 0 : index
    %79 = vector.load %arg9[%c0_41, %c0_42] : memref<64x1xf32, #tpu.memory_space<vmem>>, vector<64x1xf32>
    %80 = vector.broadcast %79 : vector<64x1xf32> to vector<64x256xf32>
    %81 = arith.addf %78, %80 : vector<64x256xf32>
    %cst_43 = arith.constant 0.000000e+00 : f32
    %82 = vector.broadcast %cst_43 : f32 to vector<64x256xf32>
    %83 = arith.maximumf %81, %82 : vector<64x256xf32>
    %c0_44 = arith.constant 0 : index
    %c0_45 = arith.constant 0 : index
    %84 = vector.load %arg10[%c0_44, %c0_45] : memref<128x64xbf16, #tpu.memory_space<vmem>>, vector<128x64xbf16>
    %85 = arith.truncf %83 : vector<64x256xf32> to vector<64x256xbf16>
    %cst_46 = arith.constant dense<0.000000e+00> : vector<128x256xf32>
    %86 = tpu.matmul %84, %85, %cst_46 {dimension_numbers = #tpu.dot_dimension_numbers<[1], [0], [0], [1], [0, 0, 1, 1], [], []>} : vector<128x64xbf16>, vector<64x256xbf16>, vector<128x256xf32> -> vector<128x256xf32>
    %c0_47 = arith.constant 0 : index
    %c0_48 = arith.constant 0 : index
    %87 = vector.load %arg11[%c0_47, %c0_48] : memref<128x1xf32, #tpu.memory_space<vmem>>, vector<128x1xf32>
    %88 = vector.broadcast %87 : vector<128x1xf32> to vector<128x256xf32>
    %89 = arith.addf %86, %88 : vector<128x256xf32>
    %c0_49 = arith.constant 0 : index
    %c0_50 = arith.constant 0 : index
    %90 = vector.load %arg1[%c0_49, %c0_50] : memref<128x256xf32, #tpu.memory_space<vmem>>, vector<128x256xf32>
    %91 = arith.addf %90, %89 : vector<128x256xf32>
    %c0_51 = arith.constant 0 : index
    %c0_52 = arith.constant 0 : index
    %92 = vector.load %arg12[%c0_51, %c0_52] : memref<128x256xf32, #tpu.memory_space<vmem>>, vector<128x256xf32>
    tpu.vector_store %arg12[%c0_51, %c0_52], %91 {strides = array<i32>} : memref<128x256xf32, #tpu.memory_space<vmem>>, vector<128x256xf32>,
    return
  }
  func.func @transform_0(%arg0: i32) -> (i32, i32) {
    %c0_i32 = arith.constant 0 : i32
    %c0_i32_0 = arith.constant 0 : i32
    %c0_i32_1 = arith.constant 0 : i32
    return %c0_i32, %c0_i32_0 : i32, i32
  }
  func.func @transform_1(%arg0: i32) -> (i32, i32, i32) {
    %c0_i32 = arith.constant 0 : i32
    %c0_i32_0 = arith.constant 0 : i32
    %c0_i32_1 = arith.constant 0 : i32
    %c0_i32_2 = arith.constant 0 : i32
    return %c0_i32, %c0_i32_0, %c0_i32_1 : i32, i32, i32
  }
  func.func @transform_2(%arg0: i32) -> (i32, i32, i32) {
    %c0_i32 = arith.constant 0 : i32
    %c0_i32_0 = arith.constant 0 : i32
    %c0_i32_1 = arith.constant 0 : i32
    %c0_i32_2 = arith.constant 0 : i32
    return %c0_i32, %c0_i32_0, %c0_i32_1 : i32, i32, i32
  }
  func.func @transform_3(%arg0: i32) -> (i32, i32) {
    %c0_i32 = arith.constant 0 : i32
    %c0_i32_0 = arith.constant 0 : i32
    %c0_i32_1 = arith.constant 0 : i32
    return %c0_i32, %c0_i32_0 : i32, i32
  }
  func.func @transform_4(%arg0: i32) -> (i32, i32) {
    %c0_i32 = arith.constant 0 : i32
    %c0_i32_0 = arith.constant 0 : i32
    %c0_i32_1 = arith.constant 0 : i32
    return %c0_i32, %c0_i32_0 : i32, i32
  }
  func.func @transform_5(%arg0: i32) -> (i32, i32) {
    %c0_i32 = arith.constant 0 : i32
    %c0_i32_0 = arith.constant 0 : i32
    %c0_i32_1 = arith.constant 0 : i32
    return %c0_i32, %c0_i32_0 : i32, i32
  }
  func.func @transform_6(%arg0: i32) -> (i32, i32) {
    %c0_i32 = arith.constant 0 : i32
    %c0_i32_0 = arith.constant 0 : i32
    %c0_i32_1 = arith.constant 0 : i32
    return %c0_i32, %c0_i32_0 : i32, i32
  }
  func.func @transform_7(%arg0: i32) -> (i32, i32) {
    %c0_i32 = arith.constant 0 : i32
    %c0_i32_0 = arith.constant 0 : i32
    %c0_i32_1 = arith.constant 0 : i32
    return %c0_i32, %c0_i32_0 : i32, i32
  }
  func.func @transform_8(%arg0: i32) -> (i32, i32) {
    %c0_i32 = arith.constant 0 : i32
    %c0_i32_0 = arith.constant 0 : i32
    %c0_i32_1 = arith.constant 0 : i32
    return %c0_i32, %c0_i32_0 : i32, i32
  }
  func.func @transform_9(%arg0: i32) -> (i32, i32) {
    %c0_i32 = arith.constant 0 : i32
    %c0_i32_0 = arith.constant 0 : i32
    %c0_i32_1 = arith.constant 0 : i32
    return %c0_i32, %c0_i32_0 : i32, i32
  }
  func.func @transform_10(%arg0: i32) -> (i32, i32) {
    %c0_i32 = arith.constant 0 : i32
    %c0_i32_0 = arith.constant 0 : i32
    %c0_i32_1 = arith.constant 0 : i32
    return %c0_i32, %c0_i32_0 : i32, i32
  }
  func.func @transform_11(%arg0: i32) -> (i32, i32) {
    %c0_i32 = arith.constant 0 : i32
    %c0_i32_0 = arith.constant 0 : i32
    %c0_i32_1 = arith.constant 0 : i32
    return %c0_i32, %c0_i32_0 : i32, i32
  }
}

</mosaic_0001>

<bundles_post_ra>
// kernel: nonlocal_block_wide.1
= control target key start
LH: loop header
LB: loop body
LE: loop exit
PB: predicated region body
PF: predicated region fallthrough
CT: control target
= control target key end

     0   :  { %16 = vsyncpa [#allocation3], 0  ;;  %s4619_s0 = inlined_call_operand.vmem [shape: f32[128,256], index: 0, kind: input, shape index: {}]   ;;  %s4620_s1 = inlined_call_operand.vmem [shape: f32[2,128,128], index: 1, kind: input, shape index: {}]   ;;  %s4621_s2 = inlined_call_operand.hbm [shape: f32[2,128,128], index: 2, kind: input, shape index: {}]   ;;  %s4622_s3 = inlined_call_operand.vmem [shape: bf16[384,128], index: 3, kind: input, shape index: {}]   ;;  %s4623_s4 = inlined_call_operand.vmem [shape: f32[384,1], index: 4, kind: input, shape index: {}]   ;;  %s4624_s5 = inlined_call_operand.vmem [shape: bf16[64,128], index: 5, kind: input, shape index: {}]   ;;  %s4625_s6 = inlined_call_operand.vmem [shape: f32[64,1], index: 6, kind: input, shape index: {}]   ;;  %s4626_s7 = inlined_call_operand.hbm [shape: bf16[64,64], index: 7, kind: input, shape index: {}]   ;;  %s4627_s8 = inlined_call_operand.vmem [shape: f32[64,1], index: 8, kind: input, shape index: {}]   ;;  %s4628_s9 = inlined_call_operand.vmem [shape: bf16[128,64], index: 9, kind: input, shape index: {}]   ;;  %s4629_s10 = inlined_call_operand.vmem [shape: f32[128,1], index: 10, kind: input, shape index: {}]   ;;  %s4630_s11 = inlined_call_operand.hbm [shape: f32[128,256], index: 11, kind: output, shape index: {}]  }
   0x1   :  { %17 = vsyncpa [#allocation6], 0 }
   0x2   :  { %18 = vsyncpa [#allocation4], 0  ;;  %s3178_s17 = smov [#allocation2]   ;;  %s3106_s21 = scalar_lea.hbm %s4621_s2, 4096 }
   0x3   :  { %s28_s18 = sshll.u32 %s3178_s17, 4  ;;  %p3107_p0 = scmp.ne.s32.totalorder %s4621_s2, %s3106_s21  ;;  %s29_s18 = int_to_ptr.vmem [resolvable:$true] %s28_s18 }
   0x4   :  { %p3110_p1 = scmp.lt.u32.totalorder %s3106_s21, %s4621_s2 }
   0x6   :  { %p3112_p2 = pnand %p3110_p1, %p3107_p0 }
   0x8   :  { %3115 = shalt.err (!%p3112_p2)
}
   0x9   :  { %s3116_s26 = scalar_lea.vmem %s29_s18, 4096  ;;  %p3121_p4 = scmp.lt.s32.totalorder %s29_s18, %s29_s18 }
   0xa   :  { %p3117_p3 = scmp.ne.s32.totalorder %s29_s18, %s3116_s26  ;;  %p3122_p5 = scmp.lt.s32.totalorder %s3116_s26, %s3116_s26 }
   0xc   :  { %p3123_p6 = por %p3122_p5, %p3121_p4 }
   0xe   :  { %p3124_p7 = pnand %p3123_p6, %p3117_p3 }
  0x10   :  { %3127 = shalt.err (!%p3124_p7)
}
  0x11   :  { %s3179_s27 = smov 128   ;;  %s3180_s28 = smov 8  }
  0x12   :  { %34 = dma.hbm_to_vmem [thread:$0]  %s4621_s2, 4096, %s29_s18, [#allocation3], %s3179_s27, %s3179_s27, %s3180_s28  }
  0x13   :  { %s3181_s12 = smov [#allocation5]   ;;  %s3128_s16 = scalar_lea.hbm %s4626_s7, 512 }
  0x14   :  { %s48_s13 = sshll.u32 %s3181_s12, 4  ;;  %p3129_p8 = scmp.ne.s32.totalorder %s4626_s7, %s3128_s16  ;;  %s49_s13 = int_to_ptr.vmem [resolvable:$true] %s48_s13 }
  0x15   :  { %p3132_p9 = scmp.lt.u32.totalorder %s3128_s16, %s4626_s7 }
  0x17   :  { %p3134_p10 = pnand %p3132_p9, %p3129_p8 }
  0x19   :  { %3137 = shalt.err (!%p3134_p10)
}
  0x1a   :  { %s3138_s22 = scalar_lea.vmem %s49_s13, 512  ;;  %p3143_p12 = scmp.lt.s32.totalorder %s49_s13, %s49_s13 }
  0x1b   :  { %p3139_p11 = scmp.ne.s32.totalorder %s49_s13, %s3138_s22  ;;  %p3144_p13 = scmp.lt.s32.totalorder %s3138_s22, %s3138_s22 }
  0x1d   :  { %p3145_p0 = por %p3144_p13, %p3143_p12 }
  0x1f   :  { %p3146_p1 = pnand %p3145_p0, %p3139_p11 }
  0x21   :  { %3149 = shalt.err (!%p3146_p1)
}
  0x22   :  { %s3182_s2 = smov 64   ;;  %s3183_s18 = smov 4  }
  0x23   :  { %54 = dma.hbm_to_vmem [thread:$0]  %s4626_s7, 512, %s49_s13, [#allocation6], %s3182_s2, %s3182_s2, %s3183_s18  }
  0x24   :  { %3172 = dma.done.wait [#allocation3], 4096  }
  0x25   :  { %3173 = vsyncadd [#allocation3], 4294963200 }
  0x26   :  { %3174 = dma.done.wait [#allocation6], 512  }
  0x27   :  { %3175 = vsyncadd [#allocation6], 4294966784  ;;  %v4631_v0 = vmov 0   ;;  %v117_v1 = vld [vmem:[%s4619_s0 + $0x8] sm:$0xff]  ;;  %v119_v2 = vld [vmem:[%s4619_s0 + $0x18] sm:$0xff]  ;;  %s3186_s25 = smov [#allocation7]  }
  0x28   :  { %628 = vmatprep.mubr.bf16.mxu0 %v4631_v0  ;;  %2904 = vset.pattern.permute.xlu0 %v4631_v0  ;;  %v116_v3 = vld [vmem:[%s4619_s0] sm:$0xff]  ;;  %v149_v4 = vpack.c.bf16 %v119_v2, %v117_v1  ;;  %v118_v5 = vld [vmem:[%s4619_s0 + $0x10] sm:$0xff]  ;;  %v121_v6 = vld [vmem:[%s4619_s0 + $0x28] sm:$0xff]  ;;  %s2604_s26 = sshll.u32 %s3186_s25, 4  ;;  %s2605_s26 = int_to_ptr.vmem [resolvable:$true] %s2604_s26 }
  0x29   :  { %2905 = vset.pattern.permute.xlu1 %v4631_v0  ;;  %828 = vmatprep.mubr.bf16.mxu1 %v4631_v0  ;;  %v123_v7 = vld [vmem:[%s4619_s0 + $0x38] sm:$0xff]  ;;  %v148_v8 = vpack.c.bf16 %v118_v5, %v116_v3  ;;  %v120_v10 = vld [vmem:[%s4619_s0 + $0x20] sm:$0xff]  ;;  %v122_v11 = vld [vmem:[%s4619_s0 + $0x30] sm:$0xff]  ;;  %p3155_p3 = scmp.lt.s32.totalorder %s2605_s26, %s2605_s26 }
  0x2a   :  { %v151_v9 = vpack.c.bf16 %v123_v7, %v121_v6  ;;  %v125_v12 = vld [vmem:[%s4619_s0 + $0x48] sm:$0xff]  ;;  %596 = vmatprep.subr.bf16.mxu0 %v149_v4  ;;  %v127_v13 = vld [vmem:[%s4619_s0 + $0x58] sm:$0xff]  ;;  %2877 = vmatprep.subr.bf16.mxu1 %v149_v4  ;;  %v150_v14 = vpack.c.bf16 %v122_v11, %v120_v10  ;;  %v124_v16 = vld [vmem:[%s4619_s0 + $0x40] sm:$0xff] }
  0x2b   :  { %597 = vmatpush1.bf16.msra.mxu0 %v148_v8  ;;  %2885 = vmatpush1.bf16.msra.mxu1 %v148_v8  ;;  %v153_v15 = vpack.c.bf16 %v127_v13, %v125_v12  ;;  %v126_v17 = vld [vmem:[%s4619_s0 + $0x50] sm:$0xff]  ;;  %v129_v18 = vld [vmem:[%s4619_s0 + $0x68] sm:$0xff]  ;;  %v131_v19 = vld [vmem:[%s4619_s0 + $0x78] sm:$0xff] }
  0x2c   :  { %598 = vmatprep.subr.bf16.mxu0 %v151_v9  ;;  %2878 = vmatprep.subr.bf16.mxu1 %v151_v9  ;;  %v152_v20 = vpack.c.bf16 %v126_v17, %v124_v16  ;;  %v155_v21 = vpack.c.bf16 %v131_v19, %v129_v18  ;;  %v128_v22 = vld [vmem:[%s4619_s0 + $0x60] sm:$0xff]  ;;  %v130_v23 = vld [vmem:[%s4619_s0 + $0x70] sm:$0xff]  ;;  %v133_v24 = vld [vmem:[%s4619_s0 + $0x88] sm:$0xff] }
  0x2d   :  { %v135_v25 = vld [vmem:[%s4619_s0 + $0x98] sm:$0xff]  ;;  %v132_v26 = vld [vmem:[%s4619_s0 + $0x80] sm:$0xff]  ;;  %v154_v27 = vpack.c.bf16 %v130_v23, %v128_v22  ;;  %v134_v28 = vld [vmem:[%s4619_s0 + $0x90] sm:$0xff] }
  0x2e   :  { %v157_v29 = vpack.c.bf16 %v135_v25, %v133_v24  ;;  %v137_v30 = vld [vmem:[%s4619_s0 + $0xa8] sm:$0xff]  ;;  %v139_v31 = vld [vmem:[%s4619_s0 + $0xb8] sm:$0xff]  ;;  %v136_v32 = vld [vmem:[%s4619_s0 + $0xa0] sm:$0xff]  ;;  %v156_v33 = vpack.c.bf16 %v134_v28, %v132_v26 }
  0x2f   :  { %599 = vmatpush1.bf16.msra.mxu0 %v150_v14  ;;  %2886 = vmatpush1.bf16.msra.mxu1 %v150_v14  ;;  %v138_v34 = vld [vmem:[%s4619_s0 + $0xb0] sm:$0xff]  ;;  %v159_v35 = vpack.c.bf16 %v139_v31, %v137_v30  ;;  %v141_v36 = vld [vmem:[%s4619_s0 + $0xc8] sm:$0xff]  ;;  %v164_v37 = vld [vmem:[%s4623_s4] sm:$0xff] }
  0x30   :  { %600 = vmatprep.subr.bf16.mxu0 %v153_v15  ;;  %2879 = vmatprep.subr.bf16.mxu1 %v153_v15  ;;  %v143_v38 = vld [vmem:[%s4619_s0 + $0xd8] sm:$0xff]  ;;  %v166_v39 = vld [vmem:[%s4623_s4 + $0x10] sm:$0xff]  ;;  %v165_v40 = vld [vmem:[%s4623_s4 + $0x8] sm:$0xff]  ;;  %v158_v41 = vpack.c.bf16 %v138_v34, %v136_v32 }
  0x31   :  { %214 = vperm.xlu0 %2904, %v164_v37   ;;  %224 = vperm.xlu1 %2905, %v166_v39   ;;  %v140_v42 = vld [vmem:[%s4619_s0 + $0xc0] sm:$0xff]  ;;  %v167_v43 = vld [vmem:[%s4623_s4 + $0x18] sm:$0xff]  ;;  %v161_v44 = vpack.c.bf16 %v143_v38, %v141_v36  ;;  %v142_v45 = vld [vmem:[%s4619_s0 + $0xd0] sm:$0xff] }
  0x32   :  { %v145_v46 = vld [vmem:[%s4619_s0 + $0xe8] sm:$0xff]  ;;  %v147_v47 = vld [vmem:[%s4619_s0 + $0xf8] sm:$0xff]  ;;  %v168_v48 = vld [vmem:[%s4623_s4 + $0x20] sm:$0xff]  ;;  %v160_v49 = vpack.c.bf16 %v142_v45, %v140_v42 }
  0x33   :  { %601 = vmatpush1.bf16.msra.mxu0 %v152_v20  ;;  %2887 = vmatpush1.bf16.msra.mxu1 %v152_v20  ;;  %v169_v50 = vld [vmem:[%s4623_s4 + $0x28] sm:$0xff]  ;;  %v163_v51 = vpack.c.bf16 %v147_v47, %v145_v46  ;;  %v144_v52 = vld [vmem:[%s4619_s0 + $0xe0] sm:$0xff]  ;;  %v146_v53 = vld [vmem:[%s4619_s0 + $0xf0] sm:$0xff] }
  0x34   :  { %602 = vmatprep.subr.bf16.mxu0 %v155_v21  ;;  %2880 = vmatprep.subr.bf16.mxu1 %v155_v21  ;;  %v170_v54 = vld [vmem:[%s4623_s4 + $0x30] sm:$0xff]  ;;  %v162_v55 = vpack.c.bf16 %v146_v53, %v144_v52  ;;  %v171_v56 = vld [vmem:[%s4623_s4 + $0x38] sm:$0xff]  ;;  %v2906_v57 = vld [vmem:[%s4622_s3] sm:$0xff]  }
  0x35   :  { %219 = vperm.xlu0 %2904, %v165_v40   ;;  %229 = vperm.xlu1 %2905, %v167_v43   ;;  %v172_v58 = vld [vmem:[%s4623_s4 + $0x40] sm:$0xff]  ;;  %v173_v59 = vld [vmem:[%s4623_s4 + $0x48] sm:$0xff]  ;;  %v174_v60 = vld [vmem:[%s4623_s4 + $0x50] sm:$0xff] }
  0x36   :  { %v175_v61 = vld [vmem:[%s4623_s4 + $0x58] sm:$0xff]  ;;  %v2907_v62 = vld [vmem:[%s4622_s3 + $0x8] sm:$0xff]   ;;  %v176_v63 = vld [vmem:[%s4623_s4 + $0x60] sm:$0xff] }
  0x37   :  { %603 = vmatpush1.bf16.msra.mxu0 %v154_v27  ;;  %2888 = vmatpush1.bf16.msra.mxu1 %v154_v27  ;;  %v177_v1 = vld [vmem:[%s4623_s4 + $0x68] sm:$0xff]  ;;  %v178_v2 = vld [vmem:[%s4623_s4 + $0x70] sm:$0xff]  ;;  %v179_v3 = vld [vmem:[%s4623_s4 + $0x78] sm:$0xff] }
  0x38   :  { %604 = vmatprep.subr.bf16.mxu0 %v157_v29  ;;  %2881 = vmatprep.subr.bf16.mxu1 %v157_v29  ;;  %v2908_v4 = vld [vmem:[%s4622_s3 + $0x10] sm:$0xff]   ;;  %v180_v5 = vld [vmem:[%s4623_s4 + $0x80] sm:$0xff]  ;;  %v181_v6 = vld [vmem:[%s4623_s4 + $0x88] sm:$0xff] }
  0x39   :  { %234 = vperm.xlu0 %2904, %v168_v48   ;;  %239 = vperm.xlu1 %2905, %v169_v50   ;;  %v182_v7 = vld [vmem:[%s4623_s4 + $0x90] sm:$0xff]  ;;  %v183_v8 = vld [vmem:[%s4623_s4 + $0x98] sm:$0xff]  ;;  %v184_v10 = vld [vmem:[%s4623_s4 + $0xa0] sm:$0xff] }
  0x3a   :  { %v2909_v9 = vld [vmem:[%s4622_s3 + $0x18] sm:$0xff]   ;;  %v185_v11 = vld [vmem:[%s4623_s4 + $0xa8] sm:$0xff]  ;;  %v186_v12 = vld [vmem:[%s4623_s4 + $0xb0] sm:$0xff] }
  0x3b   :  { %605 = vmatpush1.bf16.msra.mxu0 %v156_v33  ;;  %2889 = vmatpush1.bf16.msra.mxu1 %v156_v33  ;;  %v187_v13 = vld [vmem:[%s4623_s4 + $0xb8] sm:$0xff]  ;;  %v2910_v14 = vld [vmem:[%s4622_s3 + $0x20] sm:$0xff]   ;;  %v189_v16 = vld [vmem:[%s4623_s4 + $0xc8] sm:$0xff] }
  0x3c   :  { %606 = vmatprep.subr.bf16.mxu0 %v159_v35  ;;  %2882 = vmatprep.subr.bf16.mxu1 %v159_v35  ;;  %v188_v15 = vld [vmem:[%s4623_s4 + $0xc0] sm:$0xff]  ;;  %v190_v17 = vld [vmem:[%s4623_s4 + $0xd0] sm:$0xff]  ;;  %v191_v18 = vld [vmem:[%s4623_s4 + $0xd8] sm:$0xff] }
  0x3d   :  { %244 = vperm.xlu0 %2904, %v170_v54   ;;  %249 = vperm.xlu1 %2905, %v171_v56   ;;  %v2911_v19 = vld [vmem:[%s4622_s3 + $0x28] sm:$0xff]   ;;  %v192_v20 = vld [vmem:[%s4623_s4 + $0xe0] sm:$0xff]  ;;  %v194_v22 = vld [vmem:[%s4623_s4 + $0xf0] sm:$0xff] }
  0x3e   :  { %v193_v21 = vld [vmem:[%s4623_s4 + $0xe8] sm:$0xff]  ;;  %v195_v23 = vld [vmem:[%s4623_s4 + $0xf8] sm:$0xff]  ;;  %v2912_v24 = vld [vmem:[%s4622_s3 + $0x30] sm:$0xff]  }
  0x3f   :  { %607 = vmatpush1.bf16.msra.mxu0 %v158_v41  ;;  %2890 = vmatpush1.bf16.msra.mxu1 %v158_v41  ;;  %v2913_v25 = vld [vmem:[%s4622_s3 + $0x38] sm:$0xff]   ;;  %v2914_v26 = vld [vmem:[%s4622_s3 + $0x40] sm:$0xff]   ;;  %v2915_v27 = vld [vmem:[%s4622_s3 + $0x48] sm:$0xff]  }
  0x40   :  { %608 = vmatprep.subr.bf16.mxu0 %v161_v44  ;;  %2883 = vmatprep.subr.bf16.mxu1 %v161_v44  ;;  %v2916_v28 = vld [vmem:[%s4622_s3 + $0x50] sm:$0xff]   ;;  %v2917_v29 = vld [vmem:[%s4622_s3 + $0x58] sm:$0xff]   ;;  %v2918_v30 = vld [vmem:[%s4622_s3 + $0x60] sm:$0xff]  }
  0x41   :  { %254 = vperm.xlu0 %2904, %v172_v58   ;;  %259 = vperm.xlu1 %2905, %v173_v59   ;;  %v2919_v31 = vld [vmem:[%s4622_s3 + $0x68] sm:$0xff]   ;;  %v2920_v32 = vld [vmem:[%s4622_s3 + $0x70] sm:$0xff]   ;;  %v2921_v33 = vld [vmem:[%s4622_s3 + $0x78] sm:$0xff]  }
  0x42   :  { %v2922_v34 = vld [vmem:[%s4622_s3 + $0xa0] sm:$0xff]   ;;  %v2923_v35 = vld [vmem:[%s4622_s3 + $0xa8] sm:$0xff]   ;;  %v2924_v36 = vld [vmem:[%s4622_s3 + $0xb0] sm:$0xff]  }
  0x43   :  { %609 = vmatpush1.bf16.msra.mxu0 %v160_v49  ;;  %2891 = vmatpush1.bf16.msra.mxu1 %v160_v49  ;;  %v2925_v39 = vld [vmem:[%s4622_s3 + $0xb8] sm:$0xff]  }
  0x44   :  { %610 = vmatprep.subr.bf16.mxu0 %v163_v51  ;;  %2884 = vmatprep.subr.bf16.mxu1 %v163_v51 }
  0x45   :  { %264 = vperm.xlu0 %2904, %v174_v60   ;;  %269 = vperm.xlu1 %2905, %v175_v61   ;;  %v1089_v61 = vld [vmem:[#allocation2 + $0x58] sm:$0xff] }
  0x46   :  { %vm1105_vm6 = vcmp.eq.f32.partialorder %v1089_v61, 1.0 }
  0x47   :  { %611 = vmatpush1.bf16.msra.mxu0 %v162_v55  ;;  %2892 = vmatpush1.bf16.msra.mxu1 %v162_v55 }
  0x49   :  { %274 = vperm.xlu0 %2904, %v176_v63   ;;  %279 = vperm.xlu1 %2905, %v177_v1  }
  0x4a   :  { %629 = vmatmul.mubr.bf16.vlgmr.msra.gmra.mrb[0].mxu0 %v2906_v57  ;;  %829 = vmatmul.mubr.bf16.vlgmr.msra.gmra.mrb[0].mxu1 %v2922_v34 }
  0x4b   :  { %638 = vmatprep.mubr.bf16.mxu0 %v4631_v0  ;;  %838 = vmatprep.mubr.bf16.mxu1 %v4631_v0 }
  0x4d   :  { %284 = vperm.xlu0 %2904, %v178_v2   ;;  %289 = vperm.xlu1 %2905, %v179_v3  }
  0x51   :  { %294 = vperm.xlu0 %2904, %v180_v5   ;;  %299 = vperm.xlu1 %2905, %v181_v6  }
  0x52   :  { %639 = vmatmul.mubr.bf16.gmra.mrb[4].mxu0 %v2907_v62  ;;  %839 = vmatmul.mubr.bf16.gmra.mrb[4].mxu1 %v2923_v35  ;;  %v2926_v35 = vld [vmem:[%s4622_s3 + $0x80] sm:$0xff]  }
  0x53   :  { %648 = vmatprep.mubr.bf16.mxu0 %v4631_v0  ;;  %848 = vmatprep.mubr.bf16.mxu1 %v4631_v0 }
  0x55   :  { %304 = vperm.xlu0 %2904, %v182_v7   ;;  %309 = vperm.xlu1 %2905, %v183_v8  }
  0x59   :  { %314 = vperm.xlu0 %2904, %v184_v10   ;;  %319 = vperm.xlu1 %2905, %v185_v11  }
  0x5a   :  { %649 = vmatmul.mubr.bf16.gmra.mrb[8].mxu0 %v2908_v4  ;;  %849 = vmatmul.mubr.bf16.gmra.mrb[8].mxu1 %v2924_v36 }
  0x5b   :  { %658 = vmatprep.mubr.bf16.mxu0 %v4631_v0  ;;  %858 = vmatprep.mubr.bf16.mxu1 %v4631_v0 }
  0x5d   :  { %324 = vperm.xlu0 %2904, %v186_v12   ;;  %329 = vperm.xlu1 %2905, %v187_v13  }
  0x61   :  { %334 = vperm.xlu0 %2904, %v188_v15   ;;  %339 = vperm.xlu1 %2905, %v189_v16  }
  0x62   :  { %659 = vmatmul.mubr.bf16.gmra.mrb[12].mxu0 %v2909_v9  ;;  %859 = vmatmul.mubr.bf16.gmra.mrb[12].mxu1 %v2925_v39 }
  0x63   :  { %668 = vmatprep.mubr.bf16.mxu0 %v4631_v0 }
  0x65   :  { %344 = vperm.xlu0 %2904, %v190_v17   ;;  %349 = vperm.xlu1 %2905, %v191_v18  }
  0x69   :  { %354 = vperm.xlu0 %2904, %v192_v20   ;;  %359 = vperm.xlu1 %2905, %v193_v21  }
  0x6a   :  { %669 = vmatmul.mubr.bf16.gmra.mrb[16].mxu0 %v2910_v14 }
  0x6b   :  { %678 = vmatprep.mubr.bf16.mxu0 %v4631_v0 }
  0x6d   :  { %364 = vperm.xlu0 %2904, %v194_v22   ;;  %369 = vperm.xlu1 %2905, %v195_v23  }
  0x72   :  { %679 = vmatmul.mubr.bf16.gmra.mrb[20].mxu0 %v2911_v19 }
  0x73   :  { %688 = vmatprep.mubr.bf16.mxu0 %v4631_v0 }
  0x7a   :  { %689 = vmatmul.mubr.bf16.gmra.mrb[24].mxu0 %v2912_v24 }
  0x7b   :  { %698 = vmatprep.mubr.bf16.mxu0 %v4631_v0 }
  0x82   :  { %699 = vmatmul.mubr.bf16.gmra.mrb[28].mxu0 %v2913_v25 }
  0x83   :  { %708 = vmatprep.mubr.bf16.mxu0 %v4631_v0 }
  0x8a   :  { %709 = vmatmul.mubr.bf16.gmra.mrb[32].mxu0 %v2914_v26 }
  0x8b   :  { %718 = vmatprep.mubr.bf16.mxu0 %v4631_v0 }
  0x92   :  { %719 = vmatmul.mubr.bf16.gmra.mrb[36].mxu0 %v2915_v27 }
  0x93   :  { %728 = vmatprep.mubr.bf16.mxu0 %v4631_v0 }
  0x9a   :  { %729 = vmatmul.mubr.bf16.gmra.mrb[40].mxu0 %v2916_v28 }
  0x9b   :  { %738 = vmatprep.mubr.bf16.mxu0 %v4631_v0 }
  0xa2   :  { %739 = vmatmul.mubr.bf16.gmra.mrb[44].mxu0 %v2917_v29 }
  0xa3   :  { %748 = vmatprep.mubr.bf16.mxu0 %v4631_v0 }
  0xaa   :  { %749 = vmatmul.mubr.bf16.gmra.mrb[48].mxu0 %v2918_v30 }
  0xab   :  { %758 = vmatprep.mubr.bf16.mxu0 %v4631_v0 }
  0xb0   :  { %v215_v37 = vpop.permute.xlu0 %214  ;;  %v225_v46 = vpop.permute.xlu1 %224 }
  0xb2   :  { %759 = vmatmul.mubr.bf16.gmra.mrb[52].mxu0 %v2919_v31 }
  0xb3   :  { %768 = vmatprep.mubr.bf16.mxu0 %v4631_v0 }
  0xb4   :  { %v220_v41 = vpop.permute.xlu0 %219  ;;  %v230_v53 = vpop.permute.xlu1 %229 }
  0xb8   :  { %v235_v63 = vpop.permute.xlu0 %234  ;;  %v240_v2 = vpop.permute.xlu1 %239 }
  0xba   :  { %769 = vmatmul.mubr.bf16.gmra.mrb[56].mxu0 %v2920_v32 }
  0xbb   :  { %778 = vmatprep.mubr.bf16.mxu0 %v4631_v0 }
  0xbc   :  { %v245_v12 = vpop.permute.xlu0 %244  ;;  %v250_v14 = vpop.permute.xlu1 %249 }
  0xc0   :  { %v255_v24 = vpop.permute.xlu0 %254  ;;  %v260_v26 = vpop.permute.xlu1 %259 }
  0xc2   :  { %779 = vmatmul.mubr.bf16.gmra.mrb[60].mxu0 %v2921_v33 }
  0xc3   :  { %788 = vmatprep.mubr.bf16.mxu0 %v4631_v0 }
  0xc4   :  { %v270_v39 = vpop.permute.xlu1 %269 }
  0xca   :  { %789 = vmatmul.mubr.bf16.gmra.mrb[64].mxu0 %v2926_v35 }
  0xcb   :  { %798 = vmatprep.mubr.bf16.mxu0 %v4631_v0 }
 0x11d   :  { %v630_v38 = vpop.f32.mrb[0].mxu0 }
 0x11e   :  { %v632_v40 = vpop.f32.mrb[1].mxu0  ;;  %v631_v43 = vadd.f32 %v630_v38, %v215_v37 }
 0x11f   :  { %v634_v42 = vpop.f32.mrb[2].mxu0  ;;  %v3548_v47 = vadd.f32 %v632_v40, %v215_v37  ;;  %v265_v37 = vpop.permute.xlu0 %264 }
 0x120   :  { %v635_v44 = vadd.f32 %v634_v42, %v220_v41  ;;  %v636_v45 = vpop.f32.mrb[3].mxu0 }
 0x121   :  { %v3550_v48 = vadd.f32 %v636_v45, %v220_v41 }
 0x122   :  { %v869_v49 = vpack.c.bf16 %v635_v44, %v631_v43 }
 0x124   :  { %917 = vxpose.xlu0.c.b16.start [1/8] %v869_v49, 128  ;;  %v1079_v49 = vld [vmem:[#allocation2 + $0x8] sm:$0xff] }
 0x125   :  { %v640_v51 = vpop.f32.mrb[4].mxu0  ;;  %vm1095_vm4 = vcmp.eq.f32.partialorder %v1079_v49, 1.0 }
 0x126   :  { %v642_v52 = vpop.f32.mrb[5].mxu0  ;;  %v641_v55 = vadd.f32 %v640_v51, %v225_v46 }
 0x127   :  { %v644_v54 = vpop.f32.mrb[6].mxu0  ;;  %v3554_v58 = vadd.f32 %v642_v52, %v225_v46  ;;  %v275_v52 = vpop.permute.xlu0 %274 }
 0x128   :  { %v645_v56 = vadd.f32 %v644_v54, %v230_v53  ;;  %v646_v57 = vpop.f32.mrb[7].mxu0  ;;  %v280_v54 = vpop.permute.xlu1 %279 }
 0x129   :  { %v3556_v59 = vadd.f32 %v646_v57, %v230_v53 }
 0x12a   :  { %v871_v60 = vpack.c.bf16 %v645_v56, %v641_v55 }
 0x12c   :  { %918 = vxpose.xlu0.c.b16.cont [2/8] %v871_v60, 128 }
 0x12d   :  { %v650_v62 = vpop.f32.mrb[8].mxu0 }
 0x12e   :  { %v652_v1 = vpop.f32.mrb[9].mxu0  ;;  %v651_v4 = vadd.f32 %v650_v62, %v235_v63 }
 0x12f   :  { %v654_v3 = vpop.f32.mrb[10].mxu0  ;;  %v3560_v7 = vadd.f32 %v652_v1, %v235_v63 }
 0x130   :  { %v655_v5 = vadd.f32 %v654_v3, %v240_v2  ;;  %v656_v6 = vpop.f32.mrb[11].mxu0 }
 0x131   :  { %v3562_v8 = vadd.f32 %v656_v6, %v240_v2  ;;  %v290_v6 = vpop.permute.xlu1 %289 }
 0x132   :  { %v873_v9 = vpack.c.bf16 %v655_v5, %v651_v4  ;;  %v285_v4 = vpop.permute.xlu0 %284 }
 0x134   :  { %919 = vxpose.xlu0.c.b16.cont [3/8] %v873_v9, 128 }
 0x135   :  { %v660_v11 = vpop.f32.mrb[12].mxu0 }
 0x136   :  { %v662_v13 = vpop.f32.mrb[13].mxu0  ;;  %v661_v16 = vadd.f32 %v660_v11, %v245_v12 }
 0x137   :  { %v664_v15 = vpop.f32.mrb[14].mxu0  ;;  %v3566_v19 = vadd.f32 %v662_v13, %v245_v12 }
 0x138   :  { %v665_v17 = vadd.f32 %v664_v15, %v250_v14  ;;  %v666_v18 = vpop.f32.mrb[15].mxu0 }
 0x139   :  { %v3568_v20 = vadd.f32 %v666_v18, %v250_v14 }
 0x13a   :  { %v875_v21 = vpack.c.bf16 %v665_v17, %v661_v16  ;;  %v1085_v17 = vld [vmem:[#allocation2 + $0x38] sm:$0xff] }
 0x13b   :  { %vm1101_vm3 = vcmp.eq.f32.partialorder %v1085_v17, 1.0  ;;  %v1052_v17 = vld [vmem:[%s4620_s1 + $0x30] sm:$0xff] }
 0x13c   :  { %920 = vxpose.xlu0.c.b16.cont [4/8] %v875_v21, 128  ;;  %v295_v21 = vpop.permute.xlu0 %294 }
 0x13d   :  { %v670_v23 = vpop.f32.mrb[16].mxu0 }
 0x13e   :  { %v672_v25 = vpop.f32.mrb[17].mxu0  ;;  %v671_v28 = vadd.f32 %v670_v23, %v255_v24 }
 0x13f   :  { %v674_v27 = vpop.f32.mrb[18].mxu0  ;;  %v3572_v31 = vadd.f32 %v672_v25, %v255_v24  ;;  %v300_v24 = vpop.permute.xlu1 %299 }
 0x140   :  { %v675_v29 = vadd.f32 %v674_v27, %v260_v26  ;;  %v676_v30 = vpop.f32.mrb[19].mxu0 }
 0x141   :  { %v3574_v32 = vadd.f32 %v676_v30, %v260_v26 }
 0x142   :  { %v877_v33 = vpack.c.bf16 %v675_v29, %v671_v28 }
 0x144   :  { %921 = vxpose.xlu0.c.b16.cont [5/8] %v877_v33, 128 }
 0x145   :  { %v680_v36 = vpop.f32.mrb[20].mxu0 }
 0x146   :  { %v682_v38 = vpop.f32.mrb[21].mxu0  ;;  %v681_v41 = vadd.f32 %v680_v36, %v265_v37 }
 0x147   :  { %v684_v40 = vpop.f32.mrb[22].mxu0  ;;  %v3582_v44 = vadd.f32 %v682_v38, %v265_v37  ;;  %v305_v37 = vpop.permute.xlu0 %304 }
 0x148   :  { %v685_v42 = vadd.f32 %v684_v40, %v270_v39  ;;  %v686_v43 = vpop.f32.mrb[23].mxu0 }
 0x149   :  { %v3584_v45 = vadd.f32 %v686_v43, %v270_v39  ;;  %v310_v39 = vpop.permute.xlu1 %309 }
 0x14a   :  { %v879_v46 = vpack.c.bf16 %v685_v42, %v681_v41 }
 0x14c   :  { %922 = vxpose.xlu0.c.b16.cont [6/8] %v879_v46, 128 }
 0x14d   :  { %v690_v51 = vpop.f32.mrb[24].mxu0 }
 0x14e   :  { %v692_v53 = vpop.f32.mrb[25].mxu0  ;;  %v691_v56 = vadd.f32 %v690_v51, %v275_v52 }
 0x14f   :  { %v694_v55 = vpop.f32.mrb[26].mxu0  ;;  %v3588_v62 = vadd.f32 %v692_v53, %v275_v52 }
 0x150   :  { %v695_v57 = vadd.f32 %v694_v55, %v280_v54  ;;  %v696_v60 = vpop.f32.mrb[27].mxu0  ;;  %v315_v55 = vpop.permute.xlu0 %314 }
 0x151   :  { %v3590_v63 = vadd.f32 %v696_v60, %v280_v54 }
 0x152   :  { %v881_v1 = vpack.c.bf16 %v695_v57, %v691_v56  ;;  %v320_v57 = vpop.permute.xlu1 %319 }
 0x154   :  { %923 = vxpose.xlu0.c.b16.cont [7/8] %v881_v1, 128 }
 0x155   :  { %v700_v3 = vpop.f32.mrb[28].mxu0 }
 0x156   :  { %v702_v5 = vpop.f32.mrb[29].mxu0  ;;  %v701_v11 = vadd.f32 %v700_v3, %v285_v4 }
 0x157   :  { %v704_v9 = vpop.f32.mrb[30].mxu0  ;;  %v3594_v14 = vadd.f32 %v702_v5, %v285_v4 }
 0x158   :  { %v705_v12 = vadd.f32 %v704_v9, %v290_v6  ;;  %v706_v13 = vpop.f32.mrb[31].mxu0 }
 0x159   :  { %v3596_v15 = vadd.f32 %v706_v13, %v290_v6  ;;  %v325_v13 = vpop.permute.xlu0 %324 }
 0x15a   :  { %v883_v16 = vpack.c.bf16 %v705_v12, %v701_v11 }
 0x15c   :  { %924 = vxpose.xlu0.c.b16.end [8/8] %v883_v16, 128 }
 0x15d   :  { %v710_v18 = vpop.f32.mrb[32].mxu0 }
 0x15e   :  { %v712_v23 = vpop.f32.mrb[33].mxu0  ;;  %v711_v26 = vadd.f32 %v710_v18, %v295_v21  ;;  %v330_v18 = vpop.permute.xlu1 %329 }
 0x15f   :  { %v714_v25 = vpop.f32.mrb[34].mxu0  ;;  %v713_v29 = vadd.f32 %v712_v23, %v295_v21 }
 0x160   :  { %v715_v27 = vadd.f32 %v714_v25, %v300_v24  ;;  %v716_v28 = vpop.f32.mrb[35].mxu0 }
 0x161   :  { %v717_v30 = vadd.f32 %v716_v28, %v300_v24 }
 0x162   :  { %v885_v33 = vpack.c.bf16 %v715_v27, %v711_v26 }
 0x163   :  { %v3600_v35 = vpack.c.bf16 %v717_v30, %v713_v29 }
 0x164   :  { %2749 = vmatprep.subr.bf16.mxu1 %v885_v33 }
 0x165   :  { %4647 = vst [vmem:[#allocation11_spill] sm:$0xff] %v3600_v35  ;;  %v720_v36 = vpop.f32.mrb[36].mxu0  ;;  %2750 = vmatpush3.bf16.msra.mxu1 %v885_v33  ;;  %v335_v33 = vpop.permute.xlu0 %334 }
 0x166   :  { %v722_v38 = vpop.f32.mrb[37].mxu0  ;;  %v721_v41 = vadd.f32 %v720_v36, %v305_v37 }
 0x167   :  { %v724_v40 = vpop.f32.mrb[38].mxu0  ;;  %v723_v46 = vadd.f32 %v722_v38, %v305_v37  ;;  %v340_v37 = vpop.permute.xlu1 %339 }
 0x168   :  { %v725_v42 = vadd.f32 %v724_v40, %v310_v39  ;;  %v726_v43 = vpop.f32.mrb[39].mxu0 }
 0x169   :  { %v727_v51 = vadd.f32 %v726_v43, %v310_v39 }
 0x16a   :  { %v887_v52 = vpack.c.bf16 %v725_v42, %v721_v41 }
 0x16b   :  { %v3602_v53 = vpack.c.bf16 %v727_v51, %v723_v46 }
 0x16c   :  { %2751 = vmatprep.subr.bf16.mxu1 %v887_v52 }
 0x16d   :  { %4648 = vst [vmem:[#allocation12_spill] sm:$0xff] %v3602_v53  ;;  %v730_v54 = vpop.f32.mrb[40].mxu0  ;;  %2752 = vmatpush3.bf16.msra.mxu1 %v887_v52 }
 0x16e   :  { %v732_v56 = vpop.f32.mrb[41].mxu0  ;;  %v731_v1 = vadd.f32 %v730_v54, %v315_v55  ;;  %v345_v54 = vpop.permute.xlu0 %344 }
 0x16f   :  { %v734_v60 = vpop.f32.mrb[42].mxu0  ;;  %v733_v5 = vadd.f32 %v732_v56, %v315_v55  ;;  %v350_v56 = vpop.permute.xlu1 %349 }
 0x170   :  { %v735_v3 = vadd.f32 %v734_v60, %v320_v57  ;;  %v736_v4 = vpop.f32.mrb[43].mxu0 }
 0x171   :  { %v737_v6 = vadd.f32 %v736_v4, %v320_v57 }
 0x172   :  { %v889_v9 = vpack.c.bf16 %v735_v3, %v731_v1 }
 0x173   :  { %v3604_v11 = vpack.c.bf16 %v737_v6, %v733_v5 }
 0x174   :  { %2753 = vmatprep.subr.bf16.mxu1 %v889_v9 }
 0x175   :  { %4649 = vst [vmem:[#allocation13_spill] sm:$0xff] %v3604_v11  ;;  %v740_v12 = vpop.f32.mrb[44].mxu0  ;;  %2754 = vmatpush3.bf16.msra.mxu1 %v889_v9 }
 0x176   :  { %v742_v16 = vpop.f32.mrb[45].mxu0  ;;  %v741_v23 = vadd.f32 %v740_v12, %v325_v13 }
 0x177   :  { %v744_v21 = vpop.f32.mrb[46].mxu0  ;;  %v743_v26 = vadd.f32 %v742_v16, %v325_v13  ;;  %v355_v13 = vpop.permute.xlu0 %354 }
 0x178   :  { %v745_v24 = vadd.f32 %v744_v21, %v330_v18  ;;  %v746_v25 = vpop.f32.mrb[47].mxu0 }
 0x179   :  { %v747_v27 = vadd.f32 %v746_v25, %v330_v18  ;;  %v360_v18 = vpop.permute.xlu1 %359 }
 0x17a   :  { %v891_v28 = vpack.c.bf16 %v745_v24, %v741_v23 }
 0x17b   :  { %v3606_v29 = vpack.c.bf16 %v747_v27, %v743_v26 }
 0x17c   :  { %2755 = vmatprep.subr.bf16.mxu1 %v891_v28 }
 0x17d   :  { %4650 = vst [vmem:[#allocation14_spill] sm:$0xff] %v3606_v29  ;;  %v750_v30 = vpop.f32.mrb[48].mxu0  ;;  %2756 = vmatpush3.bf16.msra.mxu1 %v891_v28 }
 0x17e   :  { %v752_v36 = vpop.f32.mrb[49].mxu0  ;;  %v751_v39 = vadd.f32 %v750_v30, %v335_v33 }
 0x17f   :  { %v754_v38 = vpop.f32.mrb[50].mxu0  ;;  %v753_v42 = vadd.f32 %v752_v36, %v335_v33  ;;  %v365_v36 = vpop.permute.xlu0 %364 }
 0x180   :  { %v755_v40 = vadd.f32 %v754_v38, %v340_v37  ;;  %v756_v41 = vpop.f32.mrb[51].mxu0  ;;  %v370_v38 = vpop.permute.xlu1 %369 }
 0x181   :  { %v757_v43 = vadd.f32 %v756_v41, %v340_v37 }
 0x182   :  { %v893_v46 = vpack.c.bf16 %v755_v40, %v751_v39 }
 0x183   :  { %v3608_v51 = vpack.c.bf16 %v757_v43, %v753_v42 }
 0x184   :  { %2757 = vmatprep.subr.bf16.mxu1 %v893_v46 }
 0x185   :  { %4651 = vst [vmem:[#allocation15_spill] sm:$0xff] %v3608_v51  ;;  %v760_v52 = vpop.f32.mrb[52].mxu0  ;;  %2758 = vmatpush3.bf16.msra.mxu1 %v893_v46 }
 0x186   :  { %v762_v55 = vpop.f32.mrb[53].mxu0  ;;  %v761_v60 = vadd.f32 %v760_v52, %v345_v54 }
 0x187   :  { %v764_v57 = vpop.f32.mrb[54].mxu0  ;;  %v763_v4 = vadd.f32 %v762_v55, %v345_v54 }
 0x188   :  { %v765_v1 = vadd.f32 %v764_v57, %v350_v56  ;;  %v766_v3 = vpop.f32.mrb[55].mxu0 }
 0x189   :  { %v767_v5 = vadd.f32 %v766_v3, %v350_v56  ;;  %v3616_v3 = vpop.f32.mrb[0].mxu1 }
 0x18a   :  { %v895_v6 = vpack.c.bf16 %v765_v1, %v761_v60 }
 0x18b   :  { %v3610_v9 = vpack.c.bf16 %v767_v5, %v763_v4  ;;  %v3618_v4 = vpop.f32.mrb[1].mxu1 }
 0x18c   :  { %2759 = vmatprep.subr.bf16.mxu1 %v895_v6 }
 0x18d   :  { %4652 = vst [vmem:[#allocation16_spill] sm:$0xff] %v3610_v9  ;;  %v770_v12 = vpop.f32.mrb[56].mxu0  ;;  %2760 = vmatpush3.bf16.msra.mxu1 %v895_v6  ;;  %v3620_v6 = vpop.f32.mrb[2].mxu1  ;;  %v1088_v9 = vld [vmem:[#allocation2 + $0x50] sm:$0xff] }
 0x18e   :  { %v772_v16 = vpop.f32.mrb[57].mxu0  ;;  %v771_v23 = vadd.f32 %v770_v12, %v355_v13  ;;  %v3622_v12 = vpop.f32.mrb[3].mxu1  ;;  %vm1104_vm9 = vcmp.eq.f32.partialorder %v1088_v9, 1.0 }
 0x18f   :  { %v774_v21 = vpop.f32.mrb[58].mxu0  ;;  %v773_v26 = vadd.f32 %v772_v16, %v355_v13 }
 0x190   :  { %v775_v24 = vadd.f32 %v774_v21, %v360_v18  ;;  %v776_v25 = vpop.f32.mrb[59].mxu0 }
 0x191   :  { %v777_v27 = vadd.f32 %v776_v25, %v360_v18  ;;  %v3624_v18 = vpop.f32.mrb[4].mxu1 }
 0x192   :  { %v897_v28 = vpack.c.bf16 %v775_v24, %v771_v23  ;;  %v3626_v21 = vpop.f32.mrb[5].mxu1 }
 0x193   :  { %v3612_v30 = vpack.c.bf16 %v777_v27, %v773_v26  ;;  %v3628_v23 = vpop.f32.mrb[6].mxu1 }
 0x194   :  { %2761 = vmatprep.subr.bf16.mxu1 %v897_v28  ;;  %v3630_v24 = vpop.f32.mrb[7].mxu1 }
 0x195   :  { %4653 = vst [vmem:[#allocation17_spill] sm:$0xff] %v3612_v30  ;;  %v780_v33 = vpop.f32.mrb[60].mxu0  ;;  %2762 = vmatpush3.bf16.msra.mxu1 %v897_v28  ;;  %v3632_v25 = vpop.f32.mrb[8].mxu1 }
 0x196   :  { %v782_v37 = vpop.f32.mrb[61].mxu0  ;;  %v781_v40 = vadd.f32 %v780_v33, %v365_v36  ;;  %4655 = vst [vmem:[#allocation19_spill] sm:$0xff] %v3632_v25  ;;  %v3634_v26 = vpop.f32.mrb[9].mxu1 }
 0x197   :  { %v784_v39 = vpop.f32.mrb[62].mxu0  ;;  %v783_v43 = vadd.f32 %v782_v37, %v365_v36  ;;  %4656 = vst [vmem:[#allocation20_spill] sm:$0xff] %v3634_v26  ;;  %v3636_v27 = vpop.f32.mrb[10].mxu1 }
 0x198   :  { %v785_v41 = vadd.f32 %v784_v39, %v370_v38  ;;  %v786_v42 = vpop.f32.mrb[63].mxu0  ;;  %4657 = vst [vmem:[#allocation21_spill] sm:$0xff] %v3636_v27  ;;  %v3638_v28 = vpop.f32.mrb[11].mxu1  ;;  %v2927_v39 = vld [vmem:[%s4622_s3 + $0x88] sm:$0xff]  }
 0x199   :  { %v787_v46 = vadd.f32 %v786_v42, %v370_v38  ;;  %4658 = vst [vmem:[#allocation22_spill] sm:$0xff] %v3638_v28  ;;  %v3640_v33 = vpop.f32.mrb[12].mxu1  ;;  %799 = vmatmul.mubr.bf16.gmra.mrb[68].mxu0 %v2927_v39  ;;  %v1080_v42 = vld [vmem:[#allocation2 + $0x10] sm:$0xff] }
 0x19a   :  { %v899_v52 = vpack.c.bf16 %v785_v41, %v781_v40  ;;  %4659 = vst [vmem:[#allocation23_spill] sm:$0xff] %v3640_v33  ;;  %v3642_v36 = vpop.f32.mrb[13].mxu1  ;;  %808 = vmatprep.mubr.bf16.mxu0 %v4631_v0  ;;  %v2928_v40 = vld [vmem:[%s4622_s3 + $0x90] sm:$0xff]   ;;  %v2929_v41 = vld [vmem:[%s4622_s3 + $0x98] sm:$0xff]   ;;  %vm1096_vm0 = vcmp.eq.f32.partialorder %v1080_v42, 1.0 }
 0x19b   :  { %v3614_v54 = vpack.c.bf16 %v787_v46, %v783_v43  ;;  %4660 = vst [vmem:[#allocation24_spill] sm:$0xff] %v3642_v36  ;;  %v3644_v37 = vpop.f32.mrb[14].mxu1  ;;  %v1048_v46 = vld [vmem:[%s4620_s1 + $0x10] sm:$0xff] }
 0x19c   :  { %2763 = vmatprep.subr.bf16.mxu1 %v899_v52  ;;  %4661 = vst [vmem:[#allocation25_spill] sm:$0xff] %v3644_v37  ;;  %v3646_v38 = vpop.f32.mrb[15].mxu1 }
 0x19d   :  { %4654 = vst [vmem:[#allocation18_spill] sm:$0xff] %v3614_v54  ;;  %2764 = vmatpush3.bf16.msra.mxu1 %v899_v52  ;;  %4662 = vst [vmem:[#allocation26_spill] sm:$0xff] %v3646_v38  ;;  %v1078_v52 = vld [vmem:[#allocation2] sm:$0xff] }
 0x19e   :  { %vm1094_vm1 = vcmp.eq.f32.partialorder %v1078_v52, 1.0  ;;  %v1082_v54 = vld [vmem:[#allocation2 + $0x20] sm:$0xff] }
 0x19f   :  { %vm1098_vm7 = vcmp.eq.f32.partialorder %v1082_v54, 1.0  ;;  %v1056_v54 = vld [vmem:[%s4620_s1 + $0x50] sm:$0xff] }
 0x1a1   :  { %809 = vmatmul.mubr.bf16.gmra.mrb[72].mxu0 %v2928_v40  ;;  %v1081_v40 = vld [vmem:[#allocation2 + $0x18] sm:$0xff] }
 0x1a2   :  { %818 = vmatprep.mubr.bf16.mxu0 %v4631_v0  ;;  %vm1097_vm2 = vcmp.eq.f32.partialorder %v1081_v40, 1.0 }
 0x1a6   :  { %v925_v55 = vpop.trf.xlu0 }
 0x1a7   :  { %2765 = vmatprep.mubr.bf16.mxu1 %v925_v55 }
 0x1a9   :  { %819 = vmatmul.mubr.bf16.gmra.mrb[76].mxu0 %v2929_v41 }
 0x1aa   :  { %v926_v56 = vpop.trf.xlu0  ;;  %1995 = vmatprep.mubr.bf16.mxu0 %v4631_v0 }
 0x1ab   :  { %2766 = vmatmul.mubr.bf16.vlgmr.msra.gmra.mrb[16].mxu1 %v926_v56 }
 0x1ae   :  { %v927_v57 = vpop.trf.xlu0 }
 0x1af   :  { %2769 = vmatprep.mubr.bf16.mxu1 %v927_v57 }
 0x1b2   :  { %v928_v60 = vpop.trf.xlu0 }
 0x1b3   :  { %2770 = vmatmul.mubr.bf16.gmra.mrb[20].mxu1 %v928_v60  ;;  %v1046_v60 = vld [vmem:[%s4620_s1] sm:$0xff] }
 0x1b6   :  { %v929_v1 = vpop.trf.xlu0 }
 0x1b7   :  { %2773 = vmatprep.mubr.bf16.mxu1 %v929_v1 }
 0x1ba   :  { %v930_v5 = vpop.trf.xlu0 }
 0x1bb   :  { %2774 = vmatmul.mubr.bf16.gmra.mrb[24].mxu1 %v930_v5  ;;  %v4641_v5 = vmov -1e+09  }
 0x1bc   :  { %v1111_v10 = vsel %vm1095_vm4, 0.0, %v4641_v5 }
 0x1be   :  { %v931_v13 = vpop.trf.xlu0 }
 0x1bf   :  { %2777 = vmatprep.mubr.bf16.mxu1 %v931_v13  ;;  %v1112_v13 = vsel %vm1096_vm0, 0.0, %v4641_v5 }
 0x1c2   :  { %v932_v16 = vpop.trf.xlu0 }
 0x1c3   :  { %2778 = vmatmul.mubr.bf16.gmra.mrb[28].mxu1 %v932_v16 }
 0x27e   :  { %v2767_v43 = vpop.f32.mrb[16].mxu1 }
 0x27f   :  { %v1032_v55 = vmul.f32 0.088388346, %v2767_v43  ;;  %v967_v56 = vpop.f32.mrb[17].mxu1  ;;  %v1049_v43 = vld [vmem:[%s4620_s1 + $0x18] sm:$0xff] }
 0x280   :  { %v1030_v57 = vmul.f32 0.088388346, %v967_v56  ;;  %v2768_v1 = vpop.f32.mrb[18].mxu1  ;;  %v1110_v56 = vsel %vm1094_vm1, 0.0, %v4641_v5 }
 0x281   :  { %v1064_v16 = vmul.f32 %v1048_v46, %v1032_v55  ;;  %v970_v39 = vpop.f32.mrb[19].mxu1  ;;  %v1033_v42 = vmul.f32 0.088388346, %v2768_v1  ;;  %v1053_v1 = vld [vmem:[%s4620_s1 + $0x38] sm:$0xff] }
 0x282   :  { %v1062_v41 = vmul.f32 %v1046_v60, %v1030_v57  ;;  %v1031_v55 = vmul.f32 0.088388346, %v970_v39  ;;  %v1047_v57 = vld [vmem:[%s4620_s1 + $0x8] sm:$0xff] }
 0x283   :  { %v3667_v0 = vadd.f32 %v1112_v13, %v1064_v16  ;;  %v1065_v46 = vmul.f32 %v1049_v43, %v1033_v42  ;;  %v1113_v13 = vsel %vm1097_vm2, 0.0, %v4641_v5  ;;  %v1084_v16 = vld [vmem:[#allocation2 + $0x30] sm:$0xff] }
 0x284   :  { %v3674_v34 = vadd.f32 %v1110_v56, %v1062_v41  ;;  %v1117_v41 = vsel %vm1101_vm3, 0.0, %v4641_v5  ;;  %v1063_v42 = vmul.f32 %v1047_v57, %v1031_v55  ;;  %vm1100_vm5 = vcmp.eq.f32.partialorder %v1084_v16, 1.0 }
 0x285   :  { %1146 = vmax.xlane.f32.xlu1 %v3667_v0  ;;  %v3688_v56 = vadd.f32 %v1113_v13, %v1065_v46  ;;  %v1116_v50 = vsel %vm1100_vm5, 0.0, %v4641_v5  ;;  %v1050_v46 = vld [vmem:[%s4620_s1 + $0x20] sm:$0xff] }
 0x286   :  { %v2771_v2 = vpop.f32.mrb[20].mxu1 }
 0x287   :  { %v983_v52 = vpop.f32.mrb[21].mxu1  ;;  %v1036_v40 = vmul.f32 0.088388346, %v2771_v2 }
 0x288   :  { %v2772_v60 = vpop.f32.mrb[22].mxu1  ;;  %v1034_v30 = vmul.f32 0.088388346, %v983_v52 }
 0x289   :  { %v1037_v22 = vmul.f32 0.088388346, %v2772_v60  ;;  %1142 = vmax.xlane.f32.xlu1 %v3674_v34  ;;  %v986_v39 = vpop.f32.mrb[23].mxu1  ;;  %v1068_v2 = vmul.f32 %v1052_v17, %v1036_v40  ;;  %v1083_v40 = vld [vmem:[#allocation2 + $0x28] sm:$0xff] }
 0x28a   :  { %v1066_v61 = vmul.f32 %v1050_v46, %v1034_v30  ;;  %v1035_v17 = vmul.f32 0.088388346, %v986_v39  ;;  %vm1099_vm8 = vcmp.eq.f32.partialorder %v1083_v40, 1.0  ;;  %v1120_v40 = vsel %vm1104_vm9, 0.0, %v4641_v5 }
 0x28b   :  { %v1069_v43 = vmul.f32 %v1053_v1, %v1037_v22  ;;  %v3696_v22 = vadd.f32 %v1111_v10, %v1063_v42  ;;  %v1057_v1 = vld [vmem:[%s4620_s1 + $0x58] sm:$0xff]  ;;  %v3705_v16 = vadd.f32 %v1116_v50, %v1068_v2  ;;  %v1121_v10 = vsel %vm1105_vm6, 0.0, %v4641_v5  ;;  %v1051_v42 = vld [vmem:[%s4620_s1 + $0x28] sm:$0xff] }
 0x28c   :  { %v1067_v39 = vmul.f32 %v1051_v42, %v1035_v17  ;;  %v1087_v17 = vld [vmem:[#allocation2 + $0x48] sm:$0xff] }
 0x28d   :  { %1148 = vmax.xlane.f32.xlu1 %v3688_v56  ;;  %v3692_v60 = vadd.f32 %v1117_v41, %v1069_v43  ;;  %v1114_v43 = vsel %vm1098_vm7, 0.0, %v4641_v5  ;;  %vm1103_vm11 = vcmp.eq.f32.partialorder %v1087_v17, 1.0 }
 0x28e   :  { %v2775_v49 = vpop.f32.mrb[24].mxu1  ;;  %v3719_v2 = vadd.f32 %v1114_v43, %v1066_v61  ;;  %v1054_v61 = vld [vmem:[%s4620_s1 + $0x40] sm:$0xff] }
 0x28f   :  { %1156 = vmax.xlane.f32.xlu0 %v3692_v60  ;;  %v999_v55 = vpop.f32.mrb[25].mxu1 }
 0x290   :  { %v2776_v57 = vpop.f32.mrb[26].mxu1  ;;  %v1038_v51 = vmul.f32 0.088388346, %v999_v55 }
 0x291   :  { %v1041_v13 = vmul.f32 0.088388346, %v2776_v57  ;;  %1144 = vmax.xlane.f32.xlu1 %v3696_v22  ;;  %v1002_v52 = vpop.f32.mrb[27].mxu1  ;;  %v1040_v57 = vmul.f32 0.088388346, %v2775_v49 }
 0x292   :  { %v1070_v42 = vmul.f32 %v1054_v61, %v1038_v51  ;;  %v1039_v43 = vmul.f32 0.088388346, %v1002_v52  ;;  %v1119_v51 = vsel %vm1103_vm11, 0.0, %v4641_v5  ;;  %v1090_v52 = vld [vmem:[#allocation2 + $0x60] sm:$0xff] }
 0x293   :  { %v1073_v41 = vmul.f32 %v1057_v1, %v1041_v13  ;;  %v1115_v1 = vsel %vm1099_vm8, 0.0, %v4641_v5  ;;  %v1072_v13 = vmul.f32 %v1056_v54, %v1040_v57  ;;  %v1055_v57 = vld [vmem:[%s4620_s1 + $0x48] sm:$0xff]  ;;  %v1092_v54 = vld [vmem:[#allocation2 + $0x70] sm:$0xff]  ;;  %vm1106_vm13 = vcmp.eq.f32.partialorder %v1090_v52, 1.0  ;;  %v1093_v52 = vld [vmem:[#allocation2 + $0x78] sm:$0xff] }
 0x294   :  { %v3724_v29 = vadd.f32 %v1115_v1, %v1067_v39  ;;  %v1060_v1 = vld [vmem:[%s4620_s1 + $0x70] sm:$0xff]  ;;  %vm1108_vm12 = vcmp.eq.f32.partialorder %v1092_v54, 1.0  ;;  %vm1109_vm14 = vcmp.eq.f32.partialorder %v1093_v52, 1.0 }
 0x295   :  { %1154 = vmax.xlane.f32.xlu1 %v3705_v16  ;;  %v3713_v50 = vadd.f32 %v1121_v10, %v1073_v41  ;;  %v1086_v41 = vld [vmem:[#allocation2 + $0x40] sm:$0xff]  ;;  %v3730_v9 = vadd.f32 %v1120_v40, %v1072_v13  ;;  %v1071_v13 = vmul.f32 %v1055_v57, %v1039_v43  ;;  %v1124_v17 = vsel %vm1108_vm12, 0.0, %v4641_v5  ;;  %v3753_v57 = vpop.f32.mrb[64].mxu0 }
 0x296   :  { %v2779_v30 = vpop.f32.mrb[28].mxu1  ;;  %vm1102_vm10 = vcmp.eq.f32.partialorder %v1086_v41, 1.0  ;;  %v3759_v54 = vpop.f32.mrb[65].mxu0 }
 0x297   :  { %1164 = vmax.xlane.f32.xlu0 %v3713_v50  ;;  %v1015_v46 = vpop.f32.mrb[29].mxu1  ;;  %v1118_v55 = vsel %vm1102_vm10, 0.0, %v4641_v5  ;;  %v1044_v39 = vmul.f32 0.088388346, %v2779_v30  ;;  %v1058_v30 = vld [vmem:[%s4620_s1 + $0x60] sm:$0xff]  ;;  %v3748_v11 = vadd.f32 %v1119_v51, %v1071_v13 }
 0x298   :  { %v2780_v49 = vpop.f32.mrb[30].mxu1  ;;  %v3740_v40 = vadd.f32 %v1118_v55, %v1070_v42  ;;  %v1042_v61 = vmul.f32 0.088388346, %v1015_v46  ;;  %v197_v46 = vld [vmem:[%s4623_s4 + $0x108] sm:$0xff]  ;;  %v1122_v55 = vsel %vm1106_vm13, 0.0, %v4641_v5  ;;  %v196_v51 = vld [vmem:[%s4623_s4 + $0x100] sm:$0xff] }
 0x299   :  { %1150 = vmax.xlane.f32.xlu1 %v3719_v2  ;;  %v1018_v10 = vpop.f32.mrb[31].mxu1  ;;  %v1076_v41 = vmul.f32 %v1060_v1, %v1044_v39  ;;  %v3761_v39 = vpop.f32.mrb[66].mxu0 }
 0x29a   :  { %v1074_v42 = vmul.f32 %v1058_v30, %v1042_v61  ;;  %v3763_v1 = vpop.f32.mrb[67].mxu0  ;;  %v1061_v61 = vld [vmem:[%s4620_s1 + $0x78] sm:$0xff]  ;;  %v1091_v30 = vld [vmem:[#allocation2 + $0x68] sm:$0xff] }
 0x29b   :  { %v3751_v43 = vadd.f32 %v1124_v17, %v1076_v41  ;;  %v1045_v41 = vmul.f32 0.088388346, %v2780_v49  ;;  %vm1107_vm15 = vcmp.eq.f32.partialorder %v1091_v30, 1.0 }
 0x29c   :  { %v3766_v13 = vadd.f32 %v1122_v55, %v1074_v42  ;;  %v1059_v42 = vld [vmem:[%s4620_s1 + $0x68] sm:$0xff]  ;;  %v1125_v55 = vsel %vm1109_vm14, 0.0, %v4641_v5  ;;  %v1123_v49 = vsel %vm1107_vm15, 0.0, %v4641_v5 }
 0x29d   :  { %1152 = vmax.xlane.f32.xlu1 %v3724_v29  ;;  %v1077_v17 = vmul.f32 %v1061_v61, %v1045_v41 }
 0x29f   :  { %v3779_v35 = vadd.f32 %v1125_v55, %v1077_v17 }
 0x2a1   :  { %1162 = vmax.xlane.f32.xlu1 %v3730_v9 }
 0x2a5   :  { %1158 = vmax.xlane.f32.xlu1 %v3740_v40 }
 0x2a9   :  { %1160 = vmax.xlane.f32.xlu1 %v3748_v11 }
 0x2ad   :  { %379 = vperm.xlu0 %2904, %v197_v46   ;;  %1170 = vmax.xlane.f32.xlu1 %v3751_v43  ;;  %v1043_v46 = vmul.f32 0.088388346, %v1018_v10 }
 0x2af   :  { %v1075_v53 = vmul.f32 %v1059_v42, %v1043_v46 }
 0x2b1   :  { %1166 = vmax.xlane.f32.xlu1 %v3766_v13  ;;  %v3783_v36 = vadd.f32 %v1123_v49, %v1075_v53 }
 0x2c2   :  { %374 = vperm.xlu1 %2905, %v196_v51  }
 0x2cc   :  { %1172 = vmax.xlane.f32.xlu0 %v3779_v35 }
 0x2d0   :  { %1168 = vmax.xlane.f32.xlu0 %v3783_v36 }
 0x312   :  { %v1147_v51 = vpop.xlane.xlu1 %1146 }
 0x313   :  { %v1176_v10 = vsub.f32 %v3667_v0, %v1147_v51 }
 0x315   :  { %v1194_v52 = vmul.f32 1.442695, %v1176_v10 }
 0x316   :  { %v1143_v41 = vpop.xlane.xlu1 %1142 }
 0x317   :  { %2946 = vpow2.f32 %v1194_v52  ;;  %v1174_v61 = vsub.f32 %v3674_v34, %v1143_v41 }
 0x319   :  { %v1190_v30 = vmul.f32 1.442695, %v1174_v61 }
 0x31a   :  { %v1149_v46 = vpop.xlane.xlu1 %1148 }
 0x31b   :  { %2948 = vpow2.f32 %v1190_v30  ;;  %v1177_v17 = vsub.f32 %v3688_v56, %v1149_v46 }
 0x31c   :  { %v1157_v42 = vpop.xlane.xlu0 %1156 }
 0x31d   :  { %v1196_v55 = vmul.f32 1.442695, %v1177_v17  ;;  %v1181_v53 = vsub.f32 %v3692_v60, %v1157_v42 }
 0x31e   :  { %v1145_v49 = vpop.xlane.xlu1 %1144 }
 0x31f   :  { %2950 = vpow2.f32 %v1196_v55  ;;  %v1175_v5 = vsub.f32 %v3696_v22, %v1145_v49  ;;  %v1204_v51 = vmul.f32 1.442695, %v1181_v53 }
 0x321   :  { %v3791_v33 = vpop.eup %2946  ;;  %v1192_v0 = vmul.f32 1.442695, %v1175_v5 }
 0x322   :  { %v1155_v10 = vpop.xlane.xlu1 %1154  ;;  %1226 = vadd.xlane.f32.xlu1 %v3791_v33 }
 0x323   :  { %2952 = vpow2.f32 %v1192_v0  ;;  %v1180_v34 = vsub.f32 %v3705_v16, %v1155_v10 }
 0x324   :  { %2954 = vpow2.f32 %v1204_v51  ;;  %v1165_v60 = vpop.xlane.xlu0 %1164 }
 0x325   :  { %v3795_v52 = vpop.eup %2948  ;;  %v1202_v56 = vmul.f32 1.442695, %v1180_v34  ;;  %v1185_v30 = vsub.f32 %v3713_v50, %v1165_v60 }
 0x326   :  { %v1151_v41 = vpop.xlane.xlu1 %1150  ;;  %1222 = vadd.xlane.f32.xlu1 %v3795_v52 }
 0x327   :  { %2956 = vpow2.f32 %v1202_v56  ;;  %v1178_v22 = vsub.f32 %v3719_v2, %v1151_v41  ;;  %v1212_v55 = vmul.f32 1.442695, %v1185_v30 }
 0x329   :  { %v3799_v61 = vpop.eup %2950  ;;  %v1198_v5 = vmul.f32 1.442695, %v1178_v22 }
 0x32a   :  { %v1153_v46 = vpop.xlane.xlu1 %1152  ;;  %1228 = vadd.xlane.f32.xlu0 %v3799_v61 }
 0x32b   :  { %2958 = vpow2.f32 %v1198_v5  ;;  %v1179_v16 = vsub.f32 %v3724_v29, %v1153_v46 }
 0x32c   :  { %v380_v46 = vpop.permute.xlu0 %379 }
 0x32d   :  { %v3804_v17 = vpop.eup %2952  ;;  %v1200_v42 = vmul.f32 1.442695, %v1179_v16 }
 0x32e   :  { %v1163_v53 = vpop.xlane.xlu1 %1162  ;;  %1224 = vadd.xlane.f32.xlu0 %v3804_v17  ;;  %v3808_v49 = vpop.eup %2954 }
 0x32f   :  { %2960 = vpow2.f32 %v1200_v42  ;;  %v1184_v2 = vsub.f32 %v3730_v9, %v1163_v53  ;;  %v795_v42 = vadd.f32 %v3761_v39, %v380_v46  ;;  %v198_v39 = vld [vmem:[%s4623_s4 + $0x110] sm:$0xff] }
 0x330   :  { %2962 = vpow2.f32 %v1212_v55  ;;  %v3833_v55 = vadd.f32 %v3763_v1, %v380_v46  ;;  %v3847_v1 = vpop.f32.mrb[68].mxu0 }
 0x331   :  { %v3810_v0 = vpop.eup %2956  ;;  %v1210_v50 = vmul.f32 1.442695, %v1184_v2 }
 0x332   :  { %v1159_v51 = vpop.xlane.xlu1 %1158  ;;  %1234 = vadd.xlane.f32.xlu1 %v3810_v0  ;;  %1236 = vadd.xlane.f32.xlu0 %v3808_v49  ;;  %4663 = vst [vmem:[#allocation27_spill] sm:$0xff] %v3833_v55 }
 0x333   :  { %2964 = vpow2.f32 %v1210_v50  ;;  %v1182_v29 = vsub.f32 %v3740_v40, %v1159_v51 }
 0x335   :  { %v3815_v10 = vpop.eup %2958  ;;  %v1206_v34 = vmul.f32 1.442695, %v1182_v29 }
 0x336   :  { %v1161_v56 = vpop.xlane.xlu1 %1160  ;;  %1230 = vadd.xlane.f32.xlu1 %v3815_v10 }
 0x337   :  { %2966 = vpow2.f32 %v1206_v34  ;;  %v1183_v9 = vsub.f32 %v3748_v11, %v1161_v56  ;;  %v3849_v34 = vpop.f32.mrb[69].mxu0  ;;  %v200_v56 = vld [vmem:[%s4623_s4 + $0x120] sm:$0xff] }
 0x339   :  { %v3819_v41 = vpop.eup %2960  ;;  %v1208_v60 = vmul.f32 1.442695, %v1183_v9 }
 0x33a   :  { %v1171_v22 = vpop.xlane.xlu1 %1170  ;;  %1232 = vadd.xlane.f32.xlu0 %v3819_v41  ;;  %v3822_v5 = vpop.eup %2962 }
 0x33b   :  { %2968 = vpow2.f32 %v1208_v60  ;;  %v1188_v29 = vsub.f32 %v3751_v43, %v1171_v22 }
 0x33d   :  { %v3824_v30 = vpop.eup %2964 }
 0x33e   :  { %1242 = vadd.xlane.f32.xlu1 %v3824_v30  ;;  %v1167_v40 = vpop.xlane.xlu1 %1166  ;;  %1244 = vadd.xlane.f32.xlu0 %v3822_v5 }
 0x341   :  { %v3828_v16 = vpop.eup %2966 }
 0x342   :  { %1238 = vadd.xlane.f32.xlu1 %v3828_v16  ;;  %v375_v11 = vpop.permute.xlu1 %374 }
 0x343   :  { %v791_v53 = vadd.f32 %v3753_v57, %v375_v11  ;;  %v3837_v2 = vadd.f32 %v3759_v54, %v375_v11  ;;  %v3851_v57 = vpop.f32.mrb[70].mxu0  ;;  %v202_v11 = vld [vmem:[%s4623_s4 + $0x130] sm:$0xff] }
 0x344   :  { %v3853_v54 = vpop.f32.mrb[71].mxu0 }
 0x345   :  { %4664 = vst [vmem:[#allocation28_spill] sm:$0xff] %v3837_v2  ;;  %v3839_v50 = vpop.eup %2968  ;;  %v901_v51 = vpack.c.bf16 %v795_v42, %v791_v53  ;;  %v3858_v9 = vpop.f32.mrb[72].mxu0  ;;  %v1186_v2 = vsub.f32 %v3766_v13, %v1167_v40  ;;  %v205_v40 = vld [vmem:[%s4623_s4 + $0x148] sm:$0xff] }
 0x346   :  { %1240 = vadd.xlane.f32.xlu0 %v3839_v50  ;;  %v3860_v60 = vpop.f32.mrb[73].mxu0 }
 0x347   :  { %2797 = vmatprep.mubr.bf16.mxu1 %v901_v51  ;;  %v3862_v46 = vpop.f32.mrb[74].mxu0  ;;  %v1214_v38 = vmul.f32 1.442695, %v1186_v2  ;;  %v206_v2 = vld [vmem:[%s4623_s4 + $0x150] sm:$0xff] }
 0x348   :  { %v3867_v42 = vpop.f32.mrb[75].mxu0 }
 0x349   :  { %v3869_v53 = vpop.f32.mrb[76].mxu0 }
 0x34a   :  { %v3871_v51 = vpop.f32.mrb[77].mxu0 }
 0x353   :  { %384 = vperm.xlu1 %2905, %v198_v39   ;;  %v204_v39 = vld [vmem:[%s4623_s4 + $0x140] sm:$0xff] }
 0x359   :  { %v1173_v55 = vpop.xlane.xlu0 %1172 }
 0x35a   :  { %v1189_v37 = vsub.f32 %v3779_v35, %v1173_v55  ;;  %v207_v55 = vld [vmem:[%s4623_s4 + $0x158] sm:$0xff] }
 0x35c   :  { %394 = vperm.xlu0 %2904, %v200_v56   ;;  %v1218_v56 = vmul.f32 1.442695, %v1188_v29  ;;  %v1220_v25 = vmul.f32 1.442695, %v1189_v37  ;;  %v3901_v37 = vpop.f32.mrb[78].mxu0  ;;  %v209_v29 = vld [vmem:[%s4623_s4 + $0x168] sm:$0xff] }
 0x35d   :  { %v1169_v26 = vpop.xlane.xlu0 %1168 }
 0x35e   :  { %2970 = vpow2.f32 %v1218_v56  ;;  %v211_v56 = vld [vmem:[%s4623_s4 + $0x178] sm:$0xff] }
 0x35f   :  { %2972 = vpow2.f32 %v1214_v38  ;;  %v3903_v38 = vpop.f32.mrb[79].mxu0 }
 0x360   :  { %404 = vperm.xlu0 %2904, %v202_v11   ;;  %v1187_v11 = vsub.f32 %v3783_v36, %v1169_v26  ;;  %2974 = vpow2.f32 %v1220_v25  ;;  %v199_v26 = vld [vmem:[%s4623_s4 + $0x118] sm:$0xff]  ;;  %v201_v25 = vld [vmem:[%s4623_s4 + $0x128] sm:$0xff] }
 0x361   :  { %v203_v36 = vld [vmem:[%s4623_s4 + $0x138] sm:$0xff] }
 0x362   :  { %v1216_v43 = vmul.f32 1.442695, %v1187_v11  ;;  %v210_v11 = vld [vmem:[%s4623_s4 + $0x170] sm:$0xff] }
 0x364   :  { %414 = vperm.xlu0 %2904, %v204_v39   ;;  %2976 = vpow2.f32 %v1216_v43  ;;  %v208_v39 = vld [vmem:[%s4623_s4 + $0x160] sm:$0xff] }
 0x368   :  { %v3880_v28 = vpop.eup %2970 }
 0x369   :  { %4665 = vst [vmem:[#allocation29_spill] sm:$0xff] %v3880_v28  ;;  %v3883_v22 = vpop.eup %2972 }
 0x36a   :  { %v3886_v13 = vpop.eup %2974 }
 0x36b   :  { %4666 = vst [vmem:[#allocation30_spill] sm:$0xff] %v3886_v13 }
 0x36e   :  { %v3889_v35 = vpop.eup %2976 }
 0x377   :  { %1250 = vadd.xlane.f32.xlu1 %v3880_v28 }
 0x37b   :  { %1246 = vadd.xlane.f32.xlu1 %v3883_v22 }
 0x383   :  { %1252 = vadd.xlane.f32.xlu0 %v3886_v13 }
 0x387   :  { %1248 = vadd.xlane.f32.xlu0 %v3889_v35 }
 0x38c   :  { %389 = vperm.xlu1 %2905, %v199_v26  }
 0x390   :  { %399 = vperm.xlu1 %2905, %v201_v25  }
 0x394   :  { %409 = vperm.xlu1 %2905, %v203_v36  }
 0x398   :  { %419 = vperm.xlu1 %2905, %v205_v40  }
 0x39c   :  { %429 = vperm.xlu1 %2905, %v207_v55  }
 0x39d   :  { %424 = vperm.xlu0 %2904, %v206_v2  }
 0x3a0   :  { %439 = vperm.xlu1 %2905, %v209_v29  }
 0x3a1   :  { %434 = vperm.xlu0 %2904, %v208_v39   ;;  %v4667_v39 = vpack.c.bf16 %v3550_v48, %v3548_v47 }
 0x3a4   :  { %449 = vperm.xlu1 %2905, %v211_v56  }
 0x3a5   :  { %444 = vperm.xlu0 %2904, %v210_v11   ;;  %v4668_v11 = vpack.c.bf16 %v3556_v59, %v3554_v58 }
 0x3af   :  { %v1227_v43 = vpop.xlane.xlu1 %1226 }
 0x3b3   :  { %v1223_v26 = vpop.xlane.xlu1 %1222 }
 0x3b4   :  { %2978 = vrcp.f32 %v1223_v26 }
 0x3b7   :  { %v1229_v25 = vpop.xlane.xlu0 %1228 }
 0x3b8   :  { %2980 = vrcp.f32 %v1229_v25 }
 0x3b9   :  { %2982 = vrcp.f32 %v1227_v43 }
 0x3bb   :  { %v1225_v36 = vpop.xlane.xlu0 %1224 }
 0x3bc   :  { %2984 = vrcp.f32 %v1225_v36 }
 0x3be   :  { %v2979_v55 = vpop.eup %2978 }
 0x3bf   :  { %v1235_v40 = vpop.xlane.xlu1 %1234  ;;  %v1237_v2 = vpop.xlane.xlu0 %1236  ;;  %v1270_v43 = vmul.f32 %v2979_v55, %v3795_v52 }
 0x3c2   :  { %v2981_v28 = vpop.eup %2980 }
 0x3c3   :  { %v1231_v29 = vpop.xlane.xlu1 %1230  ;;  %1399 = vxpose.xlu0.c.b16.start [1/8] %v4667_v39, 128  ;;  %v2983_v27 = vpop.eup %2982  ;;  %v1273_v36 = vmul.f32 %v2981_v28, %v3799_v61  ;;  %v4670_v28 = vpack.c.bf16 %v3568_v20, %v3566_v19  ;;  %v4672_v20 = vpack.c.bf16 %v3584_v45, %v3582_v44  ;;  %v4674_v45 = vpack.c.bf16 %v3596_v15, %v3594_v14 }
 0x3c4   :  { %2986 = vrcp.f32 %v1231_v29  ;;  %v1272_v47 = vmul.f32 %v2983_v27, %v3791_v33  ;;  %v4669_v29 = vpack.c.bf16 %v3562_v8, %v3560_v7  ;;  %v4671_v33 = vpack.c.bf16 %v3574_v32, %v3572_v31 }
 0x3c6   :  { %v2985_v56 = vpop.eup %2984  ;;  %v1287_v58 = vpack.c.bf16 %v1273_v36, %v1272_v47 }
 0x3c7   :  { %1400 = vxpose.xlu0.c.b16.cont [2/8] %v4668_v11, 128  ;;  %v1233_v26 = vpop.xlane.xlu0 %1232  ;;  %v1271_v25 = vmul.f32 %v2985_v56, %v3804_v17 }
 0x3c8   :  { %2988 = vrcp.f32 %v1233_v26 }
 0x3c9   :  { %2990 = vrcp.f32 %v1235_v40  ;;  %v1286_v13 = vpack.c.bf16 %v1271_v25, %v1270_v43 }
 0x3ca   :  { %2992 = vrcp.f32 %v1237_v2 }
 0x3cb   :  { %v1243_v48 = vpop.xlane.xlu1 %1242  ;;  %1401 = vxpose.xlu0.c.b16.cont [3/8] %v4669_v29, 128  ;;  %2781 = vmatprep.subr.bf16.mxu1 %v1286_v13  ;;  %v1245_v59 = vpop.xlane.xlu0 %1244 }
 0x3cc   :  { %2782 = vmatpush3.bf16.xpose.msra.mxu1 %v1286_v13 }
 0x3cd   :  { %2783 = vmatprep.subr.bf16.mxu1 %v1287_v58 }
 0x3ce   :  { %v2987_v61 = vpop.eup %2986 }
 0x3cf   :  { %v1239_v52 = vpop.xlane.xlu1 %1238  ;;  %1402 = vxpose.xlu0.c.b16.cont [4/8] %v4670_v28, 128  ;;  %v1274_v8 = vmul.f32 %v2987_v61, %v3815_v10  ;;  %v4673_v10 = vpack.c.bf16 %v3590_v63, %v3588_v62 }
 0x3d0   :  { %2994 = vrcp.f32 %v1239_v52 }
 0x3d2   :  { %v2989_v17 = vpop.eup %2988 }
 0x3d3   :  { %v2991_v40 = vpop.eup %2990  ;;  %v385_v27 = vpop.permute.xlu1 %384  ;;  %1403 = vxpose.xlu0.c.b16.cont [5/8] %v4671_v33, 128  ;;  %v1275_v13 = vmul.f32 %v2989_v17, %v3819_v41 }
 0x3d4   :  { %v1241_v7 = vpop.xlane.xlu0 %1240  ;;  %v2993_v55 = vpop.eup %2992  ;;  %v3948_v2 = vadd.f32 %v3849_v34, %v385_v27  ;;  %2784 = vmatpush3.bf16.xpose.msra.mxu1 %v1287_v58  ;;  %v1276_v31 = vmul.f32 %v2991_v40, %v3810_v0  ;;  %v3975_v47 = vadd.f32 %v3847_v1, %v385_v27 }
 0x3d5   :  { %2996 = vrcp.f32 %v1241_v7  ;;  %v1288_v19 = vpack.c.bf16 %v1275_v13, %v1274_v8  ;;  %v1277_v32 = vmul.f32 %v2993_v55, %v3808_v49 }
 0x3d6   :  { %2998 = vrcp.f32 %v1243_v48 }
 0x3d7   :  { %1404 = vxpose.xlu0.c.b16.cont [6/8] %v4672_v20, 128  ;;  %2785 = vmatprep.subr.bf16.mxu1 %v1288_v19  ;;  %3000 = vrcp.f32 %v1245_v59  ;;  %v1289_v34 = vpack.c.bf16 %v1277_v32, %v1276_v31 }
 0x3da   :  { %v2995_v56 = vpop.eup %2994 }
 0x3db   :  { %1405 = vxpose.xlu0.c.b16.cont [7/8] %v4673_v10, 128  ;;  %v395_v41 = vpop.permute.xlu0 %394  ;;  %v1278_v62 = vmul.f32 %v2995_v56, %v3828_v16 }
 0x3dc   :  { %v3959_v39 = vadd.f32 %v3860_v60, %v395_v41  ;;  %2786 = vmatpush3.bf16.xpose.msra.mxu1 %v1288_v19  ;;  %v811_v59 = vadd.f32 %v3858_v9, %v395_v41  ;;  %v1571_v41 = vld [vmem:[#allocation2 + $0xc8] sm:$0xff] }
 0x3dd   :  { %2787 = vmatprep.subr.bf16.mxu1 %v1289_v34  ;;  %vm1587_vm12 = vcmp.eq.f32.partialorder %v1571_v41, 1.0  ;;  %v2651_v41 = vld [vmem:[%s4620_s1 + $0xd0] sm:$0xff] }
 0x3df   :  { %v2997_v44 = vpop.eup %2996  ;;  %1406 = vxpose.xlu0.c.b16.end [8/8] %v4674_v45, 128  ;;  %v405_v49 = vpop.permute.xlu0 %404  ;;  %v4675_v45 = vld [vmem:[#allocation30_spill] sm:$0xff] }
 0x3e0   :  { %v1279_v0 = vmul.f32 %v2997_v44, %v3839_v50  ;;  %v3966_v11 = vadd.f32 %v3871_v51, %v405_v49  ;;  %v2999_v63 = vpop.eup %2998  ;;  %v821_v17 = vadd.f32 %v3869_v53, %v405_v49  ;;  %v4676_v49 = vld [vmem:[#allocation21_spill] sm:$0xff] }
 0x3e1   :  { %v3001_v43 = vpop.eup %3000  ;;  %v1280_v14 = vmul.f32 %v2999_v63, %v3824_v30 }
 0x3e2   :  { %v1290_v60 = vpack.c.bf16 %v1279_v0, %v1278_v62  ;;  %v1281_v15 = vmul.f32 %v3001_v43, %v3822_v5 }
 0x3e3   :  { %v415_v26 = vpop.permute.xlu0 %414 }
 0x3e4   :  { %v3970_v25 = vadd.f32 %v3618_v4, %v415_v26  ;;  %2788 = vmatpush3.bf16.xpose.msra.mxu1 %v1289_v34  ;;  %v1291_v36 = vpack.c.bf16 %v1281_v15, %v1280_v14  ;;  %v831_v33 = vadd.f32 %v3616_v3, %v415_v26  ;;  %v4679_v26 = vld [vmem:[#allocation20_spill] sm:$0xff]  ;;  %v4680_v14 = vld [vmem:[#allocation29_spill] sm:$0xff] }
 0x3e5   :  { %2789 = vmatprep.subr.bf16.mxu1 %v1290_v60 }
 0x3ec   :  { %2790 = vmatpush3.bf16.xpose.msra.mxu1 %v1290_v60 }
 0x3ed   :  { %2791 = vmatprep.subr.bf16.mxu1 %v1291_v36 }
 0x3f4   :  { %2792 = vmatpush3.bf16.xpose.msra.mxu1 %v1291_v36 }
 0x404   :  { %v1251_v50 = vpop.xlane.xlu1 %1250 }
 0x408   :  { %v1247_v51 = vpop.xlane.xlu1 %1246 }
 0x409   :  { %3002 = vrcp.f32 %v1247_v51 }
 0x40c   :  { %v390_v16 = vpop.permute.xlu1 %389 }
 0x40d   :  { %v3978_v48 = vadd.f32 %v3851_v57, %v390_v16  ;;  %v3981_v4 = vadd.f32 %v3853_v54, %v390_v16  ;;  %v4681_v16 = vld [vmem:[#allocation25_spill] sm:$0xff] }
 0x40f   :  { %v903_v30 = vpack.c.bf16 %v3978_v48, %v3975_v47  ;;  %v4689_v47 = vld [vmem:[#allocation15_spill] sm:$0xff] }
 0x410   :  { %v400_v29 = vpop.permute.xlu1 %399  ;;  %v1253_v58 = vpop.xlane.xlu0 %1252 }
 0x411   :  { %v815_v52 = vadd.f32 %v3862_v46, %v400_v29  ;;  %v3990_v1 = vadd.f32 %v3867_v42, %v400_v29  ;;  %3004 = vrcp.f32 %v1253_v58  ;;  %v4682_v58 = vld [vmem:[#allocation26_spill] sm:$0xff] }
 0x412   :  { %3006 = vrcp.f32 %v1251_v50 }
 0x413   :  { %v905_v57 = vpack.c.bf16 %v815_v52, %v811_v59  ;;  %v4683_v52 = vld [vmem:[#allocation23_spill] sm:$0xff] }
 0x414   :  { %v410_v28 = vpop.permute.xlu1 %409  ;;  %v1249_v61 = vpop.xlane.xlu0 %1248 }
 0x415   :  { %v825_v40 = vadd.f32 %v3901_v37, %v410_v28  ;;  %v3997_v9 = vadd.f32 %v3903_v38, %v410_v28  ;;  %3008 = vrcp.f32 %v1249_v61  ;;  %v3003_v37 = vpop.eup %3002  ;;  %v4684_v61 = vld [vmem:[#allocation24_spill] sm:$0xff] }
 0x416   :  { %v1282_v44 = vmul.f32 %v3003_v37, %v3883_v22  ;;  %v4687_v37 = vld [vmem:[#allocation13_spill] sm:$0xff] }
 0x417   :  { %v907_v46 = vpack.c.bf16 %v825_v40, %v821_v17 }
 0x418   :  { %v420_v27 = vpop.permute.xlu1 %419 }
 0x419   :  { %v835_v7 = vadd.f32 %v3620_v6, %v420_v27  ;;  %v4004_v8 = vadd.f32 %v3622_v12, %v420_v27  ;;  %v1570_v27 = vld [vmem:[#allocation2 + $0xc0] sm:$0xff] }
 0x41a   :  { %vm1586_vm10 = vcmp.eq.f32.partialorder %v1570_v27, 1.0  ;;  %v2650_v27 = vld [vmem:[%s4620_s1 + $0xc8] sm:$0xff] }
 0x41b   :  { %v909_v13 = vpack.c.bf16 %v835_v7, %v831_v33  ;;  %v3005_v19 = vpop.eup %3004  ;;  %v4685_v33 = vld [vmem:[#allocation11_spill] sm:$0xff]  ;;  %v4686_v7 = vld [vmem:[#allocation12_spill] sm:$0xff] }
 0x41c   :  { %v430_v38 = vpop.permute.xlu1 %429  ;;  %v425_v55 = vpop.permute.xlu0 %424 }
 0x41d   :  { %v845_v20 = vadd.f32 %v3628_v23, %v430_v38  ;;  %v4010_v31 = vadd.f32 %v3630_v24, %v430_v38  ;;  %v841_v3 = vadd.f32 %v3624_v18, %v425_v55  ;;  %v4014_v6 = vadd.f32 %v3626_v21, %v425_v55  ;;  %v3007_v12 = vpop.eup %3006  ;;  %v4677_v18 = vld [vmem:[#allocation22_spill] sm:$0xff]  ;;  %v4678_v21 = vld [vmem:[#allocation19_spill] sm:$0xff] }
 0x41e   :  { %v1285_v24 = vmul.f32 %v3005_v19, %v4675_v45  ;;  %v1284_v15 = vmul.f32 %v3007_v12, %v4680_v14  ;;  %v4688_v38 = vld [vmem:[#allocation14_spill] sm:$0xff] }
 0x41f   :  { %v3009_v32 = vpop.eup %3008  ;;  %v911_v10 = vpack.c.bf16 %v845_v20, %v841_v3 }
 0x420   :  { %v440_v34 = vpop.permute.xlu1 %439  ;;  %v435_v56 = vpop.permute.xlu0 %434  ;;  %v1283_v23 = vmul.f32 %v3009_v32, %v3889_v35  ;;  %v1293_v51 = vpack.c.bf16 %v1285_v24, %v1284_v15 }
 0x421   :  { %v855_v0 = vadd.f32 %v4676_v49, %v440_v34  ;;  %v4023_v62 = vadd.f32 %v4677_v18, %v440_v34  ;;  %v851_v63 = vadd.f32 %v4678_v21, %v435_v56  ;;  %v4027_v60 = vadd.f32 %v4679_v26, %v435_v56  ;;  %v4694_v34 = vld [vmem:[#allocation28_spill] sm:$0xff] }
 0x422   :  { %v1292_v43 = vpack.c.bf16 %v1283_v23, %v1282_v44 }
 0x423   :  { %v913_v36 = vpack.c.bf16 %v855_v0, %v851_v63  ;;  %v1575_v0 = vld [vmem:[#allocation2 + $0xe8] sm:$0xff] }
 0x424   :  { %v450_v35 = vpop.permute.xlu1 %449  ;;  %2793 = vmatprep.subr.bf16.mxu1 %v1292_v43  ;;  %v445_v50 = vpop.permute.xlu0 %444  ;;  %vm1591_vm9 = vcmp.eq.f32.partialorder %v1575_v0, 1.0 }
 0x425   :  { %v865_v29 = vadd.f32 %v4681_v16, %v450_v35  ;;  %v4034_v59 = vadd.f32 %v4682_v58, %v450_v35  ;;  %v861_v28 = vadd.f32 %v4683_v52, %v445_v50  ;;  %v4038_v17 = vadd.f32 %v4684_v61, %v445_v50  ;;  %2794 = vmatpush3.bf16.xpose.msra.mxu1 %v1292_v43 }
 0x426   :  { %2795 = vmatprep.subr.bf16.mxu1 %v1293_v51 }
 0x427   :  { %v915_v40 = vpack.c.bf16 %v865_v29, %v861_v28 }
 0x429   :  { %v1407_v55 = vpop.trf.xlu0 }
 0x42d   :  { %2796 = vmatpush3.bf16.xpose.msra.mxu1 %v1293_v51  ;;  %v1408_v48 = vpop.trf.xlu0 }
 0x42e   :  { %2813 = vmatprep.subr.bf16.mxu1 %v4685_v33 }
 0x434   :  { %2798 = vmatmul.mubr.bf16.vlgmr.msra.gmra.mrb[32].mxu1 %v903_v30  ;;  %v4690_v30 = vld [vmem:[#allocation16_spill] sm:$0xff] }
 0x435   :  { %2801 = vmatprep.mubr.bf16.mxu1 %v905_v57  ;;  %2814 = vmatpush3.bf16.msra.mxu1 %v4685_v33  ;;  %v4691_v57 = vld [vmem:[#allocation17_spill] sm:$0xff]  ;;  %v1562_v33 = vld [vmem:[#allocation2 + $0x80] sm:$0xff] }
 0x436   :  { %2815 = vmatprep.subr.bf16.mxu1 %v4686_v7  ;;  %vm1578_vm0 = vcmp.eq.f32.partialorder %v1562_v33, 1.0 }
 0x439   :  { %2816 = vmatpush3.bf16.msra.mxu1 %v4686_v7 }
 0x43a   :  { %2817 = vmatprep.subr.bf16.mxu1 %v4687_v37 }
 0x43c   :  { %2802 = vmatmul.mubr.bf16.gmra.mrb[36].mxu1 %v907_v46  ;;  %v1409_v46 = vpop.trf.xlu0 }
 0x43d   :  { %2805 = vmatprep.mubr.bf16.mxu1 %v909_v13  ;;  %2818 = vmatpush3.bf16.msra.mxu1 %v4687_v37  ;;  %v4692_v13 = vld [vmem:[#allocation18_spill] sm:$0xff] }
 0x43e   :  { %2819 = vmatprep.subr.bf16.mxu1 %v4688_v38 }
 0x440   :  { %v1410_v19 = vpop.trf.xlu0 }
 0x441   :  { %2820 = vmatpush3.bf16.msra.mxu1 %v4688_v38  ;;  %v2641_v38 = vld [vmem:[%s4620_s1 + $0x80] sm:$0xff] }
 0x442   :  { %2821 = vmatprep.subr.bf16.mxu1 %v4689_v47 }
 0x444   :  { %2806 = vmatmul.mubr.bf16.gmra.mrb[40].mxu1 %v911_v10  ;;  %v1411_v20 = vpop.trf.xlu0  ;;  %v4693_v10 = vld [vmem:[#allocation27_spill] sm:$0xff] }
 0x445   :  { %2809 = vmatprep.mubr.bf16.mxu1 %v913_v36  ;;  %2822 = vmatpush3.bf16.msra.mxu1 %v4689_v47  ;;  %v4695_v56 = vpack.c.bf16 %v4693_v10, %v4694_v34  ;;  %v1569_v34 = vld [vmem:[#allocation2 + $0xb8] sm:$0xff] }
 0x446   :  { %2823 = vmatprep.subr.bf16.mxu1 %v4690_v30  ;;  %vm1585_vm3 = vcmp.eq.f32.partialorder %v1569_v34, 1.0 }
 0x448   :  { %v1412_v3 = vpop.trf.xlu0 }
 0x449   :  { %2824 = vmatpush3.bf16.msra.mxu1 %v4690_v30 }
 0x44a   :  { %2825 = vmatprep.subr.bf16.mxu1 %v4691_v57 }
 0x44c   :  { %2810 = vmatmul.mubr.bf16.gmra.mrb[44].mxu1 %v915_v40  ;;  %v1413_v12 = vpop.trf.xlu0  ;;  %v1566_v40 = vld [vmem:[#allocation2 + $0xa0] sm:$0xff] }
 0x44d   :  { %2826 = vmatpush3.bf16.msra.mxu1 %v4691_v57  ;;  %2829 = vmatprep.mubr.bf16.mxu1 %v1407_v55  ;;  %v1563_v55 = vld [vmem:[#allocation2 + $0x88] sm:$0xff]  ;;  %vm1582_vm5 = vcmp.eq.f32.partialorder %v1566_v40, 1.0  ;;  %v2652_v40 = vld [vmem:[%s4620_s1 + $0xd8] sm:$0xff] }
 0x44e   :  { %2827 = vmatprep.subr.bf16.mxu1 %v4692_v13  ;;  %v2642_v57 = vld [vmem:[%s4620_s1 + $0x88] sm:$0xff]  ;;  %vm1579_vm1 = vcmp.eq.f32.partialorder %v1563_v55, 1.0 }
 0x450   :  { %v1414_v32 = vpop.trf.xlu0 }
 0x451   :  { %2828 = vmatpush3.bf16.msra.mxu1 %v4692_v13 }
 0x454   :  { %2830 = vmatmul.mubr.bf16.vlgmr.msra.gmra.mrb[48].mxu1 %v1408_v48 }
 0x455   :  { %2833 = vmatprep.mubr.bf16.mxu1 %v1409_v46  ;;  %v4696_v46 = vmov -1e+09  }
 0x456   :  { %v1594_v13 = vsel %vm1578_vm0, 0.0, %v4696_v46  ;;  %v1595_v33 = vsel %vm1579_vm1, 0.0, %v4696_v46  ;;  %v1598_v14 = vsel %vm1582_vm5, 0.0, %v4696_v46  ;;  %v1602_v0 = vsel %vm1586_vm10, 0.0, %v4696_v46 }
 0x457   :  { %vm2136_vm0 = vcmask 523264  }
 0x45c   :  { %2834 = vmatmul.mubr.bf16.gmra.mrb[52].mxu1 %v1410_v19 }
 0x45d   :  { %2837 = vmatprep.mubr.bf16.mxu1 %v1411_v20 }
 0x464   :  { %2838 = vmatmul.mubr.bf16.gmra.mrb[56].mxu1 %v1412_v3  ;;  %v1564_v3 = vld [vmem:[#allocation2 + $0x90] sm:$0xff] }
 0x465   :  { %2841 = vmatprep.mubr.bf16.mxu1 %v1413_v12  ;;  %vm1580_vm2 = vcmp.eq.f32.partialorder %v1564_v3, 1.0 }
 0x466   :  { %v1596_v3 = vsel %vm1580_vm2, 0.0, %v4696_v46 }
 0x46c   :  { %2842 = vmatmul.mubr.bf16.gmra.mrb[60].mxu1 %v1414_v32 }
 0x46d   :  { %2861 = vmatprep.mubr.bf16.mxu1 %v4695_v56  ;;  %v2643_v56 = vld [vmem:[%s4620_s1 + $0x90] sm:$0xff] }
 0x507   :  { %v4064_v44 = vpop.f32.mrb[32].mxu1 }
 0x508   :  { %v4066_v23 = vpop.f32.mrb[33].mxu1 }
 0x509   :  { %v4068_v45 = vpop.f32.mrb[34].mxu1 }
 0x50a   :  { %v4072_v49 = vpop.f32.mrb[35].mxu1 }
 0x50f   :  { %v4076_v18 = vpop.f32.mrb[36].mxu1 }
 0x510   :  { %v4078_v21 = vpop.f32.mrb[37].mxu1 }
 0x511   :  { %v4080_v63 = vpop.f32.mrb[38].mxu1 }
 0x512   :  { %v4084_v43 = vpop.f32.mrb[39].mxu1 }
 0x517   :  { %v4088_v15 = vpop.f32.mrb[40].mxu1 }
 0x518   :  { %v4090_v36 = vpop.f32.mrb[41].mxu1 }
 0x519   :  { %v4092_v35 = vpop.f32.mrb[42].mxu1 }
 0x51a   :  { %v4096_v51 = vpop.f32.mrb[43].mxu1 }
 0x51f   :  { %v4100_v29 = vpop.f32.mrb[44].mxu1 }
 0x520   :  { %v4102_v58 = vpop.f32.mrb[45].mxu1 }
 0x521   :  { %v4104_v52 = vpop.f32.mrb[46].mxu1 }
 0x522   :  { %v4108_v61 = vpop.f32.mrb[47].mxu1 }
 0x527   :  { %v2831_v7 = vpop.f32.mrb[48].mxu1 }
 0x528   :  { %v1449_v37 = vpop.f32.mrb[49].mxu1  ;;  %v1514_v12 = vmul.f32 0.088388346, %v2831_v7 }
 0x529   :  { %v1512_v47 = vmul.f32 0.088388346, %v1449_v37  ;;  %v2832_v48 = vpop.f32.mrb[50].mxu1 }
 0x52a   :  { %v1452_v30 = vpop.f32.mrb[51].mxu1  ;;  %v1547_v55 = vmul.f32 %v2643_v56, %v1514_v12  ;;  %v2645_v12 = vld [vmem:[%s4620_s1 + $0xa0] sm:$0xff] }
 0x52b   :  { %v1545_v19 = vmul.f32 %v2641_v38, %v1512_v47  ;;  %v1513_v20 = vmul.f32 0.088388346, %v1452_v30  ;;  %v1565_v38 = vld [vmem:[#allocation2 + $0x98] sm:$0xff]  ;;  %v1515_v47 = vmul.f32 0.088388346, %v2832_v48  ;;  %v1601_v48 = vsel %vm1585_vm3, 0.0, %v4696_v46 }
 0x52c   :  { %v2648_v30 = vld [vmem:[%s4620_s1 + $0xb8] sm:$0xff]  ;;  %vm1581_vm4 = vcmp.eq.f32.partialorder %v1565_v38, 1.0 }
 0x52d   :  { %v1546_v32 = vmul.f32 %v2642_v57, %v1513_v20  ;;  %v4119_v10 = vadd.f32 %v1594_v13, %v1545_v19  ;;  %v2644_v13 = vld [vmem:[%s4620_s1 + $0x98] sm:$0xff]  ;;  %v1597_v16 = vsel %vm1581_vm4, 0.0, %v4696_v46 }
 0x52e   :  { %v1548_v56 = vmul.f32 %v2644_v13, %v1515_v47  ;;  %v1567_v47 = vld [vmem:[#allocation2 + $0xa8] sm:$0xff] }
 0x52f   :  { %1626 = vmax.xlane.f32.xlu1 %v4119_v10  ;;  %v2835_v37 = vpop.f32.mrb[52].mxu1  ;;  %v4129_v57 = vadd.f32 %v1595_v33, %v1546_v32  ;;  %v4140_v33 = vadd.f32 %v1596_v3, %v1547_v55  ;;  %vm1583_vm7 = vcmp.eq.f32.partialorder %v1567_v47, 1.0 }
 0x530   :  { %v1465_v28 = vpop.f32.mrb[53].mxu1  ;;  %v4153_v13 = vadd.f32 %v1597_v16, %v1548_v56  ;;  %v2647_v16 = vld [vmem:[%s4620_s1 + $0xb0] sm:$0xff] }
 0x531   :  { %v2836_v7 = vpop.f32.mrb[54].mxu1  ;;  %v1516_v34 = vmul.f32 0.088388346, %v1465_v28 }
 0x532   :  { %v1519_v19 = vmul.f32 0.088388346, %v2836_v7  ;;  %v1468_v20 = vpop.f32.mrb[55].mxu1  ;;  %v1573_v7 = vld [vmem:[#allocation2 + $0xd8] sm:$0xff] }
 0x533   :  { %1628 = vmax.xlane.f32.xlu1 %v4129_v57  ;;  %v1549_v28 = vmul.f32 %v2645_v12, %v1516_v34  ;;  %vm1589_vm6 = vcmp.eq.f32.partialorder %v1573_v7, 1.0  ;;  %v1517_v55 = vmul.f32 0.088388346, %v1468_v20  ;;  %v1518_v7 = vmul.f32 0.088388346, %v2835_v37  ;;  %v2649_v37 = vld [vmem:[%s4620_s1 + $0xc0] sm:$0xff] }
 0x534   :  { %v1552_v32 = vmul.f32 %v2648_v30, %v1519_v19  ;;  %v2646_v19 = vld [vmem:[%s4620_s1 + $0xa8] sm:$0xff]  ;;  %v1605_v20 = vsel %vm1589_vm6, 0.0, %v4696_v46 }
 0x535   :  { %v4159_v12 = vadd.f32 %v1598_v14, %v1549_v28  ;;  %v1550_v24 = vmul.f32 %v2646_v19, %v1517_v55  ;;  %v1577_v55 = vld [vmem:[#allocation2 + $0xf8] sm:$0xff] }
 0x536   :  { %v4142_v50 = vadd.f32 %v1601_v48, %v1552_v32  ;;  %v1568_v48 = vld [vmem:[#allocation2 + $0xb0] sm:$0xff]  ;;  %vm1593_vm11 = vcmp.eq.f32.partialorder %v1577_v55, 1.0 }
 0x537   :  { %1630 = vmax.xlane.f32.xlu1 %v4140_v33  ;;  %v4146_v26 = vpop.f32.mrb[56].mxu1  ;;  %vm1584_vm8 = vcmp.eq.f32.partialorder %v1568_v48, 1.0  ;;  %v2656_v48 = vld [vmem:[%s4620_s1 + $0xf8] sm:$0xff] }
 0x538   :  { %1640 = vmax.xlane.f32.xlu0 %v4142_v50  ;;  %v1481_v38 = vpop.f32.mrb[57].mxu1  ;;  %v1600_v47 = vsel %vm1584_vm8, 0.0, %v4696_v46  ;;  %v1522_v5 = vmul.f32 0.088388346, %v4146_v26 }
 0x539   :  { %v2840_v30 = vpop.f32.mrb[58].mxu1  ;;  %v1520_v22 = vmul.f32 0.088388346, %v1481_v38 }
 0x53a   :  { %v1523_v3 = vmul.f32 0.088388346, %v2840_v30  ;;  %v1484_v34 = vpop.f32.mrb[59].mxu1  ;;  %v1599_v30 = vsel %vm1583_vm7, 0.0, %v4696_v46  ;;  %v1555_v26 = vmul.f32 %v2651_v41, %v1522_v5 }
 0x53b   :  { %1632 = vmax.xlane.f32.xlu1 %v4153_v13  ;;  %v1553_v53 = vmul.f32 %v2649_v37, %v1520_v22  ;;  %v1521_v42 = vmul.f32 0.088388346, %v1484_v34  ;;  %v1609_v22 = vsel %vm1593_vm11, 0.0, %v4696_v46 }
 0x53c   :  { %v1556_v32 = vmul.f32 %v2652_v40, %v1523_v3  ;;  %v1551_v40 = vmul.f32 %v2647_v16, %v1518_v7  ;;  %v4174_v3 = vadd.f32 %v1599_v30, %v1550_v24  ;;  %v1607_v24 = vsel %vm1591_vm9, 0.0, %v4696_v46 }
 0x53d   :  { %v1554_v34 = vmul.f32 %v2650_v27, %v1521_v42  ;;  %v4194_v55 = vadd.f32 %v1602_v0, %v1553_v53  ;;  %v1574_v42 = vld [vmem:[#allocation2 + $0xe0] sm:$0xff] }
 0x53e   :  { %v4165_v56 = vadd.f32 %v1605_v20, %v1556_v32  ;;  %v2654_v32 = vld [vmem:[%s4620_s1 + $0xe8] sm:$0xff]  ;;  %v4188_v30 = vadd.f32 %v1600_v47, %v1551_v40  ;;  %v2653_v53 = vld [vmem:[%s4620_s1 + $0xe0] sm:$0xff]  ;;  %vm1590_vm14 = vcmp.eq.f32.partialorder %v1574_v42, 1.0 }
 0x53f   :  { %1634 = vmax.xlane.f32.xlu1 %v4159_v12  ;;  %v2843_v14 = vpop.f32.mrb[60].mxu1 }
 0x540   :  { %1648 = vmax.xlane.f32.xlu0 %v4165_v56  ;;  %v1497_v28 = vpop.f32.mrb[61].mxu1 }
 0x541   :  { %v2844_v19 = vpop.f32.mrb[62].mxu1  ;;  %v1524_v47 = vmul.f32 0.088388346, %v1497_v28  ;;  %v2655_v28 = vld [vmem:[%s4620_s1 + $0xf0] sm:$0xff] }
 0x542   :  { %v1527_v38 = vmul.f32 0.088388346, %v2844_v19  ;;  %v1500_v20 = vpop.f32.mrb[63].mxu1  ;;  %v1603_v19 = vsel %vm1587_vm12, 0.0, %v4696_v46 }
 0x543   :  { %v1525_v54 = vmul.f32 0.088388346, %v1500_v20  ;;  %1636 = vmax.xlane.f32.xlu1 %v4174_v3  ;;  %v1572_v20 = vld [vmem:[#allocation2 + $0xd0] sm:$0xff]  ;;  %v4205_v40 = vadd.f32 %v1603_v19, %v1554_v34  ;;  %v1557_v27 = vmul.f32 %v2653_v53, %v1524_v47 }
 0x544   :  { %v1560_v7 = vmul.f32 %v2656_v48, %v1527_v38  ;;  %vm1588_vm13 = vcmp.eq.f32.partialorder %v1572_v20, 1.0  ;;  %v1576_v48 = vld [vmem:[#allocation2 + $0xf0] sm:$0xff] }
 0x545   :  { %v1558_v16 = vmul.f32 %v2654_v32, %v1525_v54  ;;  %v1604_v38 = vsel %vm1588_vm13, 0.0, %v4696_v46  ;;  %v1526_v32 = vmul.f32 0.088388346, %v2843_v14  ;;  %vm1592_vm15 = vcmp.eq.f32.partialorder %v1576_v48, 1.0 }
 0x546   :  { %v4199_v54 = vadd.f32 %v1609_v22, %v1560_v7  ;;  %v4217_v0 = vadd.f32 %v1604_v38, %v1555_v26 }
 0x547   :  { %1638 = vmax.xlane.f32.xlu1 %v4188_v30  ;;  %v4192_v37 = vadd.f32 %v1607_v24, %v1558_v16  ;;  %v1606_v24 = vsel %vm1590_vm14, 0.0, %v4696_v46  ;;  %v1559_v5 = vmul.f32 %v2655_v28, %v1526_v32  ;;  %v1608_v16 = vsel %vm1592_vm15, 0.0, %v4696_v46 }
 0x548   :  { %v4220_v7 = vadd.f32 %v1606_v24, %v1557_v27 }
 0x549   :  { %1652 = vmax.xlane.f32.xlu0 %v4192_v37  ;;  %v4224_v14 = vadd.f32 %v1608_v16, %v1559_v5 }
 0x54b   :  { %1642 = vmax.xlane.f32.xlu1 %v4194_v55 }
 0x54d   :  { %1656 = vmax.xlane.f32.xlu0 %v4199_v54 }
 0x54f   :  { %1644 = vmax.xlane.f32.xlu1 %v4205_v40 }
 0x553   :  { %1646 = vmax.xlane.f32.xlu1 %v4217_v0 }
 0x557   :  { %1650 = vmax.xlane.f32.xlu1 %v4220_v7 }
 0x55b   :  { %1654 = vmax.xlane.f32.xlu1 %v4224_v14 }
 0x5bc   :  { %v1627_v22 = vpop.xlane.xlu1 %1626 }
 0x5bd   :  { %v1658_v34 = vsub.f32 %v4119_v10, %v1627_v22 }
 0x5bf   :  { %v1674_v19 = vmul.f32 1.442695, %v1658_v34 }
 0x5c0   :  { %v1629_v20 = vpop.xlane.xlu1 %1628 }
 0x5c1   :  { %3010 = vpow2.f32 %v1674_v19  ;;  %v1659_v41 = vsub.f32 %v4129_v57, %v1629_v20 }
 0x5c3   :  { %v1676_v42 = vmul.f32 1.442695, %v1659_v41 }
 0x5c4   :  { %v1631_v47 = vpop.xlane.xlu1 %1630 }
 0x5c5   :  { %3012 = vpow2.f32 %v1676_v42  ;;  %v1660_v53 = vsub.f32 %v4140_v33, %v1631_v47  ;;  %v1641_v10 = vpop.xlane.xlu0 %1640 }
 0x5c6   :  { %v1665_v33 = vsub.f32 %v4142_v50, %v1641_v10 }
 0x5c7   :  { %v1678_v46 = vmul.f32 1.442695, %v1660_v53 }
 0x5c8   :  { %v1633_v26 = vpop.xlane.xlu1 %1632  ;;  %v1688_v34 = vmul.f32 1.442695, %v1665_v33 }
 0x5c9   :  { %3014 = vpow2.f32 %v1678_v46  ;;  %v1661_v38 = vsub.f32 %v4153_v13, %v1633_v26 }
 0x5cb   :  { %v4231_v48 = vpop.eup %3010  ;;  %v1680_v32 = vmul.f32 1.442695, %v1661_v38 }
 0x5cc   :  { %v1635_v27 = vpop.xlane.xlu1 %1634  ;;  %1706 = vadd.xlane.f32.xlu1 %v4231_v48 }
 0x5cd   :  { %3016 = vpow2.f32 %v1680_v32  ;;  %v1662_v57 = vsub.f32 %v4159_v12, %v1635_v27  ;;  %v1649_v41 = vpop.xlane.xlu0 %1648 }
 0x5ce   :  { %v1669_v26 = vsub.f32 %v4165_v56, %v1649_v41 }
 0x5cf   :  { %v4235_v28 = vpop.eup %3012  ;;  %v1682_v24 = vmul.f32 1.442695, %v1662_v57 }
 0x5d0   :  { %v1637_v5 = vpop.xlane.xlu1 %1636  ;;  %1708 = vadd.xlane.f32.xlu0 %v4235_v28  ;;  %v1696_v10 = vmul.f32 1.442695, %v1669_v26 }
 0x5d1   :  { %3018 = vpow2.f32 %v1682_v24  ;;  %v1663_v13 = vsub.f32 %v4174_v3, %v1637_v5 }
 0x5d3   :  { %v4240_v16 = vpop.eup %3014  ;;  %v1684_v22 = vmul.f32 1.442695, %v1663_v13 }
 0x5d4   :  { %v1639_v19 = vpop.xlane.xlu1 %1638  ;;  %1710 = vadd.xlane.f32.xlu1 %v4240_v16 }
 0x5d5   :  { %3020 = vpow2.f32 %v1684_v22  ;;  %v1664_v12 = vsub.f32 %v4188_v30, %v1639_v19 }
 0x5d6   :  { %3022 = vpow2.f32 %v1688_v34  ;;  %v1653_v53 = vpop.xlane.xlu0 %1652 }
 0x5d7   :  { %v4244_v20 = vpop.eup %3016  ;;  %v1686_v50 = vmul.f32 1.442695, %v1664_v12  ;;  %v1671_v57 = vsub.f32 %v4192_v37, %v1653_v53 }
 0x5d8   :  { %v1643_v42 = vpop.xlane.xlu1 %1642  ;;  %1712 = vadd.xlane.f32.xlu0 %v4244_v20 }
 0x5d9   :  { %3024 = vpow2.f32 %v1686_v50  ;;  %v1666_v3 = vsub.f32 %v4194_v55, %v1643_v42 }
 0x5da   :  { %v1657_v55 = vpop.xlane.xlu0 %1656 }
 0x5db   :  { %v4248_v47 = vpop.eup %3018  ;;  %v1690_v46 = vmul.f32 1.442695, %v1666_v3  ;;  %v1673_v22 = vsub.f32 %v4199_v54, %v1657_v55  ;;  %v1897_v55 = vld [vmem:[%s4625_s6 + $0x30] sm:$0xff] }
 0x5dc   :  { %v1645_v38 = vpop.xlane.xlu1 %1644  ;;  %1714 = vadd.xlane.f32.xlu1 %v4248_v47 }
 0x5dd   :  { %3026 = vpow2.f32 %v1690_v46  ;;  %v1667_v30 = vsub.f32 %v4205_v40, %v1645_v38  ;;  %v1700_v40 = vmul.f32 1.442695, %v1671_v57  ;;  %v1704_v12 = vmul.f32 1.442695, %v1673_v22  ;;  %v1891_v38 = vld [vmem:[%s4625_s6] sm:$0xff]  ;;  %v2070_v22 = vld [vmem:[%s4627_s8 + $0x10] sm:$0xff] }
 0x5de   :  { %v1895_v57 = vld [vmem:[%s4625_s6 + $0x20] sm:$0xff] }
 0x5df   :  { %v4253_v32 = vpop.eup %3020  ;;  %v1692_v27 = vmul.f32 1.442695, %v1667_v30  ;;  %v1893_v30 = vld [vmem:[%s4625_s6 + $0x10] sm:$0xff] }
 0x5e0   :  { %v1647_v24 = vpop.xlane.xlu1 %1646  ;;  %1716 = vadd.xlane.f32.xlu0 %v4253_v32  ;;  %v4258_v56 = vpop.eup %3022 }
 0x5e1   :  { %3028 = vpow2.f32 %v1692_v27  ;;  %v1668_v33 = vsub.f32 %v4217_v0, %v1647_v24  ;;  %v1892_v27 = vld [vmem:[%s4625_s6 + $0x8] sm:$0xff] }
 0x5e2   :  { %3030 = vpow2.f32 %v1696_v10  ;;  %v1894_v10 = vld [vmem:[%s4625_s6 + $0x18] sm:$0xff]  ;;  %v1896_v24 = vld [vmem:[%s4625_s6 + $0x28] sm:$0xff] }
 0x5e3   :  { %v4260_v5 = vpop.eup %3024  ;;  %v1694_v13 = vmul.f32 1.442695, %v1668_v33  ;;  %v1898_v33 = vld [vmem:[%s4625_s6 + $0x38] sm:$0xff] }
 0x5e4   :  { %1718 = vadd.xlane.f32.xlu1 %v4260_v5  ;;  %v1651_v34 = vpop.xlane.xlu1 %1650  ;;  %1720 = vadd.xlane.f32.xlu0 %v4258_v56 }
 0x5e5   :  { %3032 = vpow2.f32 %v1694_v13  ;;  %v1670_v37 = vsub.f32 %v4220_v7, %v1651_v34  ;;  %v2068_v13 = vld [vmem:[%s4627_s8] sm:$0xff]  ;;  %v2071_v34 = vld [vmem:[%s4627_s8 + $0x18] sm:$0xff] }
 0x5e6   :  { %3034 = vpow2.f32 %v1700_v40  ;;  %v2069_v40 = vld [vmem:[%s4627_s8 + $0x8] sm:$0xff] }
 0x5e7   :  { %v4266_v19 = vpop.eup %3026  ;;  %v1698_v0 = vmul.f32 1.442695, %v1670_v37  ;;  %v2072_v37 = vld [vmem:[%s4627_s8 + $0x20] sm:$0xff] }
 0x5e8   :  { %1722 = vadd.xlane.f32.xlu1 %v4266_v19  ;;  %v1655_v41 = vpop.xlane.xlu1 %1654 }
 0x5e9   :  { %3036 = vpow2.f32 %v1698_v0  ;;  %v1672_v50 = vsub.f32 %v4224_v14, %v1655_v41  ;;  %v2073_v0 = vld [vmem:[%s4627_s8 + $0x28] sm:$0xff]  ;;  %v2075_v41 = vld [vmem:[%s4627_s8 + $0x38] sm:$0xff] }
 0x5ea   :  { %3038 = vpow2.f32 %v1704_v12  ;;  %v2074_v12 = vld [vmem:[%s4627_s8 + $0x30] sm:$0xff]  ;;  %s3150_s8 = scalar_lea.vmem %s2605_s26, 4096 }
 0x5eb   :  { %v4270_v54 = vpop.eup %3028  ;;  %v1702_v42 = vmul.f32 1.442695, %v1672_v50  ;;  %v2262_v50 = vld [vmem:[%s4629_s10] sm:$0xff]  ;;  %p3151_p2 = scmp.ne.s32.totalorder %s2605_s26, %s3150_s8  ;;  %p3156_p4 = scmp.lt.s32.totalorder %s3150_s8, %s3150_s8 }
 0x5ec   :  { %1724 = vadd.xlane.f32.xlu0 %v4270_v54  ;;  %v4273_v3 = vpop.eup %3030 }
 0x5ed   :  { %3040 = vpow2.f32 %v1702_v42  ;;  %v2263_v42 = vld [vmem:[%s4629_s10 + $0x8] sm:$0xff]  ;;  %p3157_p5 = por %p3156_p4, %p3155_p3 }
 0x5ef   :  { %v4275_v7 = vpop.eup %3032  ;;  %p3158_p6 = pnand %p3157_p5, %p3151_p2 }
 0x5f0   :  { %1726 = vadd.xlane.f32.xlu1 %v4275_v7  ;;  %1728 = vadd.xlane.f32.xlu0 %v4273_v3  ;;  %v4279_v53 = vpop.eup %3034 }
 0x5f3   :  { %v4281_v46 = vpop.eup %3036 }
 0x5f4   :  { %1730 = vadd.xlane.f32.xlu1 %v4281_v46  ;;  %1732 = vadd.xlane.f32.xlu0 %v4279_v53  ;;  %v4285_v14 = vpop.eup %3038 }
 0x5f7   :  { %v4287_v26 = vpop.eup %3040 }
 0x5f8   :  { %1734 = vadd.xlane.f32.xlu1 %v4287_v26  ;;  %1736 = vadd.xlane.f32.xlu0 %v4285_v14 }
 0x609   :  { %1901 = vperm.xlu1 %2905, %v1891_v38   ;;  %v2264_v38 = vld [vmem:[%s4629_s10 + $0x10] sm:$0xff] }
 0x60d   :  { %1911 = vperm.xlu1 %2905, %v1893_v30   ;;  %v2265_v30 = vld [vmem:[%s4629_s10 + $0x18] sm:$0xff] }
 0x60e   :  { %1906 = vperm.xlu0 %2904, %v1892_v27   ;;  %v2266_v27 = vld [vmem:[%s4629_s10 + $0x20] sm:$0xff] }
 0x611   :  { %1916 = vperm.xlu1 %2905, %v1894_v10   ;;  %v2267_v10 = vld [vmem:[%s4629_s10 + $0x28] sm:$0xff] }
 0x612   :  { %1921 = vperm.xlu0 %2904, %v1895_v57   ;;  %v2268_v57 = vld [vmem:[%s4629_s10 + $0x30] sm:$0xff] }
 0x615   :  { %1926 = vperm.xlu1 %2905, %v1896_v24   ;;  %v2269_v24 = vld [vmem:[%s4629_s10 + $0x38] sm:$0xff] }
 0x616   :  { %1931 = vperm.xlu0 %2904, %v1897_v55   ;;  %v2270_v55 = vld [vmem:[%s4629_s10 + $0x40] sm:$0xff] }
 0x619   :  { %1936 = vperm.xlu1 %2905, %v1898_v33   ;;  %v2271_v33 = vld [vmem:[%s4629_s10 + $0x48] sm:$0xff] }
 0x61a   :  { %2078 = vperm.xlu0 %2904, %v2068_v13   ;;  %v2272_v13 = vld [vmem:[%s4629_s10 + $0x50] sm:$0xff] }
 0x61d   :  { %2083 = vperm.xlu1 %2905, %v2069_v40   ;;  %v2273_v40 = vld [vmem:[%s4629_s10 + $0x58] sm:$0xff] }
 0x61e   :  { %2088 = vperm.xlu0 %2904, %v2070_v22   ;;  %v2274_v22 = vld [vmem:[%s4629_s10 + $0x60] sm:$0xff] }
 0x621   :  { %2093 = vperm.xlu1 %2905, %v2071_v34   ;;  %v2275_v34 = vld [vmem:[%s4629_s10 + $0x68] sm:$0xff] }
 0x622   :  { %2098 = vperm.xlu0 %2904, %v2072_v37   ;;  %v2276_v37 = vld [vmem:[%s4629_s10 + $0x70] sm:$0xff] }
 0x625   :  { %2103 = vperm.xlu1 %2905, %v2073_v0   ;;  %v2277_v0 = vld [vmem:[%s4629_s10 + $0x78] sm:$0xff] }
 0x626   :  { %2108 = vperm.xlu0 %2904, %v2074_v12  }
 0x629   :  { %2113 = vperm.xlu1 %2905, %v2075_v41  }
 0x62a   :  { %2280 = vperm.xlu0 %2904, %v2262_v50  }
 0x62d   :  { %2285 = vperm.xlu1 %2905, %v2263_v42  }
 0x62e   :  { %2290 = vperm.xlu0 %2904, %v2264_v38  }
 0x631   :  { %2295 = vperm.xlu1 %2905, %v2265_v30  }
 0x632   :  { %2300 = vperm.xlu0 %2904, %v2266_v27  }
 0x635   :  { %2305 = vperm.xlu1 %2905, %v2267_v10  }
 0x636   :  { %2310 = vperm.xlu0 %2904, %v2268_v57  }
 0x639   :  { %2315 = vperm.xlu1 %2905, %v2269_v24  }
 0x63a   :  { %2320 = vperm.xlu0 %2904, %v2270_v55  }
 0x63d   :  { %2325 = vperm.xlu1 %2905, %v2271_v33  }
 0x63e   :  { %2330 = vperm.xlu0 %2904, %v2272_v13  }
 0x641   :  { %2335 = vperm.xlu1 %2905, %v2273_v40  }
 0x642   :  { %2340 = vperm.xlu0 %2904, %v2274_v22  }
 0x645   :  { %2345 = vperm.xlu1 %2905, %v2275_v34  }
 0x646   :  { %2350 = vperm.xlu0 %2904, %v2276_v37  }
 0x649   :  { %2355 = vperm.xlu1 %2905, %v2277_v0  }
 0x659   :  { %v1707_v12 = vpop.xlane.xlu1 %1706 }
 0x65a   :  { %3042 = vrcp.f32 %v1707_v12 }
 0x65d   :  { %v1709_v41 = vpop.xlane.xlu0 %1708 }
 0x65e   :  { %3044 = vrcp.f32 %v1709_v41 }
 0x661   :  { %v1711_v50 = vpop.xlane.xlu1 %1710 }
 0x662   :  { %3046 = vrcp.f32 %v1711_v50 }
 0x664   :  { %v3043_v38 = vpop.eup %3042 }
 0x665   :  { %v1713_v42 = vpop.xlane.xlu0 %1712  ;;  %v1754_v10 = vmul.f32 %v3043_v38, %v4231_v48 }
 0x666   :  { %3048 = vrcp.f32 %v1713_v42 }
 0x668   :  { %v3045_v30 = vpop.eup %3044 }
 0x669   :  { %v1715_v27 = vpop.xlane.xlu1 %1714  ;;  %v1755_v57 = vmul.f32 %v3045_v30, %v4235_v28 }
 0x66a   :  { %3050 = vrcp.f32 %v1715_v27 }
 0x66b   :  { %v1770_v24 = vpack.c.bf16 %v1755_v57, %v1754_v10 }
 0x66c   :  { %v3047_v33 = vpop.eup %3046 }
 0x66d   :  { %2845 = vmatprep.subr.bf16.mxu1 %v1770_v24  ;;  %v1717_v55 = vpop.xlane.xlu0 %1716  ;;  %v1756_v34 = vmul.f32 %v3047_v33, %v4240_v16 }
 0x66e   :  { %3052 = vrcp.f32 %v1717_v55  ;;  %2846 = vmatpush3.bf16.xpose.msra.mxu1 %v1770_v24 }
 0x670   :  { %v3049_v13 = vpop.eup %3048 }
 0x671   :  { %v1719_v40 = vpop.xlane.xlu1 %1718  ;;  %v1721_v22 = vpop.xlane.xlu0 %1720  ;;  %v1757_v37 = vmul.f32 %v3049_v13, %v4244_v20 }
 0x672   :  { %3054 = vrcp.f32 %v1719_v40 }
 0x673   :  { %3056 = vrcp.f32 %v1721_v22  ;;  %v1771_v0 = vpack.c.bf16 %v1757_v37, %v1756_v34 }
 0x674   :  { %v3051_v28 = vpop.eup %3050 }
 0x675   :  { %v1723_v48 = vpop.xlane.xlu1 %1722  ;;  %2847 = vmatprep.subr.bf16.mxu1 %v1771_v0  ;;  %v1758_v50 = vmul.f32 %v3051_v28, %v4248_v47 }
 0x676   :  { %2848 = vmatpush3.bf16.xpose.msra.mxu1 %v1771_v0  ;;  %3058 = vrcp.f32 %v1723_v48 }
 0x678   :  { %v3053_v12 = vpop.eup %3052 }
 0x679   :  { %v1725_v41 = vpop.xlane.xlu0 %1724  ;;  %v1759_v42 = vmul.f32 %v3053_v12, %v4253_v32 }
 0x67a   :  { %3060 = vrcp.f32 %v1725_v41 }
 0x67b   :  { %v1772_v38 = vpack.c.bf16 %v1759_v42, %v1758_v50 }
 0x67c   :  { %v3055_v30 = vpop.eup %3054 }
 0x67d   :  { %v3057_v16 = vpop.eup %3056  ;;  %v1727_v27 = vpop.xlane.xlu1 %1726  ;;  %2849 = vmatprep.subr.bf16.mxu1 %v1772_v38  ;;  %v1760_v10 = vmul.f32 %v3055_v30, %v4260_v5 }
 0x67e   :  { %v1729_v20 = vpop.xlane.xlu0 %1728  ;;  %3062 = vrcp.f32 %v1727_v27  ;;  %2850 = vmatpush3.bf16.xpose.msra.mxu1 %v1772_v38  ;;  %v1761_v57 = vmul.f32 %v3057_v16, %v4258_v56  ;;  %v4697_v16 = vpack.c.bf16 %v3981_v4, %v3948_v2  ;;  %v4702_v2 = vpack.c.bf16 %v4023_v62, %v4027_v60 }
 0x67f   :  { %3064 = vrcp.f32 %v1729_v20  ;;  %v4704_v4 = vmov 0  }
 0x680   :  { %v1773_v24 = vpack.c.bf16 %v1761_v57, %v1760_v10  ;;  %v3059_v47 = vpop.eup %3058  ;;  %v4707_v57 = vpack.c.bf16 %v4084_v43, %v4078_v21 }
 0x681   :  { %v1731_v55 = vpop.xlane.xlu1 %1730  ;;  %v1762_v13 = vmul.f32 %v3059_v47, %v4266_v19  ;;  %v4708_v47 = vpack.c.bf16 %v4080_v63, %v4076_v18  ;;  %v4711_v18 = vpack.c.bf16 %v4108_v61, %v4102_v58  ;;  %v2930_v63 = vld [vmem:[%s4624_s5] sm:$0xff]  }
 0x682   :  { %v1733_v33 = vpop.xlane.xlu0 %1732  ;;  %2851 = vmatprep.subr.bf16.mxu1 %v1773_v24  ;;  %3066 = vrcp.f32 %v1731_v55 }
 0x683   :  { %3068 = vrcp.f32 %v1733_v33 }
 0x684   :  { %v3061_v32 = vpop.eup %3060 }
 0x685   :  { %v1763_v40 = vmul.f32 %v3061_v32, %v4270_v54  ;;  %v1735_v34 = vpop.xlane.xlu1 %1734 }
 0x686   :  { %2852 = vmatpush3.bf16.xpose.msra.mxu1 %v1773_v24  ;;  %v1737_v0 = vpop.xlane.xlu0 %1736  ;;  %3070 = vrcp.f32 %v1735_v34 }
 0x687   :  { %v1774_v22 = vpack.c.bf16 %v1763_v40, %v1762_v13  ;;  %3072 = vrcp.f32 %v1737_v0 }
 0x688   :  { %v3063_v5 = vpop.eup %3062 }
 0x689   :  { %v3065_v37 = vpop.eup %3064  ;;  %2853 = vmatprep.subr.bf16.mxu1 %v1774_v22  ;;  %v1764_v56 = vmul.f32 %v3063_v5, %v4275_v7 }
 0x68a   :  { %v1765_v48 = vmul.f32 %v3065_v37, %v4273_v3 }
 0x68c   :  { %v3067_v28 = vpop.eup %3066  ;;  %v1775_v12 = vpack.c.bf16 %v1765_v48, %v1764_v56 }
 0x68d   :  { %v3069_v41 = vpop.eup %3068  ;;  %v1766_v19 = vmul.f32 %v3067_v28, %v4281_v46  ;;  %v4699_v46 = vpack.c.bf16 %v3997_v9, %v3966_v11  ;;  %v1907_v34 = vpop.permute.xlu0 %1906 }
 0x68e   :  { %2854 = vmatpush3.bf16.xpose.msra.mxu1 %v1774_v22  ;;  %v1767_v54 = vmul.f32 %v3069_v41, %v4279_v53  ;;  %v4698_v53 = vpack.c.bf16 %v3990_v1, %v3959_v39  ;;  %v4703_v39 = vpack.c.bf16 %v4034_v59, %v4038_v17  ;;  %v4706_v17 = vpack.c.bf16 %v4068_v45, %v4064_v44 }
 0x68f   :  { %2855 = vmatprep.subr.bf16.mxu1 %v1775_v12  ;;  %v4709_v44 = vpack.c.bf16 %v4096_v51, %v4090_v36  ;;  %v4710_v22 = vpack.c.bf16 %v4092_v35, %v4088_v15  ;;  %v4712_v36 = vpack.c.bf16 %v4104_v52, %v4100_v29  ;;  %v2931_v15 = vld [vmem:[%s4624_s5 + $0x8] sm:$0xff]   ;;  %v2932_v35 = vld [vmem:[%s4624_s5 + $0x10] sm:$0xff]   ;;  %v2933_v51 = vld [vmem:[%s4624_s5 + $0x18] sm:$0xff]   ;;  %v1902_v29 = vpop.permute.xlu1 %1901 }
 0x690   :  { %v3071_v50 = vpop.eup %3070  ;;  %v1776_v42 = vpack.c.bf16 %v1767_v54, %v1766_v19 }
 0x691   :  { %v3073_v38 = vpop.eup %3072  ;;  %v1768_v7 = vmul.f32 %v3071_v50, %v4287_v26  ;;  %v4700_v26 = vpack.c.bf16 %v4004_v8, %v3970_v25 }
 0x692   :  { %v1769_v3 = vmul.f32 %v3073_v38, %v4285_v14  ;;  %v4701_v14 = vpack.c.bf16 %v4010_v31, %v4014_v6  ;;  %v4705_v31 = vpack.c.bf16 %v4072_v49, %v4066_v23 }
 0x693   :  { %v1912_v28 = vpop.permute.xlu1 %1911 }
 0x694   :  { %v1777_v30 = vpack.c.bf16 %v1769_v3, %v1768_v7 }
 0x696   :  { %2856 = vmatpush3.bf16.xpose.msra.mxu1 %v1775_v12 }
 0x697   :  { %2857 = vmatprep.subr.bf16.mxu1 %v1776_v42 }
 0x69e   :  { %2858 = vmatpush3.bf16.xpose.msra.mxu1 %v1776_v42 }
 0x69f   :  { %2859 = vmatprep.subr.bf16.mxu1 %v1777_v30 }
 0x6a6   :  { %2860 = vmatpush3.bf16.xpose.msra.mxu1 %v1777_v30 }
 0x6ad   :  { %2862 = vmatmul.mubr.bf16.vlgmr.msra.gmra.mrb[64].mxu1 %v4697_v16  ;;  %v1917_v16 = vpop.permute.xlu1 %1916 }
 0x6ae   :  { %2865 = vmatprep.mubr.bf16.mxu1 %v4698_v53 }
 0x6b5   :  { %2866 = vmatmul.mubr.bf16.gmra.mrb[68].mxu1 %v4699_v46 }
 0x6b6   :  { %2869 = vmatprep.mubr.bf16.mxu1 %v4700_v26 }
 0x6bd   :  { %2870 = vmatmul.mubr.bf16.gmra.mrb[72].mxu1 %v4701_v14 }
 0x6be   :  { %2873 = vmatprep.mubr.bf16.mxu1 %v4702_v2 }
 0x6c5   :  { %2874 = vmatmul.mubr.bf16.gmra.mrb[76].mxu1 %v4703_v39 }
 0x6c6   :  { %2181 = vmatprep.mubr.bf16.mxu1 %v4704_v4 }
 0x780   :  { %v2863_v11 = vpop.f32.mrb[64].mxu1 }
 0x781   :  { %v1812_v1 = vpop.f32.mrb[65].mxu1 }
 0x782   :  { %v2864_v9 = vpop.f32.mrb[66].mxu1 }
 0x783   :  { %v1876_v27 = vpack.c.bf16 %v2864_v9, %v2863_v11  ;;  %v1815_v25 = vpop.f32.mrb[67].mxu1 }
 0x784   :  { %v1875_v8 = vpack.c.bf16 %v1815_v25, %v1812_v1  ;;  %v1922_v25 = vpop.permute.xlu0 %1921 }
 0x786   :  { %1963 = vmatprep.subr.bf16.mxu0 %v1875_v8 }
 0x787   :  { %1964 = vmatpush1.bf16.msra.mxu0 %v4705_v31 }
 0x788   :  { %v2867_v6 = vpop.f32.mrb[68].mxu1  ;;  %1965 = vmatprep.subr.bf16.mxu0 %v1876_v27 }
 0x789   :  { %v1828_v62 = vpop.f32.mrb[69].mxu1 }
 0x78a   :  { %v2868_v60 = vpop.f32.mrb[70].mxu1 }
 0x78b   :  { %v1878_v20 = vpack.c.bf16 %v2868_v60, %v2867_v6  ;;  %v1831_v59 = vpop.f32.mrb[71].mxu1  ;;  %1966 = vmatpush1.bf16.msra.mxu0 %v4706_v17  ;;  %v1927_v60 = vpop.permute.xlu1 %1926 }
 0x78c   :  { %v1877_v10 = vpack.c.bf16 %v1831_v59, %v1828_v62 }
 0x78e   :  { %1967 = vmatprep.subr.bf16.mxu0 %v1877_v10 }
 0x78f   :  { %1968 = vmatpush1.bf16.msra.mxu0 %v4707_v57 }
 0x790   :  { %v2871_v24 = vpop.f32.mrb[72].mxu1  ;;  %1969 = vmatprep.subr.bf16.mxu0 %v1878_v20 }
 0x791   :  { %v1844_v23 = vpop.f32.mrb[73].mxu1 }
 0x792   :  { %v2872_v49 = vpop.f32.mrb[74].mxu1 }
 0x793   :  { %v1880_v55 = vpack.c.bf16 %v2872_v49, %v2871_v24  ;;  %v1847_v33 = vpop.f32.mrb[75].mxu1  ;;  %1970 = vmatpush1.bf16.msra.mxu0 %v4708_v47  ;;  %v1932_v47 = vpop.permute.xlu0 %1931 }
 0x794   :  { %v1879_v32 = vpack.c.bf16 %v1847_v33, %v1844_v23 }
 0x796   :  { %1971 = vmatprep.subr.bf16.mxu0 %v1879_v32 }
 0x797   :  { %1972 = vmatpush1.bf16.msra.mxu0 %v4709_v44 }
 0x798   :  { %v2875_v45 = vpop.f32.mrb[76].mxu1  ;;  %1973 = vmatprep.subr.bf16.mxu0 %v1880_v55 }
 0x799   :  { %v1860_v21 = vpop.f32.mrb[77].mxu1 }
 0x79a   :  { %v2876_v43 = vpop.f32.mrb[78].mxu1 }
 0x79b   :  { %v1882_v13 = vpack.c.bf16 %v2876_v43, %v2875_v45  ;;  %v1863_v40 = vpop.f32.mrb[79].mxu1  ;;  %1974 = vmatpush1.bf16.msra.mxu0 %v4710_v22  ;;  %v1937_v43 = vpop.permute.xlu1 %1936 }
 0x79c   :  { %v1881_v5 = vpack.c.bf16 %v1863_v40, %v1860_v21 }
 0x79e   :  { %1975 = vmatprep.subr.bf16.mxu0 %v1881_v5 }
 0x79f   :  { %1976 = vmatpush1.bf16.msra.mxu0 %v4711_v18 }
 0x7a0   :  { %1977 = vmatprep.subr.bf16.mxu0 %v1882_v13 }
 0x7a3   :  { %1978 = vmatpush1.bf16.msra.mxu0 %v4712_v36 }
 0x7a6   :  { %1996 = vmatmul.mubr.bf16.vlgmr.msra.gmra.mrb[80].mxu0 %v2930_v63 }
 0x7a7   :  { %2005 = vmatprep.mubr.bf16.mxu0 %v4704_v4 }
 0x7ae   :  { %2006 = vmatmul.mubr.bf16.gmra.mrb[84].mxu0 %v2931_v15 }
 0x7af   :  { %2015 = vmatprep.mubr.bf16.mxu0 %v4704_v4 }
 0x7b6   :  { %2016 = vmatmul.mubr.bf16.gmra.mrb[88].mxu0 %v2932_v35 }
 0x7b7   :  { %2025 = vmatprep.mubr.bf16.mxu0 %v4704_v4 }
 0x7be   :  { %2026 = vmatmul.mubr.bf16.gmra.mrb[92].mxu0 %v2933_v51 }
 0x7bf   :  { %2454 = vmatprep.mubr.bf16.mxu0 %v4704_v4 }
 0x879   :  { %v1997_v58 = vpop.f32.mrb[80].mxu0 }
 0x87a   :  { %v1998_v52 = vadd.f32 %v1997_v58, %v1902_v29  ;;  %v1999_v61 = vpop.f32.mrb[81].mxu0  ;;  %v2934_v58 = vld [vmem:[#allocation5] sm:$0xff]  }
 0x87b   :  { %v2000_v37 = vadd.f32 %v1999_v61, %v1902_v29  ;;  %v2001_v0 = vpop.f32.mrb[82].mxu0  ;;  %v2936_v61 = vld [vmem:[#allocation5 + $0x10] sm:$0xff]  }
 0x87c   :  { %v2002_v56 = vadd.f32 %v2001_v0, %v1907_v34  ;;  %v2003_v48 = vpop.f32.mrb[83].mxu0  ;;  %v2036_v41 = vmax.f32 %v1998_v52, 0.0  ;;  %v2935_v52 = vld [vmem:[#allocation5 + $0x8] sm:$0xff]  }
 0x87d   :  { %v2004_v12 = vadd.f32 %v2003_v48, %v1907_v34  ;;  %v2037_v54 = vmax.f32 %v2000_v37, 0.0  ;;  %v2937_v34 = vld [vmem:[#allocation5 + $0x18] sm:$0xff]   ;;  %v2079_v37 = vpop.permute.xlu0 %2078 }
 0x87e   :  { %v2038_v19 = vmax.f32 %v2002_v56, 0.0 }
 0x87f   :  { %v2039_v50 = vmax.f32 %v2004_v12, 0.0 }
 0x880   :  { %v2060_v42 = vpack.c.bf16 %v2038_v19, %v2036_v41 }
 0x881   :  { %v2061_v38 = vpack.c.bf16 %v2039_v50, %v2037_v54  ;;  %v2007_v7 = vpop.f32.mrb[84].mxu0 }
 0x882   :  { %v2008_v3 = vadd.f32 %v2007_v7, %v1912_v28  ;;  %v2009_v30 = vpop.f32.mrb[85].mxu0 }
 0x883   :  { %v2010_v53 = vadd.f32 %v2009_v30, %v1912_v28  ;;  %v2011_v46 = vpop.f32.mrb[86].mxu0  ;;  %2149 = vmatprep.subr.bf16.mxu1 %v2061_v38  ;;  %v2084_v28 = vpop.permute.xlu1 %2083 }
 0x884   :  { %v2012_v26 = vadd.f32 %v2011_v46, %v1917_v16  ;;  %v2013_v14 = vpop.f32.mrb[87].mxu0  ;;  %2150 = vmatpush1.bf16.msra.mxu1 %v2060_v42  ;;  %v2040_v39 = vmax.f32 %v2008_v3, 0.0 }
 0x885   :  { %v2014_v2 = vadd.f32 %v2013_v14, %v1917_v16  ;;  %v2041_v1 = vmax.f32 %v2010_v53, 0.0  ;;  %v2089_v16 = vpop.permute.xlu0 %2088 }
 0x886   :  { %v2042_v11 = vmax.f32 %v2012_v26, 0.0 }
 0x887   :  { %v2043_v9 = vmax.f32 %v2014_v2, 0.0  ;;  %v2094_v2 = vpop.permute.xlu1 %2093 }
 0x888   :  { %v2062_v27 = vpack.c.bf16 %v2042_v11, %v2040_v39 }
 0x889   :  { %v2063_v8 = vpack.c.bf16 %v2043_v9, %v2041_v1  ;;  %v2017_v31 = vpop.f32.mrb[88].mxu0 }
 0x88a   :  { %v2018_v6 = vadd.f32 %v2017_v31, %v1922_v25  ;;  %v2019_v62 = vpop.f32.mrb[89].mxu0 }
 0x88b   :  { %v2020_v20 = vadd.f32 %v2019_v62, %v1922_v25  ;;  %v2021_v59 = vpop.f32.mrb[90].mxu0  ;;  %2151 = vmatprep.subr.bf16.mxu1 %v2063_v8 }
 0x88c   :  { %v2022_v17 = vadd.f32 %v2021_v59, %v1927_v60  ;;  %v2023_v10 = vpop.f32.mrb[91].mxu0  ;;  %2152 = vmatpush1.bf16.msra.mxu1 %v2062_v27  ;;  %v2044_v24 = vmax.f32 %v2018_v6, 0.0 }
 0x88d   :  { %v2024_v57 = vadd.f32 %v2023_v10, %v1927_v60  ;;  %v2045_v49 = vmax.f32 %v2020_v20, 0.0  ;;  %v2099_v60 = vpop.permute.xlu0 %2098 }
 0x88e   :  { %v2046_v23 = vmax.f32 %v2022_v17, 0.0 }
 0x88f   :  { %v2047_v55 = vmax.f32 %v2024_v57, 0.0  ;;  %v2104_v57 = vpop.permute.xlu1 %2103 }
 0x890   :  { %v2064_v33 = vpack.c.bf16 %v2046_v23, %v2044_v24 }
 0x891   :  { %v2065_v32 = vpack.c.bf16 %v2047_v55, %v2045_v49  ;;  %v2027_v44 = vpop.f32.mrb[92].mxu0 }
 0x892   :  { %v2028_v45 = vadd.f32 %v2027_v44, %v1932_v47  ;;  %v2029_v21 = vpop.f32.mrb[93].mxu0 }
 0x893   :  { %v2030_v13 = vadd.f32 %v2029_v21, %v1932_v47  ;;  %v2031_v40 = vpop.f32.mrb[94].mxu0  ;;  %2153 = vmatprep.subr.bf16.mxu1 %v2065_v32 }
 0x894   :  { %v2032_v22 = vadd.f32 %v2031_v40, %v1937_v43  ;;  %v2033_v5 = vpop.f32.mrb[95].mxu0  ;;  %2154 = vmatpush1.bf16.msra.mxu1 %v2064_v33  ;;  %v2048_v63 = vmax.f32 %v2028_v45, 0.0 }
 0x895   :  { %v2034_v18 = vadd.f32 %v2033_v5, %v1937_v43  ;;  %v2049_v15 = vmax.f32 %v2030_v13, 0.0  ;;  %v2109_v43 = vpop.permute.xlu0 %2108 }
 0x896   :  { %v2050_v36 = vmax.f32 %v2032_v22, 0.0 }
 0x897   :  { %v2051_v35 = vmax.f32 %v2034_v18, 0.0  ;;  %v2114_v18 = vpop.permute.xlu1 %2113 }
 0x898   :  { %v2066_v51 = vpack.c.bf16 %v2050_v36, %v2048_v63 }
 0x899   :  { %v2067_v29 = vpack.c.bf16 %v2051_v35, %v2049_v15 }
 0x89b   :  { %2155 = vmatprep.subr.bf16.mxu1 %v2067_v29 }
 0x89c   :  { %2156 = vmatpush1.bf16.msra.mxu1 %v2066_v51 }
 0x89f   :  { %2665 = vmatmul.mubr.msk.bf16.vlgmr.msra.gmra.mrb[80].mxu1 %vm2136_vm0, %v2934_v58 }
 0x8a0   :  { %2191 = vmatprep.mubr.bf16.mxu1 %v4704_v4 }
 0x8a7   :  { %2666 = vmatmul.mubr.msk.bf16.gmra.mrb[84].mxu1 %vm2136_vm0, %v2935_v52 }
 0x8a8   :  { %2201 = vmatprep.mubr.bf16.mxu1 %v4704_v4 }
 0x8af   :  { %2667 = vmatmul.mubr.msk.bf16.gmra.mrb[88].mxu1 %vm2136_vm0, %v2936_v61 }
 0x8b0   :  { %2211 = vmatprep.mubr.bf16.mxu1 %v4704_v4 }
 0x8b7   :  { %2668 = vmatmul.mubr.msk.bf16.gmra.mrb[92].mxu1 %vm2136_vm0, %v2937_v34 }
 0x972   :  { %v2183_v0 = vpop.f32.mrb[80].mxu1 }
 0x973   :  { %v2184_v56 = vadd.f32 %v2183_v0, %v2079_v37  ;;  %v2185_v48 = vpop.f32.mrb[81].mxu1  ;;  %v2938_v0 = vld [vmem:[%s4628_s9] sm:$0xff]  }
 0x974   :  { %v2186_v12 = vadd.f32 %v2185_v48, %v2079_v37  ;;  %v2187_v41 = vpop.f32.mrb[82].mxu1  ;;  %v2940_v48 = vld [vmem:[%s4628_s9 + $0x10] sm:$0xff]  }
 0x975   :  { %v2188_v19 = vadd.f32 %v2187_v41, %v2084_v28  ;;  %v2189_v54 = vpop.f32.mrb[83].mxu1  ;;  %v2222_v42 = vmax.f32 %v2184_v56, 0.0  ;;  %v2939_v56 = vld [vmem:[%s4628_s9 + $0x8] sm:$0xff]  }
 0x976   :  { %v2190_v50 = vadd.f32 %v2189_v54, %v2084_v28  ;;  %v2223_v7 = vmax.f32 %v2186_v12, 0.0  ;;  %v2941_v28 = vld [vmem:[%s4628_s9 + $0x18] sm:$0xff]   ;;  %v2942_v12 = vld [vmem:[%s4628_s9 + $0x20] sm:$0xff]   ;;  %v2943_v41 = vld [vmem:[%s4628_s9 + $0x28] sm:$0xff]  }
 0x977   :  { %v2224_v38 = vmax.f32 %v2188_v19, 0.0  ;;  %v2944_v19 = vld [vmem:[%s4628_s9 + $0x30] sm:$0xff]   ;;  %v2945_v54 = vld [vmem:[%s4628_s9 + $0x38] sm:$0xff]  }
 0x978   :  { %v2225_v3 = vmax.f32 %v2190_v50, 0.0  ;;  %v2281_v50 = vpop.permute.xlu0 %2280 }
 0x979   :  { %v2254_v30 = vpack.c.bf16 %v2224_v38, %v2222_v42 }
 0x97a   :  { %v2255_v53 = vpack.c.bf16 %v2225_v3, %v2223_v7  ;;  %v2193_v46 = vpop.f32.mrb[84].mxu1  ;;  %v2286_v3 = vpop.permute.xlu1 %2285 }
 0x97b   :  { %v2194_v26 = vadd.f32 %v2193_v46, %v2089_v16  ;;  %v2195_v14 = vpop.f32.mrb[85].mxu1 }
 0x97c   :  { %v2196_v39 = vadd.f32 %v2195_v14, %v2089_v16  ;;  %v2197_v11 = vpop.f32.mrb[86].mxu1  ;;  %2422 = vmatprep.subr.bf16.mxu0 %v2255_v53  ;;  %v3074_v53 = vld [vmem:[%s4619_s0] sm:$0xff]  ;;  %v3075_v14 = vld [vmem:[%s4619_s0 + $0x8] sm:$0xff] }
 0x97d   :  { %v2198_v1 = vadd.f32 %v2197_v11, %v2094_v2  ;;  %v2199_v9 = vpop.f32.mrb[87].mxu1  ;;  %2423 = vmatpush1.bf16.msra.mxu0 %v2254_v30  ;;  %v2226_v25 = vmax.f32 %v2194_v26, 0.0  ;;  %v3076_v11 = vld [vmem:[%s4619_s0 + $0x10] sm:$0xff] }
 0x97e   :  { %v2200_v27 = vadd.f32 %v2199_v9, %v2094_v2  ;;  %v2227_v31 = vmax.f32 %v2196_v39, 0.0  ;;  %v3077_v9 = vld [vmem:[%s4619_s0 + $0x18] sm:$0xff] }
 0x97f   :  { %v2228_v8 = vmax.f32 %v2198_v1, 0.0 }
 0x980   :  { %v2229_v6 = vmax.f32 %v2200_v27, 0.0 }
 0x981   :  { %v2256_v62 = vpack.c.bf16 %v2228_v8, %v2226_v25  ;;  %v2291_v25 = vpop.permute.xlu0 %2290 }
 0x982   :  { %v2257_v20 = vpack.c.bf16 %v2229_v6, %v2227_v31  ;;  %v2203_v59 = vpop.f32.mrb[88].mxu1 }
 0x983   :  { %v2204_v17 = vadd.f32 %v2203_v59, %v2099_v60  ;;  %v2205_v10 = vpop.f32.mrb[89].mxu1  ;;  %v3078_v59 = vld [vmem:[%s4619_s0 + $0x20] sm:$0xff] }
 0x984   :  { %v2206_v24 = vadd.f32 %v2205_v10, %v2099_v60  ;;  %v2207_v23 = vpop.f32.mrb[90].mxu1  ;;  %2424 = vmatprep.subr.bf16.mxu0 %v2257_v20 }
 0x985   :  { %v2208_v49 = vadd.f32 %v2207_v23, %v2104_v57  ;;  %v2209_v55 = vpop.f32.mrb[91].mxu1  ;;  %2425 = vmatpush1.bf16.msra.mxu0 %v2256_v62  ;;  %v2230_v47 = vmax.f32 %v2204_v17, 0.0  ;;  %v2296_v62 = vpop.permute.xlu1 %2295 }
 0x986   :  { %v2210_v33 = vadd.f32 %v2209_v55, %v2104_v57  ;;  %v2231_v44 = vmax.f32 %v2206_v24, 0.0  ;;  %v3079_v24 = vld [vmem:[%s4619_s0 + $0x28] sm:$0xff]  ;;  %v3080_v55 = vld [vmem:[%s4619_s0 + $0x30] sm:$0xff] }
 0x987   :  { %v2232_v32 = vmax.f32 %v2208_v49, 0.0 }
 0x988   :  { %v2233_v45 = vmax.f32 %v2210_v33, 0.0 }
 0x989   :  { %v2258_v21 = vpack.c.bf16 %v2232_v32, %v2230_v47  ;;  %v3081_v47 = vld [vmem:[%s4619_s0 + $0x38] sm:$0xff] }
 0x98a   :  { %v2259_v13 = vpack.c.bf16 %v2233_v45, %v2231_v44  ;;  %v2213_v40 = vpop.f32.mrb[92].mxu1  ;;  %v2301_v44 = vpop.permute.xlu0 %2300 }
 0x98b   :  { %v2214_v22 = vadd.f32 %v2213_v40, %v2109_v43  ;;  %v2215_v5 = vpop.f32.mrb[93].mxu1 }
 0x98c   :  { %v2216_v63 = vadd.f32 %v2215_v5, %v2109_v43  ;;  %v2217_v36 = vpop.f32.mrb[94].mxu1  ;;  %2426 = vmatprep.subr.bf16.mxu0 %v2259_v13  ;;  %v2306_v13 = vpop.permute.xlu1 %2305  ;;  %v3082_v5 = vld [vmem:[%s4619_s0 + $0x40] sm:$0xff] }
 0x98d   :  { %v2218_v15 = vadd.f32 %v2217_v36, %v2114_v18  ;;  %v2219_v35 = vpop.f32.mrb[95].mxu1  ;;  %2427 = vmatpush1.bf16.msra.mxu0 %v2258_v21  ;;  %v2234_v29 = vmax.f32 %v2214_v22, 0.0 }
 0x98e   :  { %v2220_v51 = vadd.f32 %v2219_v35, %v2114_v18  ;;  %v2235_v52 = vmax.f32 %v2216_v63, 0.0 }
 0x98f   :  { %v2236_v58 = vmax.f32 %v2218_v15, 0.0  ;;  %v3083_v15 = vld [vmem:[%s4619_s0 + $0x48] sm:$0xff] }
 0x990   :  { %v2237_v61 = vmax.f32 %v2220_v51, 0.0 }
 0x991   :  { %v2260_v34 = vpack.c.bf16 %v2236_v58, %v2234_v29  ;;  %v3084_v29 = vld [vmem:[%s4619_s0 + $0x50] sm:$0xff] }
 0x992   :  { %v2261_v37 = vpack.c.bf16 %v2237_v61, %v2235_v52  ;;  %v3085_v52 = vld [vmem:[%s4619_s0 + $0x58] sm:$0xff] }
 0x994   :  { %2428 = vmatprep.subr.bf16.mxu0 %v2261_v37 }
 0x995   :  { %2429 = vmatpush1.bf16.msra.mxu0 %v2260_v34  ;;  %v2311_v34 = vpop.permute.xlu0 %2310 }
 0x998   :  { %2677 = vmatmul.mubr.msk.bf16.vlgmr.msra.gmra.mrb[96].mxu0 %vm2136_vm0, %v2938_v0 }
 0x999   :  { %2464 = vmatprep.mubr.bf16.mxu0 %v4704_v4 }
 0x9a0   :  { %2678 = vmatmul.mubr.msk.bf16.gmra.mrb[100].mxu0 %vm2136_vm0, %v2939_v56 }
 0x9a1   :  { %2474 = vmatprep.mubr.bf16.mxu0 %v4704_v4 }
 0x9a8   :  { %2679 = vmatmul.mubr.msk.bf16.gmra.mrb[104].mxu0 %vm2136_vm0, %v2940_v48  ;;  %v2316_v48 = vpop.permute.xlu1 %2315 }
 0x9a9   :  { %2484 = vmatprep.mubr.bf16.mxu0 %v4704_v4 }
 0x9b0   :  { %2680 = vmatmul.mubr.msk.bf16.gmra.mrb[108].mxu0 %vm2136_vm0, %v2941_v28 }
 0x9b1   :  { %2494 = vmatprep.mubr.bf16.mxu0 %v4704_v4 }
 0x9b8   :  { %2681 = vmatmul.mubr.msk.bf16.gmra.mrb[112].mxu0 %vm2136_vm0, %v2942_v12 }
 0x9b9   :  { %2504 = vmatprep.mubr.bf16.mxu0 %v4704_v4 }
 0x9c0   :  { %2682 = vmatmul.mubr.msk.bf16.gmra.mrb[116].mxu0 %vm2136_vm0, %v2943_v41  ;;  %v3086_v41 = vld [vmem:[%s4619_s0 + $0x60] sm:$0xff] }
 0x9c1   :  { %2514 = vmatprep.mubr.bf16.mxu0 %v4704_v4 }
 0x9c8   :  { %2683 = vmatmul.mubr.msk.bf16.gmra.mrb[120].mxu0 %vm2136_vm0, %v2944_v19 }
 0x9c9   :  { %2524 = vmatprep.mubr.bf16.mxu0 %v4704_v4 }
 0x9d0   :  { %2684 = vmatmul.mubr.msk.bf16.gmra.mrb[124].mxu0 %vm2136_vm0, %v2945_v54 }
 0xa6b   :  { %v2456_v42 = vpop.f32.mrb[96].mxu0 }
 0xa6c   :  { %v2457_v38 = vadd.f32 %v2456_v42, %v2281_v50  ;;  %v2458_v7 = vpop.f32.mrb[97].mxu0  ;;  %v3087_v42 = vld [vmem:[%s4619_s0 + $0x68] sm:$0xff] }
 0xa6d   :  { %v2459_v30 = vadd.f32 %v2458_v7, %v2281_v50  ;;  %v2460_v16 = vpop.f32.mrb[98].mxu0 }
 0xa6e   :  { %v2535_v46 = vadd.f32 %v3074_v53, %v2457_v38  ;;  %v2461_v26 = vadd.f32 %v2460_v16, %v2286_v3  ;;  %v2462_v4 = vpop.f32.mrb[99].mxu0  ;;  %v3089_v16 = vld [vmem:[%s4619_s0 + $0x78] sm:$0xff] }
 0xa6f   :  { %v2536_v2 = vadd.f32 %v3075_v14, %v2459_v30  ;;  %v2463_v39 = vadd.f32 %v2462_v4, %v2286_v3  ;;  %v3088_v3 = vld [vmem:[%s4619_s0 + $0x70] sm:$0xff] }
 0xa70   :  { %2567 = vst [vmem:[#allocation7] sm:$0xff] %v2535_v46  ;;  %v2537_v1 = vadd.f32 %v3076_v11, %v2461_v26  ;;  %v2321_v46 = vpop.permute.xlu0 %2320 }
 0xa71   :  { %2568 = vst [vmem:[#allocation7 + $0x8] sm:$0xff] %v2536_v2  ;;  %v2538_v27 = vadd.f32 %v3077_v9, %v2463_v39  ;;  %v2326_v2 = vpop.permute.xlu1 %2325 }
 0xa72   :  { %2569 = vst [vmem:[#allocation7 + $0x10] sm:$0xff] %v2537_v1  ;;  %v3090_v1 = vld [vmem:[%s4619_s0 + $0x80] sm:$0xff] }
 0xa73   :  { %2570 = vst [vmem:[#allocation7 + $0x18] sm:$0xff] %v2538_v27  ;;  %v2466_v8 = vpop.f32.mrb[100].mxu0 }
 0xa74   :  { %v2467_v31 = vadd.f32 %v2466_v8, %v2291_v25  ;;  %v2468_v6 = vpop.f32.mrb[101].mxu0  ;;  %v3091_v8 = vld [vmem:[%s4619_s0 + $0x88] sm:$0xff] }
 0xa75   :  { %v2469_v60 = vadd.f32 %v2468_v6, %v2291_v25  ;;  %v2470_v20 = vpop.f32.mrb[102].mxu0 }
 0xa76   :  { %v2539_v17 = vadd.f32 %v3078_v59, %v2467_v31  ;;  %v2471_v10 = vadd.f32 %v2470_v20, %v2296_v62  ;;  %v2472_v57 = vpop.f32.mrb[103].mxu0  ;;  %v3093_v20 = vld [vmem:[%s4619_s0 + $0x98] sm:$0xff] }
 0xa77   :  { %v2540_v23 = vadd.f32 %v3079_v24, %v2469_v60  ;;  %v2473_v49 = vadd.f32 %v2472_v57, %v2296_v62  ;;  %v3092_v62 = vld [vmem:[%s4619_s0 + $0x90] sm:$0xff] }
 0xa78   :  { %2571 = vst [vmem:[#allocation7 + $0x20] sm:$0xff] %v2539_v17  ;;  %v2541_v33 = vadd.f32 %v3080_v55, %v2471_v10  ;;  %v2331_v17 = vpop.permute.xlu0 %2330 }
 0xa79   :  { %2572 = vst [vmem:[#allocation7 + $0x28] sm:$0xff] %v2540_v23  ;;  %v2542_v32 = vadd.f32 %v3081_v47, %v2473_v49  ;;  %v2336_v23 = vpop.permute.xlu1 %2335 }
 0xa7a   :  { %2573 = vst [vmem:[#allocation7 + $0x30] sm:$0xff] %v2541_v33  ;;  %v3094_v33 = vld [vmem:[%s4619_s0 + $0xa0] sm:$0xff] }
 0xa7b   :  { %2574 = vst [vmem:[#allocation7 + $0x38] sm:$0xff] %v2542_v32  ;;  %v2476_v45 = vpop.f32.mrb[104].mxu0 }
 0xa7c   :  { %v2477_v21 = vadd.f32 %v2476_v45, %v2301_v44  ;;  %v2478_v43 = vpop.f32.mrb[105].mxu0  ;;  %v3095_v45 = vld [vmem:[%s4619_s0 + $0xa8] sm:$0xff] }
 0xa7d   :  { %v2479_v40 = vadd.f32 %v2478_v43, %v2301_v44  ;;  %v2480_v22 = vpop.f32.mrb[106].mxu0 }
 0xa7e   :  { %v2543_v18 = vadd.f32 %v3082_v5, %v2477_v21  ;;  %v2481_v63 = vadd.f32 %v2480_v22, %v2306_v13  ;;  %v2482_v36 = vpop.f32.mrb[107].mxu0  ;;  %v3097_v22 = vld [vmem:[%s4619_s0 + $0xb8] sm:$0xff] }
 0xa7f   :  { %v2544_v35 = vadd.f32 %v3083_v15, %v2479_v40  ;;  %v2483_v51 = vadd.f32 %v2482_v36, %v2306_v13  ;;  %v3096_v13 = vld [vmem:[%s4619_s0 + $0xb0] sm:$0xff] }
 0xa80   :  { %2575 = vst [vmem:[#allocation7 + $0x40] sm:$0xff] %v2543_v18  ;;  %v2545_v58 = vadd.f32 %v3084_v29, %v2481_v63  ;;  %v2341_v18 = vpop.permute.xlu0 %2340 }
 0xa81   :  { %2576 = vst [vmem:[#allocation7 + $0x48] sm:$0xff] %v2544_v35  ;;  %v2546_v61 = vadd.f32 %v3085_v52, %v2483_v51  ;;  %v2346_v35 = vpop.permute.xlu1 %2345 }
 0xa82   :  { %2577 = vst [vmem:[#allocation7 + $0x50] sm:$0xff] %v2545_v58  ;;  %v3098_v58 = vld [vmem:[%s4619_s0 + $0xc0] sm:$0xff] }
 0xa83   :  { %2578 = vst [vmem:[#allocation7 + $0x58] sm:$0xff] %v2546_v61  ;;  %v2486_v37 = vpop.f32.mrb[108].mxu0 }
 0xa84   :  { %v2487_v0 = vadd.f32 %v2486_v37, %v2311_v34  ;;  %v2488_v56 = vpop.f32.mrb[109].mxu0  ;;  %v3099_v37 = vld [vmem:[%s4619_s0 + $0xc8] sm:$0xff] }
 0xa85   :  { %v2489_v28 = vadd.f32 %v2488_v56, %v2311_v34  ;;  %v2490_v12 = vpop.f32.mrb[110].mxu0 }
 0xa86   :  { %v2547_v19 = vadd.f32 %v3086_v41, %v2487_v0  ;;  %v2491_v54 = vadd.f32 %v2490_v12, %v2316_v48  ;;  %v2492_v50 = vpop.f32.mrb[111].mxu0  ;;  %v3101_v12 = vld [vmem:[%s4619_s0 + $0xd8] sm:$0xff] }
 0xa87   :  { %v2548_v38 = vadd.f32 %v3087_v42, %v2489_v28  ;;  %v2493_v7 = vadd.f32 %v2492_v50, %v2316_v48  ;;  %v3100_v48 = vld [vmem:[%s4619_s0 + $0xd0] sm:$0xff] }
 0xa88   :  { %2579 = vst [vmem:[#allocation7 + $0x60] sm:$0xff] %v2547_v19  ;;  %v2549_v30 = vadd.f32 %v3088_v3, %v2491_v54  ;;  %v2351_v19 = vpop.permute.xlu0 %2350 }
 0xa89   :  { %2580 = vst [vmem:[#allocation7 + $0x68] sm:$0xff] %v2548_v38  ;;  %v2550_v53 = vadd.f32 %v3089_v16, %v2493_v7  ;;  %v2356_v38 = vpop.permute.xlu1 %2355 }
 0xa8a   :  { %2581 = vst [vmem:[#allocation7 + $0x70] sm:$0xff] %v2549_v30  ;;  %v3102_v30 = vld [vmem:[%s4619_s0 + $0xe0] sm:$0xff] }
 0xa8b   :  { %2582 = vst [vmem:[#allocation7 + $0x78] sm:$0xff] %v2550_v53  ;;  %v2496_v26 = vpop.f32.mrb[112].mxu0 }
 0xa8c   :  { %v2497_v4 = vadd.f32 %v2496_v26, %v2321_v46  ;;  %v2498_v14 = vpop.f32.mrb[113].mxu0  ;;  %v3103_v26 = vld [vmem:[%s4619_s0 + $0xe8] sm:$0xff] }
 0xa8d   :  { %v2499_v39 = vadd.f32 %v2498_v14, %v2321_v46  ;;  %v2500_v11 = vpop.f32.mrb[114].mxu0 }
 0xa8e   :  { %v2551_v9 = vadd.f32 %v3090_v1, %v2497_v4  ;;  %v2501_v27 = vadd.f32 %v2500_v11, %v2326_v2  ;;  %v2502_v25 = vpop.f32.mrb[115].mxu0  ;;  %v3105_v11 = vld [vmem:[%s4619_s0 + $0xf8] sm:$0xff] }
 0xa8f   :  { %v2552_v31 = vadd.f32 %v3091_v8, %v2499_v39  ;;  %v2503_v6 = vadd.f32 %v2502_v25, %v2326_v2  ;;  %v3104_v2 = vld [vmem:[%s4619_s0 + $0xf0] sm:$0xff] }
 0xa90   :  { %2583 = vst [vmem:[#allocation7 + $0x80] sm:$0xff] %v2551_v9  ;;  %v2553_v60 = vadd.f32 %v3092_v62, %v2501_v27 }
 0xa91   :  { %2584 = vst [vmem:[#allocation7 + $0x88] sm:$0xff] %v2552_v31  ;;  %v2554_v59 = vadd.f32 %v3093_v20, %v2503_v6 }
 0xa92   :  { %2585 = vst [vmem:[#allocation7 + $0x90] sm:$0xff] %v2553_v60 }
 0xa93   :  { %2586 = vst [vmem:[#allocation7 + $0x98] sm:$0xff] %v2554_v59  ;;  %v2506_v10 = vpop.f32.mrb[116].mxu0 }
 0xa94   :  { %v2507_v57 = vadd.f32 %v2506_v10, %v2331_v17  ;;  %v2508_v24 = vpop.f32.mrb[117].mxu0 }
 0xa95   :  { %v2509_v49 = vadd.f32 %v2508_v24, %v2331_v17  ;;  %v2510_v55 = vpop.f32.mrb[118].mxu0 }
 0xa96   :  { %v2555_v47 = vadd.f32 %v3094_v33, %v2507_v57  ;;  %v2511_v32 = vadd.f32 %v2510_v55, %v2336_v23  ;;  %v2512_v44 = vpop.f32.mrb[119].mxu0 }
 0xa97   :  { %v2556_v21 = vadd.f32 %v3095_v45, %v2509_v49  ;;  %v2513_v43 = vadd.f32 %v2512_v44, %v2336_v23 }
 0xa98   :  { %2587 = vst [vmem:[#allocation7 + $0xa0] sm:$0xff] %v2555_v47  ;;  %v2557_v40 = vadd.f32 %v3096_v13, %v2511_v32 }
 0xa99   :  { %2588 = vst [vmem:[#allocation7 + $0xa8] sm:$0xff] %v2556_v21  ;;  %v2558_v5 = vadd.f32 %v3097_v22, %v2513_v43 }
 0xa9a   :  { %2589 = vst [vmem:[#allocation7 + $0xb0] sm:$0xff] %v2557_v40 }
 0xa9b   :  { %2590 = vst [vmem:[#allocation7 + $0xb8] sm:$0xff] %v2558_v5  ;;  %v2516_v63 = vpop.f32.mrb[120].mxu0 }
 0xa9c   :  { %v2517_v36 = vadd.f32 %v2516_v63, %v2341_v18  ;;  %v2518_v15 = vpop.f32.mrb[121].mxu0 }
 0xa9d   :  { %v2519_v51 = vadd.f32 %v2518_v15, %v2341_v18  ;;  %v2520_v29 = vpop.f32.mrb[122].mxu0 }
 0xa9e   :  { %v2559_v52 = vadd.f32 %v3098_v58, %v2517_v36  ;;  %v2521_v61 = vadd.f32 %v2520_v29, %v2346_v35  ;;  %v2522_v34 = vpop.f32.mrb[123].mxu0 }
 0xa9f   :  { %v2560_v0 = vadd.f32 %v3099_v37, %v2519_v51  ;;  %v2523_v56 = vadd.f32 %v2522_v34, %v2346_v35 }
 0xaa0   :  { %2591 = vst [vmem:[#allocation7 + $0xc0] sm:$0xff] %v2559_v52  ;;  %v2561_v28 = vadd.f32 %v3100_v48, %v2521_v61 }
 0xaa1   :  { %2592 = vst [vmem:[#allocation7 + $0xc8] sm:$0xff] %v2560_v0  ;;  %v2562_v41 = vadd.f32 %v3101_v12, %v2523_v56 }
 0xaa2   :  { %2593 = vst [vmem:[#allocation7 + $0xd0] sm:$0xff] %v2561_v28 }
 0xaa3   :  { %2594 = vst [vmem:[#allocation7 + $0xd8] sm:$0xff] %v2562_v41  ;;  %v2526_v54 = vpop.f32.mrb[124].mxu0 }
 0xaa4   :  { %v2527_v50 = vadd.f32 %v2526_v54, %v2351_v19  ;;  %v2528_v42 = vpop.f32.mrb[125].mxu0 }
 0xaa5   :  { %v2529_v7 = vadd.f32 %v2528_v42, %v2351_v19  ;;  %v2530_v3 = vpop.f32.mrb[126].mxu0 }
 0xaa6   :  { %v2563_v16 = vadd.f32 %v3102_v30, %v2527_v50  ;;  %v2531_v53 = vadd.f32 %v2530_v3, %v2356_v38  ;;  %v2532_v46 = vpop.f32.mrb[127].mxu0 }
 0xaa7   :  { %v2564_v4 = vadd.f32 %v3103_v26, %v2529_v7  ;;  %v2533_v14 = vadd.f32 %v2532_v46, %v2356_v38 }
 0xaa8   :  { %2595 = vst [vmem:[#allocation7 + $0xe0] sm:$0xff] %v2563_v16  ;;  %v2565_v39 = vadd.f32 %v3104_v2, %v2531_v53 }
 0xaa9   :  { %2596 = vst [vmem:[#allocation7 + $0xe8] sm:$0xff] %v2564_v4  ;;  %v2566_v1 = vadd.f32 %v3105_v11, %v2533_v14 }
 0xaaa   :  { %2597 = vst [vmem:[#allocation7 + $0xf0] sm:$0xff] %v2565_v39 }
 0xaab   :  { %2598 = vst [vmem:[#allocation7 + $0xf8] sm:$0xff] %v2566_v1 }
 0xaac   :  { %3161 = shalt.err (!%p3158_p6)
}
 0xaad   :  { %s3162_s12 = scalar_lea.hbm %s4630_s11, 4096 }
 0xaae   :  { %p3163_p7 = scmp.ne.s32.totalorder %s4630_s11, %s3162_s12  ;;  %p3166_p8 = scmp.lt.u32.totalorder %s3162_s12, %s4630_s11 }
 0xab0   :  { %p3168_p9 = pnand %p3166_p8, %p3163_p7 }
 0xab2   :  { %3171 = shalt.err (!%p3168_p9)
}
 0xab3   :  { %s3187_s15 = smov 256   ;;  %s3188_s16 = smov 16  }
 0xab4   :  { %2610 = dma.vmem_to_hbm [thread:$0]  %s2605_s26, 4096, %s4630_s11, [#allocation4], %s3187_s15, %s3187_s15, %s3188_s16  }
 0xab5   :  { %3176 = dma.done.wait [#allocation4], 4096  }
 0xab6   :  { %3177 = vsyncadd [#allocation4], 4294963200 }
 0xab7   :  { %2614 = vsyncpa [#allocation3], 1 }
 0xab8   :  { %2615 = vsyncpa [#allocation6], 1 }
 0xab9   :  { %2616 = vsyncpa [#allocation4], 1 }

</bundles_post_ra>
